<compile_context>
chip_gen: v7x
topology: tpu7x:2x2x1
jax: 0.10.0
libtpu: 0.0.40
codegen_flags: <defaults>
</compile_context>

<pallas_src>
import functools

import jax
import jax.numpy as jnp
from jax.experimental import pallas as pl
from jax.experimental.pallas import tpu as pltpu

LEAKY_SLOPE = 0.1
BN_EPS = 1e-5
_RESIDENT_W_BYTES = 8 * 1024 * 1024   # 1x1 weights below this stay VMEM-resident


def _pick_vmem_limit():
    """Generation-aware scoped-VMEM limit (~half of physical, clamped 32..96 MiB)."""
    try:
        cap = int(getattr(pltpu.get_tpu_info(), "vmem_capacity_bytes", 0) or 0)
        if cap > 0:
            return int(min(96 * 2**20, max(32 * 2**20, cap // 2)))
    except Exception:
        pass
    return 48 * 2**20


VMEM_LIMIT = _pick_vmem_limit()


# ----------------------------------------------------------------------------
# helpers
# ----------------------------------------------------------------------------
def _round_up(n, m):
    return ((n + m - 1) // m) * m


def _choose_tile(n, max_tile, align):
    """Largest `align`-aligned divisor of n that is <= max_tile, else n (full)."""
    if n <= max_tile:
        return n
    t = (max_tile // align) * align
    while t >= align:
        if n % t == 0:
            return t
        t -= align
    return n


def _leaky(y):
    return jnp.maximum(y, LEAKY_SLOPE * y)


# ----------------------------------------------------------------------------
# Kernel 1: fused 1x1 conv as matmul (bf16 in / f32 acc) + bias + leaky relu.
# Main path: weights resident (constant index map), grid over M tiles only.
# Fallback path (very large K): K-tiled reduction with f32 VMEM accumulator.
# ----------------------------------------------------------------------------
def _matmul_bias_leaky_kernel(x_ref, w_ref, b_ref, o_ref):
    y = jnp.dot(x_ref[...], w_ref[...], preferred_element_type=jnp.float32)
    o_ref[...] = _leaky(y + b_ref[...]).astype(o_ref.dtype)


def _matmul_bias_leaky_acc_kernel(x_ref, w_ref, b_ref, o_ref, acc_ref):
    k = pl.program_id(1)

    @pl.when(k == 0)
    def _init():
        acc_ref[...] = jnp.zeros_like(acc_ref)

    acc_ref[...] += jnp.dot(x_ref[...], w_ref[...],
                            preferred_element_type=jnp.float32)

    @pl.when(k == pl.num_programs(1) - 1)
    def _finalize():
        o_ref[...] = _leaky(acc_ref[...] + b_ref[...]).astype(o_ref.dtype)


def _fused_matmul_bias_leaky(xf, w, bias):
    """xf: (M, K) bf16, w: (K, Cout) bf16 (BN scale folded), bias: (Cout,) f32."""
    M, K = xf.shape
    Cout = w.shape[1]
    b2 = bias.reshape(1, Cout).astype(jnp.float32)
    tm = _choose_tile(M, 2048, 16)

    if K * Cout * w.dtype.itemsize <= _RESIDENT_W_BYTES:
        # Weight block index is constant -> stays resident across all M tiles;
        # no K grid axis, no f32 scratch, no init/finalize steps.
        return pl.pallas_call(
            _matmul_bias_leaky_kernel,
            out_shape=jax.ShapeDtypeStruct((M, Cout), xf.dtype),
            grid=(M // tm,),
            in_specs=[
                pl.BlockSpec((tm, K), lambda i: (i, 0)),
                pl.BlockSpec((K, Cout), lambda i: (0, 0)),
                pl.BlockSpec((1, Cout), lambda i: (0, 0)),
            ],
            out_specs=pl.BlockSpec((tm, Cout), lambda i: (i, 0)),
            compiler_params=pltpu.CompilerParams(
                dimension_semantics=("parallel",),
                vmem_limit_bytes=VMEM_LIMIT),
        )(xf, w, b2)

    tk = _choose_tile(K, 512, 128)
    return pl.pallas_call(
        _matmul_bias_leaky_acc_kernel,
        out_shape=jax.ShapeDtypeStruct((M, Cout), xf.dtype),
        grid=(M // tm, K // tk),
        in_specs=[
            pl.BlockSpec((tm, tk), lambda i, k: (i, k)),
            pl.BlockSpec((tk, Cout), lambda i, k: (k, 0)),
            pl.BlockSpec((1, Cout), lambda i, k: (0, 0)),
        ],
        out_specs=pl.BlockSpec((tm, Cout), lambda i, k: (i, 0)),
        scratch_shapes=[pltpu.VMEM((tm, Cout), jnp.float32)],
        compiler_params=pltpu.CompilerParams(
            dimension_semantics=("parallel", "arbitrary"),
            vmem_limit_bytes=VMEM_LIMIT),
    )(xf, w, b2)


def conv1x1_bn_leaky(x_nhwc, w_io, bias):
    N, H, W, Cin = x_nhwc.shape
    Cout = w_io.shape[1]
    y = _fused_matmul_bias_leaky(x_nhwc.reshape(N * H * W, Cin), w_io, bias)
    return y.reshape(N, H, W, Cout)


# ----------------------------------------------------------------------------
# Kernel 2: 3x3 conv.  All 9 taps are sliced in-kernel (VMEM) from one padded
# block; no im2col / width-shift concat in HBM.  W is rounded up to a sublane
# multiple inside the halo pad; the kernel stores exactly W output columns.
# Grid = (N, H row tiles, Cin tiles); Cin is the reduction axis (last).
# ----------------------------------------------------------------------------
def _conv3x3_kernel(xp_ref, w_ref, b_ref, o_ref, acc_ref, *, th, W, Wp):
    # xp_ref: (1, H+2, Wp+2, tkc) bf16    w_ref: (3, 3, tkc, Cout) bf16
    # b_ref:  (1, Cout) f32               o_ref: (1, th, W, Cout)
    # acc_ref: (th*Wp, Cout) f32
    h = pl.program_id(1)
    kc = pl.program_id(2)
    row0 = h * th

    @pl.when(kc == 0)
    def _init():
        acc_ref[...] = jnp.zeros_like(acc_ref)

    acc = acc_ref[...]
    for dy in range(3):                              # 9 taps of the 3x3 window
        rows = xp_ref[0, pl.ds(row0 + dy, th), :, :]     # (th, Wp+2, tkc)
        for dx in range(3):                          # dx shift = VMEM sublane slice
            patch = rows[:, dx:dx + Wp, :].reshape(th * Wp, -1)
            acc = acc + jnp.dot(patch, w_ref[dy, dx],
                                preferred_element_type=jnp.float32)
    acc_ref[...] = acc

    @pl.when(kc == pl.num_programs(2) - 1)
    def _finalize():
        y = acc.reshape(th, Wp, -1)[:, :W, :] + b_ref[...]
        o_ref[0] = _leaky(y).astype(o_ref.dtype)


def conv3x3_bn_leaky(x_nhwc, w_hwio, bias):
    N, H, W, Cin = x_nhwc.shape
    Cout = w_hwio.shape[-1]
    Wp = _round_up(W, 8)
    # One pad builds the +/-1 conv halo AND rounds W up to a sublane multiple.
    # Extra zero columns are never stored (the kernel writes exactly W).
    xp = jnp.pad(x_nhwc, ((0, 0), (1, 1), (1, 1 + Wp - W), (0, 0)))
    tkc = _choose_tile(Cin, 512, 128)
    th = _choose_tile(H, 32, 1)
    grid = (N, H // th, Cin // tkc)

    kernel = functools.partial(_conv3x3_kernel, th=th, W=W, Wp=Wp)
    return pl.pallas_call(
        kernel,
        out_shape=jax.ShapeDtypeStruct((N, H, W, Cout), x_nhwc.dtype),
        grid=grid,
        in_specs=[
            pl.BlockSpec((1, H + 2, Wp + 2, tkc), lambda n, h, k: (n, 0, 0, k)),
            pl.BlockSpec((3, 3, tkc, Cout), lambda n, h, k: (0, 0, k, 0)),
            pl.BlockSpec((1, Cout), lambda n, h, k: (0, 0)),
        ],
        out_specs=pl.BlockSpec((1, th, W, Cout), lambda n, h, k: (n, h, 0, 0)),
        scratch_shapes=[pltpu.VMEM((th * Wp, Cout), jnp.float32)],
        compiler_params=pltpu.CompilerParams(
            dimension_semantics=("parallel", "parallel", "arbitrary"),
            vmem_limit_bytes=VMEM_LIMIT),
    )(xp, w_hwio, bias.reshape(1, Cout).astype(jnp.float32))


# ----------------------------------------------------------------------------
# Kernel 3: upsample-branch 1x1 conv with nearest-2x upsample fused into the
# output.  The kernel writes an (N, H, 2, W, 2*Cout) f32 slab with two plain
# lane-dense plane stores (H duplication) and a lane concat (W duplication);
# its free row-major reshape to (N, 2H, 2W, Cout) IS the upsampled tensor.
# ----------------------------------------------------------------------------
def _conv1x1_upsample_kernel(x_ref, w_ref, b_ref, o_ref, *, th, W, Wp):
    # x_ref: (1, th, Wp, Cin) bf16   w_ref: (Cin, Cout) bf16   b_ref: (1, Cout)
    # o_ref: (1, th, 2, W, 2*Cout) f32
    Cin = x_ref.shape[-1]
    Cout = w_ref.shape[-1]
    x2d = x_ref[0].reshape(th * Wp, Cin)
    y = jnp.dot(x2d, w_ref[...], preferred_element_type=jnp.float32)
    y = _leaky(y + b_ref[...])
    y = y.reshape(th, Wp, Cout)[:, :W, :].astype(o_ref.dtype)
    yw = jnp.concatenate([y, y], axis=-1)        # W duplication packed on lanes
    o_ref[0, :, 0, :, :] = yw                    # H duplication: two plane stores
    o_ref[0, :, 1, :, :] = yw


def conv1x1_upsample_bn_leaky(x_nhwc, w_io, bias):
    """1x1 conv + BN(folded) + leaky + nearest-2x upsample -> (N,2H,2W,Cout) f32."""
    N, H, W, Cin = x_nhwc.shape
    Cout = w_io.shape[1]
    Wp = _round_up(W, 8)
    x_in = x_nhwc if Wp == W else jnp.pad(
        x_nhwc, ((0, 0), (0, 0), (0, Wp - W), (0, 0)))
    th = _choose_tile(H, 128, 1)
    kernel = functools.partial(_conv1x1_upsample_kernel, th=th, W=W, Wp=Wp)
    out = pl.pallas_call(
        kernel,
        out_shape=jax.ShapeDtypeStruct((N, H, 2, W, 2 * Cout), jnp.float32),
        grid=(N, H // th),
        in_specs=[
            pl.BlockSpec((1, th, Wp, Cin), lambda n, i: (n, i, 0, 0)),
            pl.BlockSpec((Cin, Cout), lambda n, i: (0, 0)),
            pl.BlockSpec((1, Cout), lambda n, i: (0, 0)),
        ],
        out_specs=pl.BlockSpec((1, th, 2, W, 2 * Cout),
                               lambda n, i: (n, i, 0, 0, 0)),
        compiler_params=pltpu.CompilerParams(
            dimension_semantics=("parallel", "parallel"),
            vmem_limit_bytes=VMEM_LIMIT),
    )(x_in, w_io, bias.reshape(1, Cout).astype(jnp.float32))
    # Free row-major reshape: (n, h, r, w, c2*Cout+c) -> (n, 2h+r, 2w+c2, c).
    return out.reshape(N, 2 * H, 2 * W, Cout)


# ----------------------------------------------------------------------------
# Parameters (synthetic, deterministic).  BN (eval mode) folded: scale into the
# bf16 weights, shift kept as an f32 bias.
# ----------------------------------------------------------------------------
def _init_darknet_conv(key, cin, cout, k):
    kw, kg, kb, km, kv = jax.random.split(key, 5)
    w = 0.05 * jax.random.normal(kw, (k, k, cin, cout), jnp.float32)   # HWIO
    gamma = 1.0 + 0.1 * jax.random.normal(kg, (cout,), jnp.float32)
    beta = 0.1 * jax.random.normal(kb, (cout,), jnp.float32)
    mean = 0.1 * jax.random.normal(km, (cout,), jnp.float32)
    var = jax.random.uniform(kv, (cout,), jnp.float32, minval=0.5, maxval=1.5)
    scale = gamma / jnp.sqrt(var + BN_EPS)
    bias = beta - mean * scale
    w_folded = (w * scale[None, None, None, :]).astype(jnp.bfloat16)
    return {"w": w_folded, "bias": bias}


def init_yolov3_upsample_block(key, in_channels, out_channels):
    keys = jax.random.split(key, 6)
    oc = out_channels
    return [
        _init_darknet_conv(keys[0], in_channels, oc // 2, 1),
        _init_darknet_conv(keys[1], oc // 2, oc, 3),
        _init_darknet_conv(keys[2], oc, oc // 2, 1),
        _init_darknet_conv(keys[3], oc // 2, oc, 3),
        _init_darknet_conv(keys[4], oc, oc // 2, 1),
        _init_darknet_conv(keys[5], oc // 2, oc // 4, 1),   # upsample branch
    ]


# ----------------------------------------------------------------------------
# Forward (matches YoloV3UpsampleBlock.forward)
# ----------------------------------------------------------------------------
def _apply_conv(h_nhwc, p):
    if p["w"].shape[0] == 1:                       # static shape -> python bool
        return conv1x1_bn_leaky(h_nhwc, p["w"][0, 0], p["bias"])
    return conv3x3_bn_leaky(h_nhwc, p["w"], p["bias"])


@jax.jit
def yolov3_upsample_block(params, x_nchw, route_nchw):
    h = jnp.transpose(x_nchw, (0, 2, 3, 1)).astype(jnp.bfloat16)   # NCHW->NHWC
    # TODO(synk): the 5-conv chain runs as 5 pallas_calls (one HBM round trip
    # per layer); fusing it into one call with VMEM-resident activations would
    # remove 4 activation passes but is not implemented here.
    for p in params[:5]:                                           # YoloV3ConvBlock
        h = _apply_conv(h, p)
    out1 = h                                                       # (N,H,W,oc//2)

    u = conv1x1_upsample_bn_leaky(out1, params[5]["w"][0, 0],
                                  params[5]["bias"])               # f32 (N,2H,2W,oc//4)
    route = jnp.transpose(route_nchw, (0, 2, 3, 1))
    # TODO(synk): the out2 channel concat with `route` and the NCHW<->NHWC
    # boundary transposes remain XLA data movement (kept to match the PyTorch
    # interface).
    out2 = jnp.concatenate([u, route], axis=-1)

    out1_nchw = jnp.transpose(out1.astype(jnp.float32), (0, 3, 1, 2))
    out2_nchw = jnp.transpose(out2, (0, 3, 1, 2))
    return out1_nchw, out2_nchw


# ----------------------------------------------------------------------------
# Pure-JAX reference (same bf16-in / f32-acc numerics) for correctness check
# ----------------------------------------------------------------------------
def _ref_layer(h_nchw_bf16, p, out_dtype=jnp.bfloat16):
    k = p["w"].shape[0]
    w_oihw = jnp.transpose(p["w"], (3, 2, 0, 1))
    pad = (k - 1) // 2
    y = jax.lax.conv_general_dilated(
        h_nchw_bf16, w_oihw, (1, 1), ((pad, pad), (pad, pad)),
        dimension_numbers=("NCHW", "OIHW", "NCHW"),
        preferred_element_type=jnp.float32)
    y = y + p["bias"][None, :, None, None]
    return _leaky(y).astype(out_dtype)


def ref_forward(params, x_nchw, route_nchw):
    h = x_nchw.astype(jnp.bfloat16)
    for p in params[:5]:
        h = _ref_layer(h, p)
    out1 = h.astype(jnp.float32)
    u = _ref_layer(h, params[5], out_dtype=jnp.float32)
    u = jnp.repeat(jnp.repeat(u, 2, axis=2), 2, axis=3)
    out2 = jnp.concatenate([u, route_nchw], axis=1)
    return out1, out2


# ----------------------------------------------------------------------------
if __name__ == "__main__":
    def run_case(seed, N, C, H, W, Cr):
        key = jax.random.PRNGKey(seed)
        k_param, k_x, k_r = jax.random.split(key, 3)
        params = init_yolov3_upsample_block(k_param, C, C)
        x = jax.random.normal(k_x, (N, C, H, W), jnp.float32)
        route = jax.random.normal(k_r, (N, Cr, 2 * H, 2 * W), jnp.float32)

        out1, out2 = yolov3_upsample_block(params, x, route)
        out1 = jax.block_until_ready(out1)
        out2 = jax.block_until_ready(out2)

        # Shape checks against the module's contract.
        assert out1.shape == (N, C // 2, H, W), out1.shape
        assert out2.shape == (N, C // 4 + Cr, 2 * H, 2 * W), out2.shape

        # Numerical check vs matching bf16/f32-acc reference.
        r1, r2 = ref_forward(params, x, route)
        assert jnp.allclose(out1, r1, atol=1e-2, rtol=1e-2), "out1 mismatch"
        assert jnp.allclose(out2, r2, atol=1e-2, rtol=1e-2), "out2 mismatch"

    # Aligned widths (previous fast path).
    run_case(0, N=2, C=16, H=16, W=16, Cr=8)
    # Real-YOLO-style unaligned spatial size (13x13) at tiny channel counts:
    # exercises the padded/cropped fast kernels (no im2col / repeat fallbacks).
    run_case(1, N=1, C=8, H=13, W=13, Cr=4)

    print("KERNEL_OK")
</pallas_src>

<mosaic_0001>
module attributes {stable_mosaic.version = 11 : i64} {
  func.func @_matmul_bias_leaky_kernel(%arg0: i32, %arg1: memref<512x16xbf16, #tpu.memory_space<vmem>>, %arg2: memref<16x8xbf16, #tpu.memory_space<vmem>>, %arg3: memref<1x8xf32, #tpu.memory_space<vmem>>, %arg4: memref<512x8xbf16, #tpu.memory_space<vmem>>) attributes {dimension_semantics = [#tpu.dimension_semantics<parallel>], iteration_bounds = array<i64: 1>, scalar_prefetch = 0 : i64, scratch_operands = 0 : i64, tpu.core_type = #tpu.core_type<tc>, window_params = [{transform_indices = @transform_0, window_bounds = array<i64: 512, 16>}, {pipeline_mode = #tpu.pipeline_mode<synchronous>, transform_indices = @transform_1, window_bounds = array<i64: 16, 8>}, {pipeline_mode = #tpu.pipeline_mode<synchronous>, transform_indices = @transform_2, window_bounds = array<i64: 1, 8>}, {transform_indices = @transform_3, window_bounds = array<i64: 512, 8>}]} {
    %c0 = arith.constant 0 : index
    %c0_0 = arith.constant 0 : index
    %0 = vector.load %arg1[%c0, %c0_0] : memref<512x16xbf16, #tpu.memory_space<vmem>>, vector<512x16xbf16>
    %c0_1 = arith.constant 0 : index
    %c0_2 = arith.constant 0 : index
    %1 = vector.load %arg2[%c0_1, %c0_2] : memref<16x8xbf16, #tpu.memory_space<vmem>>, vector<16x8xbf16>
    %cst = arith.constant dense<0.000000e+00> : vector<512x8xf32>
    %2 = tpu.matmul %0, %1, %cst {dimension_numbers = #tpu.dot_dimension_numbers<[1], [0], [0], [1], [0, 0, 1, 1], [], []>} : vector<512x16xbf16>, vector<16x8xbf16>, vector<512x8xf32> -> vector<512x8xf32>
    %c0_3 = arith.constant 0 : index
    %c0_4 = arith.constant 0 : index
    %3 = vector.load %arg3[%c0_3, %c0_4] : memref<1x8xf32, #tpu.memory_space<vmem>>, vector<1x8xf32>
    %4 = vector.broadcast %3 : vector<1x8xf32> to vector<512x8xf32>
    %5 = arith.addf %2, %4 : vector<512x8xf32>
    %cst_5 = arith.constant 1.000000e-01 : f32
    %6 = vector.broadcast %cst_5 : f32 to vector<512x8xf32>
    %7 = arith.mulf %6, %5 : vector<512x8xf32>
    %8 = arith.maximumf %5, %7 : vector<512x8xf32>
    %9 = arith.truncf %8 : vector<512x8xf32> to vector<512x8xbf16>
    %c0_6 = arith.constant 0 : index
    %c0_7 = arith.constant 0 : index
    %10 = vector.load %arg4[%c0_6, %c0_7] : memref<512x8xbf16, #tpu.memory_space<vmem>>, vector<512x8xbf16>
    tpu.vector_store %arg4[%c0_6, %c0_7], %9 {strides = array<i32>} : memref<512x8xbf16, #tpu.memory_space<vmem>>, vector<512x8xbf16>,
    return
  }
  func.func @transform_0(%arg0: i32) -> (i32, i32) {
    %c0_i32 = arith.constant 0 : i32
    %c0_i32_0 = arith.constant 0 : i32
    return %arg0, %c0_i32 : i32, i32
  }
  func.func @transform_1(%arg0: i32) -> (i32, i32) {
    %c0_i32 = arith.constant 0 : i32
    %c0_i32_0 = arith.constant 0 : i32
    %c0_i32_1 = arith.constant 0 : i32
    return %c0_i32, %c0_i32_0 : i32, i32
  }
  func.func @transform_2(%arg0: i32) -> (i32, i32) {
    %c0_i32 = arith.constant 0 : i32
    %c0_i32_0 = arith.constant 0 : i32
    %c0_i32_1 = arith.constant 0 : i32
    return %c0_i32, %c0_i32_0 : i32, i32
  }
  func.func @transform_3(%arg0: i32) -> (i32, i32) {
    %c0_i32 = arith.constant 0 : i32
    %c0_i32_0 = arith.constant 0 : i32
    return %arg0, %c0_i32 : i32, i32
  }
}

module attributes {stable_mosaic.version = 11 : i64} {
  func.func @_conv3x3_kernel(%arg0: i32, %arg1: i32, %arg2: i32, %arg3: memref<1x18x18x8xbf16, #tpu.memory_space<vmem>>, %arg4: memref<3x3x8x16xbf16, #tpu.memory_space<vmem>>, %arg5: memref<1x16xf32, #tpu.memory_space<vmem>>, %arg6: memref<1x16x16x16xbf16, #tpu.memory_space<vmem>>, %arg7: memref<256x16xf32, #tpu.memory_space<vmem>>) attributes {dimension_semantics = [#tpu.dimension_semantics<parallel>, #tpu.dimension_semantics<parallel>, #tpu.dimension_semantics<arbitrary>], iteration_bounds = array<i64: 2, 1, 1>, scalar_prefetch = 0 : i64, scratch_operands = 1 : i64, tpu.core_type = #tpu.core_type<tc>, window_params = [{transform_indices = @transform_0, window_bounds = array<i64: 1, 18, 18, 8>}, {transform_indices = @transform_1, window_bounds = array<i64: 3, 3, 8, 16>}, {pipeline_mode = #tpu.pipeline_mode<synchronous>, transform_indices = @transform_2, window_bounds = array<i64: 1, 16>}, {transform_indices = @transform_3, window_bounds = array<i64: 1, 16, 16, 16>}]} {
    %c16_i32 = arith.constant 16 : i32
    %0 = arith.muli %arg1, %c16_i32 : i32
    %c0_i32 = arith.constant 0 : i32
    %1 = arith.cmpi eq, %arg2, %c0_i32 : i32
    %2 = arith.extui %1 : i1 to i32
    %c0_i32_0 = arith.constant 0 : i32
    %3 = arith.cmpi ne, %2, %c0_i32_0 : i32
    scf.if %3 {
      %cst_58 = arith.constant 0.000000e+00 : f32
      %75 = vector.broadcast %cst_58 : f32 to vector<256x16xf32>
      %c0_59 = arith.constant 0 : index
      %c0_60 = arith.constant 0 : index
      %76 = vector.load %arg7[%c0_59, %c0_60] : memref<256x16xf32, #tpu.memory_space<vmem>>, vector<256x16xf32>
      tpu.vector_store %arg7[%c0_59, %c0_60], %75 {strides = array<i32>} : memref<256x16xf32, #tpu.memory_space<vmem>>, vector<256x16xf32>,
    } else {
    }
    %c0 = arith.constant 0 : index
    %c0_1 = arith.constant 0 : index
    %4 = vector.load %arg7[%c0, %c0_1] : memref<256x16xf32, #tpu.memory_space<vmem>>, vector<256x16xf32>
    %c0_i32_2 = arith.constant 0 : i32
    %5 = arith.addi %0, %c0_i32_2 : i32
    %c0_3 = arith.constant 0 : index
    %6 = arith.index_cast %5 : i32 to index
    %c0_4 = arith.constant 0 : index
    %c0_5 = arith.constant 0 : index
    %7 = vector.load %arg3[%c0_3, %6, %c0_4, %c0_5] : memref<1x18x18x8xbf16, #tpu.memory_space<vmem>>, vector<1x16x18x8xbf16>
    %8 = vector.shape_cast %7 : vector<1x16x18x8xbf16> to vector<16x18x8xbf16>
    %9 = vector.extract_strided_slice %8 {offsets = [0, 0, 0], sizes = [16, 16, 8], strides = [1, 1, 1]} : vector<16x18x8xbf16> to vector<16x16x8xbf16>
    %10 = vector.shape_cast %9 : vector<16x16x8xbf16> to vector<256x8xbf16>
    %c0_6 = arith.constant 0 : index
    %c0_7 = arith.constant 0 : index
    %c0_8 = arith.constant 0 : index
    %c0_9 = arith.constant 0 : index
    %11 = vector.load %arg4[%c0_6, %c0_7, %c0_8, %c0_9] : memref<3x3x8x16xbf16, #tpu.memory_space<vmem>>, vector<1x1x8x16xbf16>
    %12 = vector.shape_cast %11 : vector<1x1x8x16xbf16> to vector<8x16xbf16>
    %cst = arith.constant dense<0.000000e+00> : vector<256x16xf32>
    %13 = tpu.matmul %10, %12, %cst {dimension_numbers = #tpu.dot_dimension_numbers<[1], [0], [0], [1], [0, 0, 1, 1], [], []>} : vector<256x8xbf16>, vector<8x16xbf16>, vector<256x16xf32> -> vector<256x16xf32>
    %14 = arith.addf %4, %13 : vector<256x16xf32>
    %15 = vector.extract_strided_slice %8 {offsets = [0, 1, 0], sizes = [16, 16, 8], strides = [1, 1, 1]} : vector<16x18x8xbf16> to vector<16x16x8xbf16>
    %16 = vector.shape_cast %15 : vector<16x16x8xbf16> to vector<256x8xbf16>
    %c0_10 = arith.constant 0 : index
    %c1 = arith.constant 1 : index
    %c0_11 = arith.constant 0 : index
    %c0_12 = arith.constant 0 : index
    %17 = vector.load %arg4[%c0_10, %c1, %c0_11, %c0_12] : memref<3x3x8x16xbf16, #tpu.memory_space<vmem>>, vector<1x1x8x16xbf16>
    %18 = vector.shape_cast %17 : vector<1x1x8x16xbf16> to vector<8x16xbf16>
    %cst_13 = arith.constant dense<0.000000e+00> : vector<256x16xf32>
    %19 = tpu.matmul %16, %18, %cst_13 {dimension_numbers = #tpu.dot_dimension_numbers<[1], [0], [0], [1], [0, 0, 1, 1], [], []>} : vector<256x8xbf16>, vector<8x16xbf16>, vector<256x16xf32> -> vector<256x16xf32>
    %20 = arith.addf %14, %19 : vector<256x16xf32>
    %21 = vector.extract_strided_slice %8 {offsets = [0, 2, 0], sizes = [16, 16, 8], strides = [1, 1, 1]} : vector<16x18x8xbf16> to vector<16x16x8xbf16>
    %22 = vector.shape_cast %21 : vector<16x16x8xbf16> to vector<256x8xbf16>
    %c0_14 = arith.constant 0 : index
    %c2 = arith.constant 2 : index
    %c0_15 = arith.constant 0 : index
    %c0_16 = arith.constant 0 : index
    %23 = vector.load %arg4[%c0_14, %c2, %c0_15, %c0_16] : memref<3x3x8x16xbf16, #tpu.memory_space<vmem>>, vector<1x1x8x16xbf16>
    %24 = vector.shape_cast %23 : vector<1x1x8x16xbf16> to vector<8x16xbf16>
    %cst_17 = arith.constant dense<0.000000e+00> : vector<256x16xf32>
    %25 = tpu.matmul %22, %24, %cst_17 {dimension_numbers = #tpu.dot_dimension_numbers<[1], [0], [0], [1], [0, 0, 1, 1], [], []>} : vector<256x8xbf16>, vector<8x16xbf16>, vector<256x16xf32> -> vector<256x16xf32>
    %26 = arith.addf %20, %25 : vector<256x16xf32>
    %c1_i32 = arith.constant 1 : i32
    %27 = arith.addi %0, %c1_i32 : i32
    %c0_18 = arith.constant 0 : index
    %28 = arith.index_cast %27 : i32 to index
    %c0_19 = arith.constant 0 : index
    %c0_20 = arith.constant 0 : index
    %29 = vector.load %arg3[%c0_18, %28, %c0_19, %c0_20] : memref<1x18x18x8xbf16, #tpu.memory_space<vmem>>, vector<1x16x18x8xbf16>
    %30 = vector.shape_cast %29 : vector<1x16x18x8xbf16> to vector<16x18x8xbf16>
    %31 = vector.extract_strided_slice %30 {offsets = [0, 0, 0], sizes = [16, 16, 8], strides = [1, 1, 1]} : vector<16x18x8xbf16> to vector<16x16x8xbf16>
    %32 = vector.shape_cast %31 : vector<16x16x8xbf16> to vector<256x8xbf16>
    %c1_21 = arith.constant 1 : index
    %c0_22 = arith.constant 0 : index
    %c0_23 = arith.constant 0 : index
    %c0_24 = arith.constant 0 : index
    %33 = vector.load %arg4[%c1_21, %c0_22, %c0_23, %c0_24] : memref<3x3x8x16xbf16, #tpu.memory_space<vmem>>, vector<1x1x8x16xbf16>
    %34 = vector.shape_cast %33 : vector<1x1x8x16xbf16> to vector<8x16xbf16>
    %cst_25 = arith.constant dense<0.000000e+00> : vector<256x16xf32>
    %35 = tpu.matmul %32, %34, %cst_25 {dimension_numbers = #tpu.dot_dimension_numbers<[1], [0], [0], [1], [0, 0, 1, 1], [], []>} : vector<256x8xbf16>, vector<8x16xbf16>, vector<256x16xf32> -> vector<256x16xf32>
    %36 = arith.addf %26, %35 : vector<256x16xf32>
    %37 = vector.extract_strided_slice %30 {offsets = [0, 1, 0], sizes = [16, 16, 8], strides = [1, 1, 1]} : vector<16x18x8xbf16> to vector<16x16x8xbf16>
    %38 = vector.shape_cast %37 : vector<16x16x8xbf16> to vector<256x8xbf16>
    %c1_26 = arith.constant 1 : index
    %c1_27 = arith.constant 1 : index
    %c0_28 = arith.constant 0 : index
    %c0_29 = arith.constant 0 : index
    %39 = vector.load %arg4[%c1_26, %c1_27, %c0_28, %c0_29] : memref<3x3x8x16xbf16, #tpu.memory_space<vmem>>, vector<1x1x8x16xbf16>
    %40 = vector.shape_cast %39 : vector<1x1x8x16xbf16> to vector<8x16xbf16>
    %cst_30 = arith.constant dense<0.000000e+00> : vector<256x16xf32>
    %41 = tpu.matmul %38, %40, %cst_30 {dimension_numbers = #tpu.dot_dimension_numbers<[1], [0], [0], [1], [0, 0, 1, 1], [], []>} : vector<256x8xbf16>, vector<8x16xbf16>, vector<256x16xf32> -> vector<256x16xf32>
    %42 = arith.addf %36, %41 : vector<256x16xf32>
    %43 = vector.extract_strided_slice %30 {offsets = [0, 2, 0], sizes = [16, 16, 8], strides = [1, 1, 1]} : vector<16x18x8xbf16> to vector<16x16x8xbf16>
    %44 = vector.shape_cast %43 : vector<16x16x8xbf16> to vector<256x8xbf16>
    %c1_31 = arith.constant 1 : index
    %c2_32 = arith.constant 2 : index
    %c0_33 = arith.constant 0 : index
    %c0_34 = arith.constant 0 : index
    %45 = vector.load %arg4[%c1_31, %c2_32, %c0_33, %c0_34] : memref<3x3x8x16xbf16, #tpu.memory_space<vmem>>, vector<1x1x8x16xbf16>
    %46 = vector.shape_cast %45 : vector<1x1x8x16xbf16> to vector<8x16xbf16>
    %cst_35 = arith.constant dense<0.000000e+00> : vector<256x16xf32>
    %47 = tpu.matmul %44, %46, %cst_35 {dimension_numbers = #tpu.dot_dimension_numbers<[1], [0], [0], [1], [0, 0, 1, 1], [], []>} : vector<256x8xbf16>, vector<8x16xbf16>, vector<256x16xf32> -> vector<256x16xf32>
    %48 = arith.addf %42, %47 : vector<256x16xf32>
    %c2_i32 = arith.constant 2 : i32
    %49 = arith.addi %0, %c2_i32 : i32
    %c0_36 = arith.constant 0 : index
    %50 = arith.index_cast %49 : i32 to index
    %c0_37 = arith.constant 0 : index
    %c0_38 = arith.constant 0 : index
    %51 = vector.load %arg3[%c0_36, %50, %c0_37, %c0_38] : memref<1x18x18x8xbf16, #tpu.memory_space<vmem>>, vector<1x16x18x8xbf16>
    %52 = vector.shape_cast %51 : vector<1x16x18x8xbf16> to vector<16x18x8xbf16>
    %53 = vector.extract_strided_slice %52 {offsets = [0, 0, 0], sizes = [16, 16, 8], strides = [1, 1, 1]} : vector<16x18x8xbf16> to vector<16x16x8xbf16>
    %54 = vector.shape_cast %53 : vector<16x16x8xbf16> to vector<256x8xbf16>
    %c2_39 = arith.constant 2 : index
    %c0_40 = arith.constant 0 : index
    %c0_41 = arith.constant 0 : index
    %c0_42 = arith.constant 0 : index
    %55 = vector.load %arg4[%c2_39, %c0_40, %c0_41, %c0_42] : memref<3x3x8x16xbf16, #tpu.memory_space<vmem>>, vector<1x1x8x16xbf16>
    %56 = vector.shape_cast %55 : vector<1x1x8x16xbf16> to vector<8x16xbf16>
    %cst_43 = arith.constant dense<0.000000e+00> : vector<256x16xf32>
    %57 = tpu.matmul %54, %56, %cst_43 {dimension_numbers = #tpu.dot_dimension_numbers<[1], [0], [0], [1], [0, 0, 1, 1], [], []>} : vector<256x8xbf16>, vector<8x16xbf16>, vector<256x16xf32> -> vector<256x16xf32>
    %58 = arith.addf %48, %57 : vector<256x16xf32>
    %59 = vector.extract_strided_slice %52 {offsets = [0, 1, 0], sizes = [16, 16, 8], strides = [1, 1, 1]} : vector<16x18x8xbf16> to vector<16x16x8xbf16>
    %60 = vector.shape_cast %59 : vector<16x16x8xbf16> to vector<256x8xbf16>
    %c2_44 = arith.constant 2 : index
    %c1_45 = arith.constant 1 : index
    %c0_46 = arith.constant 0 : index
    %c0_47 = arith.constant 0 : index
    %61 = vector.load %arg4[%c2_44, %c1_45, %c0_46, %c0_47] : memref<3x3x8x16xbf16, #tpu.memory_space<vmem>>, vector<1x1x8x16xbf16>
    %62 = vector.shape_cast %61 : vector<1x1x8x16xbf16> to vector<8x16xbf16>
    %cst_48 = arith.constant dense<0.000000e+00> : vector<256x16xf32>
    %63 = tpu.matmul %60, %62, %cst_48 {dimension_numbers = #tpu.dot_dimension_numbers<[1], [0], [0], [1], [0, 0, 1, 1], [], []>} : vector<256x8xbf16>, vector<8x16xbf16>, vector<256x16xf32> -> vector<256x16xf32>
    %64 = arith.addf %58, %63 : vector<256x16xf32>
    %65 = vector.extract_strided_slice %52 {offsets = [0, 2, 0], sizes = [16, 16, 8], strides = [1, 1, 1]} : vector<16x18x8xbf16> to vector<16x16x8xbf16>
    %66 = vector.shape_cast %65 : vector<16x16x8xbf16> to vector<256x8xbf16>
    %c2_49 = arith.constant 2 : index
    %c2_50 = arith.constant 2 : index
    %c0_51 = arith.constant 0 : index
    %c0_52 = arith.constant 0 : index
    %67 = vector.load %arg4[%c2_49, %c2_50, %c0_51, %c0_52] : memref<3x3x8x16xbf16, #tpu.memory_space<vmem>>, vector<1x1x8x16xbf16>
    %68 = vector.shape_cast %67 : vector<1x1x8x16xbf16> to vector<8x16xbf16>
    %cst_53 = arith.constant dense<0.000000e+00> : vector<256x16xf32>
    %69 = tpu.matmul %66, %68, %cst_53 {dimension_numbers = #tpu.dot_dimension_numbers<[1], [0], [0], [1], [0, 0, 1, 1], [], []>} : vector<256x8xbf16>, vector<8x16xbf16>, vector<256x16xf32> -> vector<256x16xf32>
    %70 = arith.addf %64, %69 : vector<256x16xf32>
    %c0_54 = arith.constant 0 : index
    %c0_55 = arith.constant 0 : index
    %71 = vector.load %arg7[%c0_54, %c0_55] : memref<256x16xf32, #tpu.memory_space<vmem>>, vector<256x16xf32>
    tpu.vector_store %arg7[%c0_54, %c0_55], %70 {strides = array<i32>} : memref<256x16xf32, #tpu.memory_space<vmem>>, vector<256x16xf32>,
    %c0_i32_56 = arith.constant 0 : i32
    %72 = arith.cmpi eq, %arg2, %c0_i32_56 : i32
    %73 = arith.extui %72 : i1 to i32
    %c0_i32_57 = arith.constant 0 : i32
    %74 = arith.cmpi ne, %73, %c0_i32_57 : i32
    scf.if %74 {
      %75 = vector.shape_cast %70 : vector<256x16xf32> to vector<16x16x16xf32>
      %c0_58 = arith.constant 0 : index
      %c0_59 = arith.constant 0 : index
      %76 = vector.load %arg5[%c0_58, %c0_59] : memref<1x16xf32, #tpu.memory_space<vmem>>, vector<1x16xf32>
      %77 = vector.shape_cast %76 : vector<1x16xf32> to vector<1x1x16xf32>
      %78 = vector.broadcast %77 : vector<1x1x16xf32> to vector<16x16x16xf32>
      %79 = arith.addf %75, %78 : vector<16x16x16xf32>
      %cst_60 = arith.constant 1.000000e-01 : f32
      %80 = vector.broadcast %cst_60 : f32 to vector<16x16x16xf32>
      %81 = arith.mulf %80, %79 : vector<16x16x16xf32>
      %82 = arith.maximumf %79, %81 : vector<16x16x16xf32>
      %83 = arith.truncf %82 : vector<16x16x16xf32> to vector<16x16x16xbf16>
      %c0_61 = arith.constant 0 : index
      %c0_62 = arith.constant 0 : index
      %c0_63 = arith.constant 0 : index
      %c0_64 = arith.constant 0 : index
      %84 = vector.load %arg6[%c0_61, %c0_62, %c0_63, %c0_64] : memref<1x16x16x16xbf16, #tpu.memory_space<vmem>>, vector<1x16x16x16xbf16>
      %85 = vector.shape_cast %84 : vector<1x16x16x16xbf16> to vector<16x16x16xbf16>
      %86 = vector.shape_cast %83 : vector<16x16x16xbf16> to vector<1x16x16x16xbf16>
      tpu.vector_store %arg6[%c0_61, %c0_62, %c0_63, %c0_64], %86 {strides = array<i32>} : memref<1x16x16x16xbf16, #tpu.memory_space<vmem>>, vector<1x16x16x16xbf16>,
    } else {
    }
    return
  }
  func.func @transform_0(%arg0: i32, %arg1: i32, %arg2: i32) -> (i32, i32, i32, i32) {
    %c0_i32 = arith.constant 0 : i32
    %c0_i32_0 = arith.constant 0 : i32
    %c0_i32_1 = arith.constant 0 : i32
    return %arg0, %c0_i32, %c0_i32_0, %arg2 : i32, i32, i32, i32
  }
  func.func @transform_1(%arg0: i32, %arg1: i32, %arg2: i32) -> (i32, i32, i32, i32) {
    %c0_i32 = arith.constant 0 : i32
    %c0_i32_0 = arith.constant 0 : i32
    %c0_i32_1 = arith.constant 0 : i32
    %c0_i32_2 = arith.constant 0 : i32
    return %c0_i32, %c0_i32_0, %arg2, %c0_i32_1 : i32, i32, i32, i32
  }
  func.func @transform_2(%arg0: i32, %arg1: i32, %arg2: i32) -> (i32, i32) {
    %c0_i32 = arith.constant 0 : i32
    %c0_i32_0 = arith.constant 0 : i32
    %c0_i32_1 = arith.constant 0 : i32
    return %c0_i32, %c0_i32_0 : i32, i32
  }
  func.func @transform_3(%arg0: i32, %arg1: i32, %arg2: i32) -> (i32, i32, i32, i32) {
    %c0_i32 = arith.constant 0 : i32
    %c0_i32_0 = arith.constant 0 : i32
    %c0_i32_1 = arith.constant 0 : i32
    return %arg0, %arg1, %c0_i32, %c0_i32_0 : i32, i32, i32, i32
  }
}

module attributes {stable_mosaic.version = 11 : i64} {
  func.func @_conv1x1_upsample_kernel(%arg0: i32, %arg1: i32, %arg2: memref<1x16x16x8xbf16, #tpu.memory_space<vmem>>, %arg3: memref<8x4xbf16, #tpu.memory_space<vmem>>, %arg4: memref<1x4xf32, #tpu.memory_space<vmem>>, %arg5: memref<1x16x2x16x8xf32, #tpu.memory_space<vmem>>) attributes {dimension_semantics = [#tpu.dimension_semantics<parallel>, #tpu.dimension_semantics<parallel>], iteration_bounds = array<i64: 2, 1>, scalar_prefetch = 0 : i64, scratch_operands = 0 : i64, tpu.core_type = #tpu.core_type<tc>, window_params = [{transform_indices = @transform_0, window_bounds = array<i64: 1, 16, 16, 8>}, {pipeline_mode = #tpu.pipeline_mode<synchronous>, transform_indices = @transform_1, window_bounds = array<i64: 8, 4>}, {pipeline_mode = #tpu.pipeline_mode<synchronous>, transform_indices = @transform_2, window_bounds = array<i64: 1, 4>}, {transform_indices = @transform_3, window_bounds = array<i64: 1, 16, 2, 16, 8>}]} {
    %c0 = arith.constant 0 : index
    %c0_0 = arith.constant 0 : index
    %c0_1 = arith.constant 0 : index
    %c0_2 = arith.constant 0 : index
    %0 = vector.load %arg2[%c0, %c0_0, %c0_1, %c0_2] : memref<1x16x16x8xbf16, #tpu.memory_space<vmem>>, vector<1x16x16x8xbf16>
    %1 = vector.shape_cast %0 : vector<1x16x16x8xbf16> to vector<16x16x8xbf16>
    %2 = vector.shape_cast %1 : vector<16x16x8xbf16> to vector<256x8xbf16>
    %c0_3 = arith.constant 0 : index
    %c0_4 = arith.constant 0 : index
    %3 = vector.load %arg3[%c0_3, %c0_4] : memref<8x4xbf16, #tpu.memory_space<vmem>>, vector<8x4xbf16>
    %cst = arith.constant dense<0.000000e+00> : vector<256x4xf32>
    %4 = tpu.matmul %2, %3, %cst {dimension_numbers = #tpu.dot_dimension_numbers<[1], [0], [0], [1], [0, 0, 1, 1], [], []>} : vector<256x8xbf16>, vector<8x4xbf16>, vector<256x4xf32> -> vector<256x4xf32>
    %c0_5 = arith.constant 0 : index
    %c0_6 = arith.constant 0 : index
    %5 = vector.load %arg4[%c0_5, %c0_6] : memref<1x4xf32, #tpu.memory_space<vmem>>, vector<1x4xf32>
    %6 = vector.broadcast %5 : vector<1x4xf32> to vector<256x4xf32>
    %7 = arith.addf %4, %6 : vector<256x4xf32>
    %cst_7 = arith.constant 1.000000e-01 : f32
    %8 = vector.broadcast %cst_7 : f32 to vector<256x4xf32>
    %9 = arith.mulf %8, %7 : vector<256x4xf32>
    %10 = arith.maximumf %7, %9 : vector<256x4xf32>
    %11 = vector.shape_cast %10 : vector<256x4xf32> to vector<16x16x4xf32>
    %12 = tpu.concatenate %11, %11 in 2 : vector<16x16x4xf32>, vector<16x16x4xf32> -> vector<16x16x8xf32>
    %c0_8 = arith.constant 0 : index
    %c0_9 = arith.constant 0 : index
    %c0_10 = arith.constant 0 : index
    %c0_11 = arith.constant 0 : index
    %c0_12 = arith.constant 0 : index
    %13 = vector.load %arg5[%c0_8, %c0_9, %c0_10, %c0_11, %c0_12] : memref<1x16x2x16x8xf32, #tpu.memory_space<vmem>>, vector<1x16x1x16x8xf32>
    %14 = vector.shape_cast %13 : vector<1x16x1x16x8xf32> to vector<16x16x8xf32>
    %15 = vector.shape_cast %12 : vector<16x16x8xf32> to vector<1x16x1x16x8xf32>
    tpu.vector_store %arg5[%c0_8, %c0_9, %c0_10, %c0_11, %c0_12], %15 {strides = array<i32>} : memref<1x16x2x16x8xf32, #tpu.memory_space<vmem>>, vector<1x16x1x16x8xf32>,
    %c0_13 = arith.constant 0 : index
    %c0_14 = arith.constant 0 : index
    %c1 = arith.constant 1 : index
    %c0_15 = arith.constant 0 : index
    %c0_16 = arith.constant 0 : index
    %16 = vector.load %arg5[%c0_13, %c0_14, %c1, %c0_15, %c0_16] : memref<1x16x2x16x8xf32, #tpu.memory_space<vmem>>, vector<1x16x1x16x8xf32>
    %17 = vector.shape_cast %16 : vector<1x16x1x16x8xf32> to vector<16x16x8xf32>
    %18 = vector.shape_cast %12 : vector<16x16x8xf32> to vector<1x16x1x16x8xf32>
    tpu.vector_store %arg5[%c0_13, %c0_14, %c1, %c0_15, %c0_16], %18 {strides = array<i32>} : memref<1x16x2x16x8xf32, #tpu.memory_space<vmem>>, vector<1x16x1x16x8xf32>,
    return
  }
  func.func @transform_0(%arg0: i32, %arg1: i32) -> (i32, i32, i32, i32) {
    %c0_i32 = arith.constant 0 : i32
    %c0_i32_0 = arith.constant 0 : i32
    %c0_i32_1 = arith.constant 0 : i32
    return %arg0, %arg1, %c0_i32, %c0_i32_0 : i32, i32, i32, i32
  }
  func.func @transform_1(%arg0: i32, %arg1: i32) -> (i32, i32) {
    %c0_i32 = arith.constant 0 : i32
    %c0_i32_0 = arith.constant 0 : i32
    %c0_i32_1 = arith.constant 0 : i32
    return %c0_i32, %c0_i32_0 : i32, i32
  }
  func.func @transform_2(%arg0: i32, %arg1: i32) -> (i32, i32) {
    %c0_i32 = arith.constant 0 : i32
    %c0_i32_0 = arith.constant 0 : i32
    %c0_i32_1 = arith.constant 0 : i32
    return %c0_i32, %c0_i32_0 : i32, i32
  }
  func.func @transform_3(%arg0: i32, %arg1: i32) -> (i32, i32, i32, i32, i32) {
    %c0_i32 = arith.constant 0 : i32
    %c0_i32_0 = arith.constant 0 : i32
    %c0_i32_1 = arith.constant 0 : i32
    %c0_i32_2 = arith.constant 0 : i32
    return %arg0, %arg1, %c0_i32, %c0_i32_0, %c0_i32_1 : i32, i32, i32, i32, i32
  }
}

</mosaic_0001>

<bundles_post_ra>
// kernel: yolov3_upsample_block.6
= control target key start
LH: loop header
LB: loop body
LE: loop exit
PB: predicated region body
PF: predicated region fallthrough
CT: control target
= control target key end

     0   :  { %vm254_vm0 = vcmask 130048   ;;  %vm1024_vm1 = vcmask 60416   ;;  %s1897_s1 = inlined_call_operand.vmem [shape: bf16[16,8], index: 1, kind: input, shape index: {}]   ;;  %s1898_s0 = inlined_call_operand.vmem [shape: bf16[512,16], index: 0, kind: input, shape index: {}]   ;;  %s1899_s2 = inlined_call_operand.vmem [shape: f32[1,8], index: 2, kind: input, shape index: {}]   ;;  %s1900_s3 = inlined_call_operand.vmem [shape: bf16[512,8], index: 3, kind: output, shape index: {}]  }
   0x1   :  { %v1388_v0 = vld [vmem:[%s1897_s1] sm:$0xff]   ;;  %v1391_v3 = vld [vmem:[%s1898_s0 + $0x8] sm:$0xff]   ;;  %v1393_v5 = vld [vmem:[%s1898_s0 + $0x10] sm:$0xff]  }
   0x2   :  { %v1389_v1 = vld [vmem:[%s1898_s0] sm:$0xff]   ;;  %1320 = vmatprep.subr.bf16.mxu0 %v1388_v0  ;;  %1386 = vmatprep.subr.bf16.mxu1 %v1388_v0  ;;  %v1392_v4 = vld [vmem:[%s1898_s0 + $0x88] sm:$0xff]   ;;  %v1394_v6 = vld [vmem:[%s1898_s0 + $0x90] sm:$0xff]  }
   0x3   :  { %v1390_v2 = vld [vmem:[%s1898_s0 + $0x80] sm:$0xff]   ;;  %1321 = vmatpush3.bf16.msra.mxu0 %v1388_v0  ;;  %1387 = vmatpush3.bf16.msra.mxu1 %v1388_v0  ;;  %v1395_v7 = vld [vmem:[%s1898_s0 + $0x18] sm:$0xff]   ;;  %v1399_v11 = vld [vmem:[%s1898_s0 + $0x28] sm:$0xff]  }
   0x4   :  { %1322 = vmatprep.mubr.msk.bf16.mxu0 %vm254_vm0, %v1389_v1  ;;  %1354 = vmatprep.mubr.msk.bf16.mxu1 %vm254_vm0, %v1390_v2  ;;  %v1396_v8 = vld [vmem:[%s1898_s0 + $0x98] sm:$0xff]   ;;  %v1397_v9 = vld [vmem:[%s1898_s0 + $0x20] sm:$0xff]   ;;  %v1400_v12 = vld [vmem:[%s1898_s0 + $0xa8] sm:$0xff]  }
   0x5   :  { %v1398_v10 = vld [vmem:[%s1898_s0 + $0xa0] sm:$0xff]   ;;  %v1401_v13 = vld [vmem:[%s1898_s0 + $0x30] sm:$0xff]   ;;  %v1403_v15 = vld [vmem:[%s1898_s0 + $0x38] sm:$0xff]  }
   0x6   :  { %1323 = vmatmul.mubr.msk.bf16.vlgmr.msra.gmra.mrb[0].mxu0 %vm254_vm0, %v1391_v3  ;;  %1355 = vmatmul.mubr.msk.bf16.vlgmr.msra.gmra.mrb[0].mxu1 %vm254_vm0, %v1392_v4  ;;  %v1402_v14 = vld [vmem:[%s1898_s0 + $0xb0] sm:$0xff]   ;;  %v1404_v16 = vld [vmem:[%s1898_s0 + $0xb8] sm:$0xff]   ;;  %v1405_v17 = vld [vmem:[%s1898_s0 + $0x40] sm:$0xff]  }
   0x7   :  { %1326 = vmatprep.mubr.msk.bf16.mxu0 %vm254_vm0, %v1393_v5  ;;  %1358 = vmatprep.mubr.msk.bf16.mxu1 %vm254_vm0, %v1394_v6  ;;  %v1406_v18 = vld [vmem:[%s1898_s0 + $0xc0] sm:$0xff]   ;;  %v1407_v19 = vld [vmem:[%s1898_s0 + $0x48] sm:$0xff]   ;;  %v1409_v21 = vld [vmem:[%s1898_s0 + $0x50] sm:$0xff]  }
   0x8   :  { %v1408_v20 = vld [vmem:[%s1898_s0 + $0xc8] sm:$0xff]   ;;  %v1410_v22 = vld [vmem:[%s1898_s0 + $0xd0] sm:$0xff]   ;;  %v1411_v23 = vld [vmem:[%s1898_s0 + $0x58] sm:$0xff]  }
   0x9   :  { %v1412_v24 = vld [vmem:[%s1898_s0 + $0xd8] sm:$0xff]   ;;  %v1413_v25 = vld [vmem:[%s1898_s0 + $0x60] sm:$0xff]   ;;  %v1415_v27 = vld [vmem:[%s1898_s0 + $0x68] sm:$0xff]  }
   0xa   :  { %v1414_v26 = vld [vmem:[%s1898_s0 + $0xe0] sm:$0xff]   ;;  %v1416_v28 = vld [vmem:[%s1898_s0 + $0xe8] sm:$0xff]   ;;  %v1417_v29 = vld [vmem:[%s1898_s0 + $0x70] sm:$0xff]  }
   0xb   :  { %v1418_v30 = vld [vmem:[%s1898_s0 + $0xf0] sm:$0xff]   ;;  %v1419_v31 = vld [vmem:[%s1898_s0 + $0x78] sm:$0xff]   ;;  %v1575_v33 = vld [vmem:[%s1899_s2] ss:$0 sm:$0xff] }
   0xc   :  { %v1420_v32 = vld [vmem:[%s1898_s0 + $0xf8] sm:$0xff]  }
   0xe   :  { %1327 = vmatmul.mubr.msk.bf16.gmra.mrb[4].mxu0 %vm254_vm0, %v1395_v7  ;;  %1359 = vmatmul.mubr.msk.bf16.gmra.mrb[4].mxu1 %vm254_vm0, %v1396_v8 }
   0xf   :  { %1330 = vmatprep.mubr.msk.bf16.mxu0 %vm254_vm0, %v1397_v9  ;;  %1362 = vmatprep.mubr.msk.bf16.mxu1 %vm254_vm0, %v1398_v10 }
  0x16   :  { %1331 = vmatmul.mubr.msk.bf16.gmra.mrb[8].mxu0 %vm254_vm0, %v1399_v11  ;;  %1363 = vmatmul.mubr.msk.bf16.gmra.mrb[8].mxu1 %vm254_vm0, %v1400_v12 }
  0x17   :  { %1334 = vmatprep.mubr.msk.bf16.mxu0 %vm254_vm0, %v1401_v13  ;;  %1366 = vmatprep.mubr.msk.bf16.mxu1 %vm254_vm0, %v1402_v14 }
  0x1e   :  { %1335 = vmatmul.mubr.msk.bf16.gmra.mrb[12].mxu0 %vm254_vm0, %v1403_v15  ;;  %1367 = vmatmul.mubr.msk.bf16.gmra.mrb[12].mxu1 %vm254_vm0, %v1404_v16 }
  0x1f   :  { %1338 = vmatprep.mubr.msk.bf16.mxu0 %vm254_vm0, %v1405_v17  ;;  %1370 = vmatprep.mubr.msk.bf16.mxu1 %vm254_vm0, %v1406_v18 }
  0x26   :  { %1339 = vmatmul.mubr.msk.bf16.gmra.mrb[16].mxu0 %vm254_vm0, %v1407_v19  ;;  %1371 = vmatmul.mubr.msk.bf16.gmra.mrb[16].mxu1 %vm254_vm0, %v1408_v20 }
  0x27   :  { %1342 = vmatprep.mubr.msk.bf16.mxu0 %vm254_vm0, %v1409_v21  ;;  %1374 = vmatprep.mubr.msk.bf16.mxu1 %vm254_vm0, %v1410_v22 }
  0x2e   :  { %1343 = vmatmul.mubr.msk.bf16.gmra.mrb[20].mxu0 %vm254_vm0, %v1411_v23  ;;  %1375 = vmatmul.mubr.msk.bf16.gmra.mrb[20].mxu1 %vm254_vm0, %v1412_v24 }
  0x2f   :  { %1346 = vmatprep.mubr.msk.bf16.mxu0 %vm254_vm0, %v1413_v25  ;;  %1378 = vmatprep.mubr.msk.bf16.mxu1 %vm254_vm0, %v1414_v26 }
  0x36   :  { %1347 = vmatmul.mubr.msk.bf16.gmra.mrb[24].mxu0 %vm254_vm0, %v1415_v27  ;;  %1379 = vmatmul.mubr.msk.bf16.gmra.mrb[24].mxu1 %vm254_vm0, %v1416_v28 }
  0x37   :  { %1350 = vmatprep.mubr.msk.bf16.mxu0 %vm254_vm0, %v1417_v29  ;;  %1382 = vmatprep.mubr.msk.bf16.mxu1 %vm254_vm0, %v1418_v30 }
  0x3e   :  { %1351 = vmatmul.mubr.msk.bf16.gmra.mrb[28].mxu0 %vm254_vm0, %v1419_v31  ;;  %1383 = vmatmul.mubr.msk.bf16.gmra.mrb[28].mxu1 %vm254_vm0, %v1420_v32 }
  0xd9   :  { %v1324_v34 = vpop.f32.mrb[0].mxu0  ;;  %v1356_v35 = vpop.f32.mrb[0].mxu1 }
  0xda   :  { %v394_v36 = vadd.f32 %v1324_v34, %v1575_v33  ;;  %v522_v37 = vadd.f32 %v1356_v35, %v1575_v33  ;;  %v385_v38 = vpop.f32.mrb[1].mxu0  ;;  %v513_v39 = vpop.f32.mrb[1].mxu1 }
  0xdb   :  { %v386_v40 = vadd.f32 %v1575_v33, %v385_v38  ;;  %v514_v41 = vadd.f32 %v1575_v33, %v513_v39  ;;  %v1325_v42 = vpop.f32.mrb[2].mxu0  ;;  %v1357_v43 = vpop.f32.mrb[2].mxu1 }
  0xdc   :  { %v642_v44 = vmul.f32 0.1, %v394_v36  ;;  %v674_v45 = vmul.f32 0.1, %v522_v37  ;;  %v397_v46 = vadd.f32 %v1325_v42, %v1575_v33  ;;  %v525_v47 = vadd.f32 %v1357_v43, %v1575_v33  ;;  %v388_v48 = vpop.f32.mrb[3].mxu0  ;;  %v516_v49 = vpop.f32.mrb[3].mxu1 }
  0xdd   :  { %v640_v50 = vmul.f32 0.1, %v386_v40  ;;  %v672_v51 = vmul.f32 0.1, %v514_v41  ;;  %v389_v52 = vadd.f32 %v1575_v33, %v388_v48  ;;  %v517_v53 = vadd.f32 %v1575_v33, %v516_v49 }
  0xde   :  { %v706_v54 = vmax.f32 %v394_v36, %v642_v44  ;;  %v738_v55 = vmax.f32 %v522_v37, %v674_v45  ;;  %v643_v56 = vmul.f32 0.1, %v397_v46  ;;  %v675_v57 = vmul.f32 0.1, %v525_v47 }
  0xdf   :  { %v704_v58 = vmax.f32 %v386_v40, %v640_v50  ;;  %v736_v59 = vmax.f32 %v514_v41, %v672_v51  ;;  %v641_v60 = vmul.f32 0.1, %v389_v52  ;;  %v673_v61 = vmul.f32 0.1, %v517_v53 }
  0xe0   :  { %v1225_v62 = vpack.c.bf16 %v706_v54, %v706_v54  ;;  %v1257_v63 = vpack.c.bf16 %v738_v55, %v738_v55  ;;  %v707_v0 = vmax.f32 %v397_v46, %v643_v56  ;;  %v739_v1 = vmax.f32 %v525_v47, %v675_v57 }
  0xe1   :  { %v1223_v2 = vpack.c.bf16 %v704_v58, %v704_v58  ;;  %v1255_v3 = vpack.c.bf16 %v736_v59, %v736_v59  ;;  %v705_v4 = vmax.f32 %v389_v52, %v641_v60  ;;  %v737_v5 = vmax.f32 %v517_v53, %v673_v61  ;;  %v1328_v6 = vpop.f32.mrb[4].mxu0  ;;  %v1360_v7 = vpop.f32.mrb[4].mxu1 }
  0xe2   :  { %1027 = vst.msk [vmem:[%s1900_s3 + $0x8] sm:$0xf] %vm1024_vm1, %v1225_v62  ;;  %1059 = vst.msk [vmem:[%s1900_s3 + $0x88] sm:$0xf] %vm1024_vm1, %v1257_v63  ;;  %v1226_v8 = vpack.c.bf16 %v707_v0, %v707_v0  ;;  %v1258_v9 = vpack.c.bf16 %v739_v1, %v739_v1  ;;  %v410_v10 = vadd.f32 %v1328_v6, %v1575_v33  ;;  %v401_v12 = vpop.f32.mrb[5].mxu0  ;;  %v529_v13 = vpop.f32.mrb[5].mxu1 }
  0xe3   :  { %v538_v11 = vadd.f32 %v1360_v7, %v1575_v33  ;;  %1025 = vst.msk [vmem:[%s1900_s3] sm:$0xf] %vm1024_vm1, %v1223_v2  ;;  %1057 = vst.msk [vmem:[%s1900_s3 + $0x80] sm:$0xf] %vm1024_vm1, %v1255_v3  ;;  %v1224_v14 = vpack.c.bf16 %v705_v4, %v705_v4  ;;  %v1256_v15 = vpack.c.bf16 %v737_v5, %v737_v5  ;;  %v1329_v18 = vpop.f32.mrb[6].mxu0  ;;  %v1361_v19 = vpop.f32.mrb[6].mxu1 }
  0xe4   :  { %v402_v16 = vadd.f32 %v1575_v33, %v401_v12  ;;  %v530_v17 = vadd.f32 %v1575_v33, %v529_v13  ;;  %1028 = vst.msk [vmem:[%s1900_s3 + $0xc] sm:$0xf] %vm1024_vm1, %v1226_v8  ;;  %1060 = vst.msk [vmem:[%s1900_s3 + $0x8c] sm:$0xf] %vm1024_vm1, %v1258_v9  ;;  %v646_v20 = vmul.f32 0.1, %v410_v10  ;;  %v413_v22 = vadd.f32 %v1329_v18, %v1575_v33 }
  0xe5   :  { %v678_v21 = vmul.f32 0.1, %v538_v11  ;;  %v541_v23 = vadd.f32 %v1361_v19, %v1575_v33  ;;  %v404_v24 = vpop.f32.mrb[7].mxu0  ;;  %v532_v25 = vpop.f32.mrb[7].mxu1  ;;  %1026 = vst.msk [vmem:[%s1900_s3 + $0x4] sm:$0xf] %vm1024_vm1, %v1224_v14 }
  0xe6   :  { %1058 = vst.msk [vmem:[%s1900_s3 + $0x84] sm:$0xf] %vm1024_vm1, %v1256_v15  ;;  %v644_v26 = vmul.f32 0.1, %v402_v16  ;;  %v676_v27 = vmul.f32 0.1, %v530_v17  ;;  %v405_v28 = vadd.f32 %v1575_v33, %v404_v24  ;;  %v533_v29 = vadd.f32 %v1575_v33, %v532_v25 }
  0xe7   :  { %v710_v30 = vmax.f32 %v410_v10, %v646_v20  ;;  %v742_v31 = vmax.f32 %v538_v11, %v678_v21  ;;  %v647_v32 = vmul.f32 0.1, %v413_v22  ;;  %v679_v34 = vmul.f32 0.1, %v541_v23 }
  0xe8   :  { %v708_v35 = vmax.f32 %v402_v16, %v644_v26  ;;  %v740_v36 = vmax.f32 %v530_v17, %v676_v27  ;;  %v645_v37 = vmul.f32 0.1, %v405_v28  ;;  %v677_v38 = vmul.f32 0.1, %v533_v29 }
  0xe9   :  { %v1229_v39 = vpack.c.bf16 %v710_v30, %v710_v30  ;;  %v1261_v40 = vpack.c.bf16 %v742_v31, %v742_v31  ;;  %v711_v41 = vmax.f32 %v413_v22, %v647_v32  ;;  %v743_v42 = vmax.f32 %v541_v23, %v679_v34  ;;  %v1332_v47 = vpop.f32.mrb[8].mxu0  ;;  %v1364_v48 = vpop.f32.mrb[8].mxu1 }
  0xea   :  { %v1227_v43 = vpack.c.bf16 %v708_v35, %v708_v35  ;;  %v1259_v44 = vpack.c.bf16 %v740_v36, %v740_v36  ;;  %v709_v45 = vmax.f32 %v405_v28, %v645_v37  ;;  %v741_v46 = vmax.f32 %v533_v29, %v677_v38  ;;  %v417_v53 = vpop.f32.mrb[9].mxu0  ;;  %v545_v54 = vpop.f32.mrb[9].mxu1 }
  0xeb   :  { %1031 = vst.msk [vmem:[%s1900_s3 + $0x18] sm:$0xf] %vm1024_vm1, %v1229_v39  ;;  %1063 = vst.msk [vmem:[%s1900_s3 + $0x98] sm:$0xf] %vm1024_vm1, %v1261_v40  ;;  %v1230_v49 = vpack.c.bf16 %v711_v41, %v711_v41  ;;  %v1262_v50 = vpack.c.bf16 %v743_v42, %v743_v42  ;;  %v426_v51 = vadd.f32 %v1332_v47, %v1575_v33  ;;  %v1333_v59 = vpop.f32.mrb[10].mxu0  ;;  %v1365_v60 = vpop.f32.mrb[10].mxu1 }
  0xec   :  { %v554_v52 = vadd.f32 %v1364_v48, %v1575_v33  ;;  %1029 = vst.msk [vmem:[%s1900_s3 + $0x10] sm:$0xf] %vm1024_vm1, %v1227_v43  ;;  %1061 = vst.msk [vmem:[%s1900_s3 + $0x90] sm:$0xf] %vm1024_vm1, %v1259_v44  ;;  %v1228_v55 = vpack.c.bf16 %v709_v45, %v709_v45  ;;  %v1260_v56 = vpack.c.bf16 %v741_v46, %v741_v46  ;;  %v420_v1 = vpop.f32.mrb[11].mxu0  ;;  %v548_v2 = vpop.f32.mrb[11].mxu1 }
  0xed   :  { %v418_v57 = vadd.f32 %v1575_v33, %v417_v53  ;;  %v546_v58 = vadd.f32 %v1575_v33, %v545_v54  ;;  %1032 = vst.msk [vmem:[%s1900_s3 + $0x1c] sm:$0xf] %vm1024_vm1, %v1230_v49  ;;  %1064 = vst.msk [vmem:[%s1900_s3 + $0x9c] sm:$0xf] %vm1024_vm1, %v1262_v50  ;;  %v650_v61 = vmul.f32 0.1, %v426_v51  ;;  %v429_v63 = vadd.f32 %v1333_v59, %v1575_v33 }
  0xee   :  { %v682_v62 = vmul.f32 0.1, %v554_v52  ;;  %v557_v0 = vadd.f32 %v1365_v60, %v1575_v33  ;;  %1030 = vst.msk [vmem:[%s1900_s3 + $0x14] sm:$0xf] %vm1024_vm1, %v1228_v55  ;;  %1062 = vst.msk [vmem:[%s1900_s3 + $0x94] sm:$0xf] %vm1024_vm1, %v1260_v56  ;;  %v421_v5 = vadd.f32 %v1575_v33, %v420_v1  ;;  %v549_v6 = vadd.f32 %v1575_v33, %v548_v2 }
  0xef   :  { %v648_v3 = vmul.f32 0.1, %v418_v57  ;;  %v680_v4 = vmul.f32 0.1, %v546_v58  ;;  %v714_v7 = vmax.f32 %v426_v51, %v650_v61  ;;  %v651_v9 = vmul.f32 0.1, %v429_v63 }
  0xf0   :  { %v746_v8 = vmax.f32 %v554_v52, %v682_v62  ;;  %v683_v10 = vmul.f32 0.1, %v557_v0  ;;  %v649_v13 = vmul.f32 0.1, %v421_v5  ;;  %v681_v14 = vmul.f32 0.1, %v549_v6 }
  0xf1   :  { %v712_v11 = vmax.f32 %v418_v57, %v648_v3  ;;  %v744_v12 = vmax.f32 %v546_v58, %v680_v4  ;;  %v1233_v15 = vpack.c.bf16 %v714_v7, %v714_v7  ;;  %v715_v17 = vmax.f32 %v429_v63, %v651_v9  ;;  %v1336_v23 = vpop.f32.mrb[12].mxu0  ;;  %v1368_v24 = vpop.f32.mrb[12].mxu1 }
  0xf2   :  { %v1265_v16 = vpack.c.bf16 %v746_v8, %v746_v8  ;;  %v747_v18 = vmax.f32 %v557_v0, %v683_v10  ;;  %v713_v21 = vmax.f32 %v421_v5, %v649_v13  ;;  %v745_v22 = vmax.f32 %v549_v6, %v681_v14  ;;  %v433_v29 = vpop.f32.mrb[13].mxu0  ;;  %v561_v30 = vpop.f32.mrb[13].mxu1 }
  0xf3   :  { %v1231_v19 = vpack.c.bf16 %v712_v11, %v712_v11  ;;  %v1263_v20 = vpack.c.bf16 %v744_v12, %v744_v12  ;;  %1035 = vst.msk [vmem:[%s1900_s3 + $0x28] sm:$0xf] %vm1024_vm1, %v1233_v15  ;;  %v1234_v25 = vpack.c.bf16 %v715_v17, %v715_v17  ;;  %v442_v27 = vadd.f32 %v1336_v23, %v1575_v33  ;;  %v1337_v36 = vpop.f32.mrb[14].mxu0  ;;  %v1369_v37 = vpop.f32.mrb[14].mxu1 }
  0xf4   :  { %1067 = vst.msk [vmem:[%s1900_s3 + $0xa8] sm:$0xf] %vm1024_vm1, %v1265_v16  ;;  %v1266_v26 = vpack.c.bf16 %v747_v18, %v747_v18  ;;  %v570_v28 = vadd.f32 %v1368_v24, %v1575_v33  ;;  %v1232_v31 = vpack.c.bf16 %v713_v21, %v713_v21  ;;  %v1264_v32 = vpack.c.bf16 %v745_v22, %v745_v22  ;;  %v436_v42 = vpop.f32.mrb[15].mxu0  ;;  %v564_v43 = vpop.f32.mrb[15].mxu1 }
  0xf5   :  { %1033 = vst.msk [vmem:[%s1900_s3 + $0x20] sm:$0xf] %vm1024_vm1, %v1231_v19  ;;  %1065 = vst.msk [vmem:[%s1900_s3 + $0xa0] sm:$0xf] %vm1024_vm1, %v1263_v20  ;;  %v434_v34 = vadd.f32 %v1575_v33, %v433_v29  ;;  %v562_v35 = vadd.f32 %v1575_v33, %v561_v30  ;;  %v654_v38 = vmul.f32 0.1, %v442_v27  ;;  %v445_v40 = vadd.f32 %v1337_v36, %v1575_v33 }
  0xf6   :  { %1036 = vst.msk [vmem:[%s1900_s3 + $0x2c] sm:$0xf] %vm1024_vm1, %v1234_v25  ;;  %1068 = vst.msk [vmem:[%s1900_s3 + $0xac] sm:$0xf] %vm1024_vm1, %v1266_v26  ;;  %v686_v39 = vmul.f32 0.1, %v570_v28  ;;  %v573_v41 = vadd.f32 %v1369_v37, %v1575_v33  ;;  %v437_v46 = vadd.f32 %v1575_v33, %v436_v42  ;;  %v565_v47 = vadd.f32 %v1575_v33, %v564_v43 }
  0xf7   :  { %1034 = vst.msk [vmem:[%s1900_s3 + $0x24] sm:$0xf] %vm1024_vm1, %v1232_v31  ;;  %1066 = vst.msk [vmem:[%s1900_s3 + $0xa4] sm:$0xf] %vm1024_vm1, %v1264_v32  ;;  %v652_v44 = vmul.f32 0.1, %v434_v34  ;;  %v718_v48 = vmax.f32 %v442_v27, %v654_v38 }
  0xf8   :  { %v684_v45 = vmul.f32 0.1, %v562_v35  ;;  %v750_v49 = vmax.f32 %v570_v28, %v686_v39  ;;  %v655_v50 = vmul.f32 0.1, %v445_v40  ;;  %v687_v51 = vmul.f32 0.1, %v573_v41 }
  0xf9   :  { %v716_v52 = vmax.f32 %v434_v34, %v652_v44  ;;  %v653_v54 = vmul.f32 0.1, %v437_v46  ;;  %v685_v55 = vmul.f32 0.1, %v565_v47  ;;  %v1237_v56 = vpack.c.bf16 %v718_v48, %v718_v48  ;;  %v1340_v0 = vpop.f32.mrb[16].mxu0  ;;  %v1372_v1 = vpop.f32.mrb[16].mxu1 }
  0xfa   :  { %v748_v53 = vmax.f32 %v562_v35, %v684_v45  ;;  %v1269_v57 = vpack.c.bf16 %v750_v49, %v750_v49  ;;  %v719_v58 = vmax.f32 %v445_v40, %v655_v50  ;;  %v751_v59 = vmax.f32 %v573_v41, %v687_v51  ;;  %v449_v6 = vpop.f32.mrb[17].mxu0  ;;  %v577_v7 = vpop.f32.mrb[17].mxu1 }
  0xfb   :  { %v1235_v60 = vpack.c.bf16 %v716_v52, %v716_v52  ;;  %v717_v62 = vmax.f32 %v437_v46, %v653_v54  ;;  %v749_v63 = vmax.f32 %v565_v47, %v685_v55  ;;  %1039 = vst.msk [vmem:[%s1900_s3 + $0x38] sm:$0xf] %vm1024_vm1, %v1237_v56  ;;  %v458_v4 = vadd.f32 %v1340_v0, %v1575_v33  ;;  %v1341_v12 = vpop.f32.mrb[18].mxu0  ;;  %v1373_v13 = vpop.f32.mrb[18].mxu1 }
  0xfc   :  { %v1267_v61 = vpack.c.bf16 %v748_v53, %v748_v53  ;;  %1071 = vst.msk [vmem:[%s1900_s3 + $0xb8] sm:$0xf] %vm1024_vm1, %v1269_v57  ;;  %v1238_v2 = vpack.c.bf16 %v719_v58, %v719_v58  ;;  %v1270_v3 = vpack.c.bf16 %v751_v59, %v751_v59  ;;  %v586_v5 = vadd.f32 %v1372_v1, %v1575_v33  ;;  %v452_v18 = vpop.f32.mrb[19].mxu0  ;;  %v580_v19 = vpop.f32.mrb[19].mxu1 }
  0xfd   :  { %1037 = vst.msk [vmem:[%s1900_s3 + $0x30] sm:$0xf] %vm1024_vm1, %v1235_v60  ;;  %v1236_v8 = vpack.c.bf16 %v717_v62, %v717_v62  ;;  %v1268_v9 = vpack.c.bf16 %v749_v63, %v749_v63  ;;  %v450_v10 = vadd.f32 %v1575_v33, %v449_v6  ;;  %v578_v11 = vadd.f32 %v1575_v33, %v577_v7 }
  0xfe   :  { %1069 = vst.msk [vmem:[%s1900_s3 + $0xb0] sm:$0xf] %vm1024_vm1, %v1267_v61  ;;  %1040 = vst.msk [vmem:[%s1900_s3 + $0x3c] sm:$0xf] %vm1024_vm1, %v1238_v2  ;;  %v658_v14 = vmul.f32 0.1, %v458_v4  ;;  %v461_v16 = vadd.f32 %v1341_v12, %v1575_v33  ;;  %v589_v17 = vadd.f32 %v1373_v13, %v1575_v33  ;;  %v453_v22 = vadd.f32 %v1575_v33, %v452_v18 }
  0xff   :  { %1072 = vst.msk [vmem:[%s1900_s3 + $0xbc] sm:$0xf] %vm1024_vm1, %v1270_v3  ;;  %v690_v15 = vmul.f32 0.1, %v586_v5  ;;  %1038 = vst.msk [vmem:[%s1900_s3 + $0x34] sm:$0xf] %vm1024_vm1, %v1236_v8  ;;  %v581_v23 = vadd.f32 %v1575_v33, %v580_v19 }
 0x100   :  { %1070 = vst.msk [vmem:[%s1900_s3 + $0xb4] sm:$0xf] %vm1024_vm1, %v1268_v9  ;;  %v656_v20 = vmul.f32 0.1, %v450_v10  ;;  %v688_v21 = vmul.f32 0.1, %v578_v11  ;;  %v722_v24 = vmax.f32 %v458_v4, %v658_v14 }
 0x101   :  { %v754_v25 = vmax.f32 %v586_v5, %v690_v15  ;;  %v659_v26 = vmul.f32 0.1, %v461_v16  ;;  %v691_v27 = vmul.f32 0.1, %v589_v17  ;;  %v657_v30 = vmul.f32 0.1, %v453_v22 }
 0x102   :  { %v720_v28 = vmax.f32 %v450_v10, %v656_v20  ;;  %v752_v29 = vmax.f32 %v578_v11, %v688_v21  ;;  %v689_v31 = vmul.f32 0.1, %v581_v23  ;;  %v1241_v32 = vpack.c.bf16 %v722_v24, %v722_v24  ;;  %v1344_v41 = vpop.f32.mrb[20].mxu0  ;;  %v1376_v42 = vpop.f32.mrb[20].mxu1 }
 0x103   :  { %v1273_v34 = vpack.c.bf16 %v754_v25, %v754_v25  ;;  %v723_v35 = vmax.f32 %v461_v16, %v659_v26  ;;  %v755_v36 = vmax.f32 %v589_v17, %v691_v27  ;;  %v721_v39 = vmax.f32 %v453_v22, %v657_v30  ;;  %v465_v47 = vpop.f32.mrb[21].mxu0  ;;  %v593_v48 = vpop.f32.mrb[21].mxu1 }
 0x104   :  { %v1239_v37 = vpack.c.bf16 %v720_v28, %v720_v28  ;;  %v1271_v38 = vpack.c.bf16 %v752_v29, %v752_v29  ;;  %v753_v40 = vmax.f32 %v581_v23, %v689_v31  ;;  %1043 = vst.msk [vmem:[%s1900_s3 + $0x48] sm:$0xf] %vm1024_vm1, %v1241_v32  ;;  %v474_v45 = vadd.f32 %v1344_v41, %v1575_v33  ;;  %v1345_v53 = vpop.f32.mrb[22].mxu0  ;;  %v1377_v54 = vpop.f32.mrb[22].mxu1 }
 0x105   :  { %1075 = vst.msk [vmem:[%s1900_s3 + $0xc8] sm:$0xf] %vm1024_vm1, %v1273_v34  ;;  %v1242_v43 = vpack.c.bf16 %v723_v35, %v723_v35  ;;  %v1274_v44 = vpack.c.bf16 %v755_v36, %v755_v36  ;;  %v602_v46 = vadd.f32 %v1376_v42, %v1575_v33  ;;  %v1240_v49 = vpack.c.bf16 %v721_v39, %v721_v39  ;;  %v468_v59 = vpop.f32.mrb[23].mxu0  ;;  %v596_v60 = vpop.f32.mrb[23].mxu1 }
 0x106   :  { %1041 = vst.msk [vmem:[%s1900_s3 + $0x40] sm:$0xf] %vm1024_vm1, %v1239_v37  ;;  %1073 = vst.msk [vmem:[%s1900_s3 + $0xc0] sm:$0xf] %vm1024_vm1, %v1271_v38  ;;  %v1272_v50 = vpack.c.bf16 %v753_v40, %v753_v40  ;;  %v466_v51 = vadd.f32 %v1575_v33, %v465_v47  ;;  %v594_v52 = vadd.f32 %v1575_v33, %v593_v48  ;;  %v662_v55 = vmul.f32 0.1, %v474_v45 }
 0x107   :  { %1044 = vst.msk [vmem:[%s1900_s3 + $0x4c] sm:$0xf] %vm1024_vm1, %v1242_v43  ;;  %1076 = vst.msk [vmem:[%s1900_s3 + $0xcc] sm:$0xf] %vm1024_vm1, %v1274_v44  ;;  %v694_v56 = vmul.f32 0.1, %v602_v46  ;;  %v477_v57 = vadd.f32 %v1345_v53, %v1575_v33  ;;  %v605_v58 = vadd.f32 %v1377_v54, %v1575_v33  ;;  %v469_v63 = vadd.f32 %v1575_v33, %v468_v59 }
 0x108   :  { %1042 = vst.msk [vmem:[%s1900_s3 + $0x44] sm:$0xf] %vm1024_vm1, %v1240_v49  ;;  %1074 = vst.msk [vmem:[%s1900_s3 + $0xc4] sm:$0xf] %vm1024_vm1, %v1272_v50  ;;  %v660_v61 = vmul.f32 0.1, %v466_v51  ;;  %v597_v0 = vadd.f32 %v1575_v33, %v596_v60  ;;  %v726_v1 = vmax.f32 %v474_v45, %v662_v55 }
 0x109   :  { %v692_v62 = vmul.f32 0.1, %v594_v52  ;;  %v758_v2 = vmax.f32 %v602_v46, %v694_v56  ;;  %v663_v3 = vmul.f32 0.1, %v477_v57  ;;  %v695_v4 = vmul.f32 0.1, %v605_v58 }
 0x10a   :  { %v724_v5 = vmax.f32 %v466_v51, %v660_v61  ;;  %v661_v7 = vmul.f32 0.1, %v469_v63  ;;  %v693_v8 = vmul.f32 0.1, %v597_v0  ;;  %v1245_v9 = vpack.c.bf16 %v726_v1, %v726_v1  ;;  %v1348_v17 = vpop.f32.mrb[24].mxu0  ;;  %v1380_v18 = vpop.f32.mrb[24].mxu1 }
 0x10b   :  { %v756_v6 = vmax.f32 %v594_v52, %v692_v62  ;;  %v1277_v10 = vpack.c.bf16 %v758_v2, %v758_v2  ;;  %v727_v11 = vmax.f32 %v477_v57, %v663_v3  ;;  %v759_v12 = vmax.f32 %v605_v58, %v695_v4  ;;  %v481_v23 = vpop.f32.mrb[25].mxu0  ;;  %v609_v24 = vpop.f32.mrb[25].mxu1 }
 0x10c   :  { %v1243_v13 = vpack.c.bf16 %v724_v5, %v724_v5  ;;  %v725_v15 = vmax.f32 %v469_v63, %v661_v7  ;;  %v757_v16 = vmax.f32 %v597_v0, %v693_v8  ;;  %1047 = vst.msk [vmem:[%s1900_s3 + $0x58] sm:$0xf] %vm1024_vm1, %v1245_v9  ;;  %v490_v21 = vadd.f32 %v1348_v17, %v1575_v33  ;;  %v1349_v29 = vpop.f32.mrb[26].mxu0  ;;  %v1381_v30 = vpop.f32.mrb[26].mxu1 }
 0x10d   :  { %v1275_v14 = vpack.c.bf16 %v756_v6, %v756_v6  ;;  %1079 = vst.msk [vmem:[%s1900_s3 + $0xd8] sm:$0xf] %vm1024_vm1, %v1277_v10  ;;  %v1246_v19 = vpack.c.bf16 %v727_v11, %v727_v11  ;;  %v1278_v20 = vpack.c.bf16 %v759_v12, %v759_v12  ;;  %v618_v22 = vadd.f32 %v1380_v18, %v1575_v33  ;;  %v484_v36 = vpop.f32.mrb[27].mxu0  ;;  %v612_v37 = vpop.f32.mrb[27].mxu1 }
 0x10e   :  { %1045 = vst.msk [vmem:[%s1900_s3 + $0x50] sm:$0xf] %vm1024_vm1, %v1243_v13  ;;  %v1244_v25 = vpack.c.bf16 %v725_v15, %v725_v15  ;;  %v1276_v26 = vpack.c.bf16 %v757_v16, %v757_v16  ;;  %v482_v27 = vadd.f32 %v1575_v33, %v481_v23  ;;  %v610_v28 = vadd.f32 %v1575_v33, %v609_v24 }
 0x10f   :  { %1077 = vst.msk [vmem:[%s1900_s3 + $0xd0] sm:$0xf] %vm1024_vm1, %v1275_v14  ;;  %1048 = vst.msk [vmem:[%s1900_s3 + $0x5c] sm:$0xf] %vm1024_vm1, %v1246_v19  ;;  %v666_v31 = vmul.f32 0.1, %v490_v21  ;;  %v493_v34 = vadd.f32 %v1349_v29, %v1575_v33  ;;  %v621_v35 = vadd.f32 %v1381_v30, %v1575_v33  ;;  %v485_v40 = vadd.f32 %v1575_v33, %v484_v36 }
 0x110   :  { %1080 = vst.msk [vmem:[%s1900_s3 + $0xdc] sm:$0xf] %vm1024_vm1, %v1278_v20  ;;  %v698_v32 = vmul.f32 0.1, %v618_v22  ;;  %1046 = vst.msk [vmem:[%s1900_s3 + $0x54] sm:$0xf] %vm1024_vm1, %v1244_v25  ;;  %v613_v41 = vadd.f32 %v1575_v33, %v612_v37 }
 0x111   :  { %1078 = vst.msk [vmem:[%s1900_s3 + $0xd4] sm:$0xf] %vm1024_vm1, %v1276_v26  ;;  %v664_v38 = vmul.f32 0.1, %v482_v27  ;;  %v696_v39 = vmul.f32 0.1, %v610_v28  ;;  %v730_v42 = vmax.f32 %v490_v21, %v666_v31 }
 0x112   :  { %v762_v43 = vmax.f32 %v618_v22, %v698_v32  ;;  %v667_v44 = vmul.f32 0.1, %v493_v34  ;;  %v699_v45 = vmul.f32 0.1, %v621_v35  ;;  %v665_v48 = vmul.f32 0.1, %v485_v40 }
 0x113   :  { %v728_v46 = vmax.f32 %v482_v27, %v664_v38  ;;  %v760_v47 = vmax.f32 %v610_v28, %v696_v39  ;;  %v697_v49 = vmul.f32 0.1, %v613_v41  ;;  %v1249_v50 = vpack.c.bf16 %v730_v42, %v730_v42  ;;  %v1352_v58 = vpop.f32.mrb[28].mxu0  ;;  %v1384_v59 = vpop.f32.mrb[28].mxu1 }
 0x114   :  { %v1281_v51 = vpack.c.bf16 %v762_v43, %v762_v43  ;;  %v731_v52 = vmax.f32 %v493_v34, %v667_v44  ;;  %v763_v53 = vmax.f32 %v621_v35, %v699_v45  ;;  %v729_v56 = vmax.f32 %v485_v40, %v665_v48  ;;  %v497_v0 = vpop.f32.mrb[29].mxu0  ;;  %v625_v1 = vpop.f32.mrb[29].mxu1 }
 0x115   :  { %v1247_v54 = vpack.c.bf16 %v728_v46, %v728_v46  ;;  %v1279_v55 = vpack.c.bf16 %v760_v47, %v760_v47  ;;  %v761_v57 = vmax.f32 %v613_v41, %v697_v49  ;;  %1051 = vst.msk [vmem:[%s1900_s3 + $0x68] sm:$0xf] %vm1024_vm1, %v1249_v50  ;;  %v506_v62 = vadd.f32 %v1352_v58, %v1575_v33  ;;  %v1353_v6 = vpop.f32.mrb[30].mxu0  ;;  %v1385_v7 = vpop.f32.mrb[30].mxu1 }
 0x116   :  { %1083 = vst.msk [vmem:[%s1900_s3 + $0xe8] sm:$0xf] %vm1024_vm1, %v1281_v51  ;;  %v1250_v60 = vpack.c.bf16 %v731_v52, %v731_v52  ;;  %v1282_v61 = vpack.c.bf16 %v763_v53, %v763_v53  ;;  %v634_v63 = vadd.f32 %v1384_v59, %v1575_v33  ;;  %v1248_v2 = vpack.c.bf16 %v729_v56, %v729_v56  ;;  %v500_v12 = vpop.f32.mrb[31].mxu0  ;;  %v628_v13 = vpop.f32.mrb[31].mxu1 }
 0x117   :  { %1049 = vst.msk [vmem:[%s1900_s3 + $0x60] sm:$0xf] %vm1024_vm1, %v1247_v54  ;;  %1081 = vst.msk [vmem:[%s1900_s3 + $0xe0] sm:$0xf] %vm1024_vm1, %v1279_v55  ;;  %v1280_v3 = vpack.c.bf16 %v761_v57, %v761_v57  ;;  %v498_v4 = vadd.f32 %v1575_v33, %v497_v0  ;;  %v626_v5 = vadd.f32 %v1575_v33, %v625_v1  ;;  %v670_v8 = vmul.f32 0.1, %v506_v62 }
 0x118   :  { %1052 = vst.msk [vmem:[%s1900_s3 + $0x6c] sm:$0xf] %vm1024_vm1, %v1250_v60  ;;  %1084 = vst.msk [vmem:[%s1900_s3 + $0xec] sm:$0xf] %vm1024_vm1, %v1282_v61  ;;  %v702_v9 = vmul.f32 0.1, %v634_v63  ;;  %v509_v10 = vadd.f32 %v1353_v6, %v1575_v33  ;;  %v637_v11 = vadd.f32 %v1385_v7, %v1575_v33  ;;  %v501_v16 = vadd.f32 %v1575_v33, %v500_v12 }
 0x119   :  { %1050 = vst.msk [vmem:[%s1900_s3 + $0x64] sm:$0xf] %vm1024_vm1, %v1248_v2  ;;  %1082 = vst.msk [vmem:[%s1900_s3 + $0xe4] sm:$0xf] %vm1024_vm1, %v1280_v3  ;;  %v668_v14 = vmul.f32 0.1, %v498_v4  ;;  %v629_v17 = vadd.f32 %v1575_v33, %v628_v13  ;;  %v734_v18 = vmax.f32 %v506_v62, %v670_v8 }
 0x11a   :  { %v700_v15 = vmul.f32 0.1, %v626_v5  ;;  %v766_v19 = vmax.f32 %v634_v63, %v702_v9  ;;  %v671_v20 = vmul.f32 0.1, %v509_v10  ;;  %v703_v21 = vmul.f32 0.1, %v637_v11 }
 0x11b   :  { %v732_v22 = vmax.f32 %v498_v4, %v668_v14  ;;  %v669_v24 = vmul.f32 0.1, %v501_v16  ;;  %v701_v25 = vmul.f32 0.1, %v629_v17  ;;  %v1253_v26 = vpack.c.bf16 %v734_v18, %v734_v18 }
 0x11c   :  { %v764_v23 = vmax.f32 %v626_v5, %v700_v15  ;;  %v1285_v27 = vpack.c.bf16 %v766_v19, %v766_v19  ;;  %v735_v28 = vmax.f32 %v509_v10, %v671_v20  ;;  %v767_v29 = vmax.f32 %v637_v11, %v703_v21 }
 0x11d   :  { %v1251_v30 = vpack.c.bf16 %v732_v22, %v732_v22  ;;  %v733_v32 = vmax.f32 %v501_v16, %v669_v24  ;;  %v765_v34 = vmax.f32 %v629_v17, %v701_v25  ;;  %1055 = vst.msk [vmem:[%s1900_s3 + $0x78] sm:$0xf] %vm1024_vm1, %v1253_v26 }
 0x11e   :  { %v1283_v31 = vpack.c.bf16 %v764_v23, %v764_v23  ;;  %1087 = vst.msk [vmem:[%s1900_s3 + $0xf8] sm:$0xf] %vm1024_vm1, %v1285_v27  ;;  %v1254_v33 = vpack.c.bf16 %v735_v28, %v735_v28  ;;  %v1286_v35 = vpack.c.bf16 %v767_v29, %v767_v29 }
 0x11f   :  { %1053 = vst.msk [vmem:[%s1900_s3 + $0x70] sm:$0xf] %vm1024_vm1, %v1251_v30  ;;  %v1252_v36 = vpack.c.bf16 %v733_v32, %v733_v32  ;;  %v1284_v37 = vpack.c.bf16 %v765_v34, %v765_v34 }
 0x120   :  { %1085 = vst.msk [vmem:[%s1900_s3 + $0xf0] sm:$0xf] %vm1024_vm1, %v1283_v31  ;;  %1056 = vst.msk [vmem:[%s1900_s3 + $0x7c] sm:$0xf] %vm1024_vm1, %v1254_v33 }
 0x121   :  { %1088 = vst.msk [vmem:[%s1900_s3 + $0xfc] sm:$0xf] %vm1024_vm1, %v1286_v35  ;;  %1054 = vst.msk [vmem:[%s1900_s3 + $0x74] sm:$0xf] %vm1024_vm1, %v1252_v36 }
 0x122   :  { %1086 = vst.msk [vmem:[%s1900_s3 + $0xf4] sm:$0xf] %vm1024_vm1, %v1284_v37 }

// kernel: yolov3_upsample_block.11
= control target key start
LH: loop header
LB: loop body
LE: loop exit
PB: predicated region body
PF: predicated region fallthrough
CT: control target
= control target key end

     0   :  { %s1155_s12 = smov 0   ;;  %s1157_s13 = smov 0   ;;  %s1591_s0 = inlined_call_operand.vmem [shape: bf16[2,16,16,8], index: 0, kind: input, shape index: {}]   ;;  %s1592_s1 = inlined_call_operand.vmem [shape: bf16[8,4], index: 1, kind: input, shape index: {}]   ;;  %s1593_s2 = inlined_call_operand.vmem [shape: f32[1,4], index: 2, kind: input, shape index: {}]   ;;  %s1594_s3 = inlined_call_operand.vmem [shape: f32[2,16,2,16,8], index: 3, kind: output, shape index: {}]  }
   0x1   :  { %s1159_s14 = smov 0  }
   0x2 LB: > { %s25_s15 = sadd.s32 1, %s1128_s13  ;;  %p940_p0 = scmp.ge.s32.totalorder %s1132_s14, 1  ;;  %s1132_s14 = sphi %s1159_s14, %s13_s14   ;;  %s1128_s13 = sphi %s1157_s13, %s1596_s13   ;;  %s1124_s12 = sphi %s1155_s12, %s1595_s12  }
   0x3   : > { %p27_p1 = scmp.ge.s32.totalorder %s25_s15, 2  ;;  %p159_p2 = scmp.lt.s32.totalorder %s1132_s14, 3 }
   0x5   : > { %s1598_s15 = smov (%p27_p1, %s25_s15), 0  ;;  %p160_p3 = pnand %p940_p0, %p159_p2 }
   0x6   : > { %v248_v0 = vld [vmem:[%s1592_s1] sm:$0xf] (!%p160_p3)  ;;  %vm385_vm0 = vcmask (!%p160_p3), 1043456   ;;  %p194_p4 = scmp.lt.s32.totalorder (!%p160_p3), %s1124_s12, 1  ;;  %vm336_vm1 = vcmask (!%p160_p3), 64512   ;;  %s1134_s24 = smov (!%p160_p3), 4  }
   0x7   : > { %163 = sbr.rel (%p160_p3) target bundleno = 415 (0x19f), region = 32  ;;  %1067 = vmatprep.subr.msk.bf16.mxu0 (!%p160_p3), %vm385_vm0, %v248_v0  ;;  %1068 = vmatprep.subr.msk.bf16.mxu1 (!%p160_p3), %vm385_vm0, %v248_v0  ;;  %v387_v1 = vsel (!%p160_p3), %vm385_vm0, %v248_v0, 0  ;;  %v1219_v18 = vld [vmem:[%s1593_s2] ss:$0 sm:$0xff] (!%p160_p3)  ;;  %vm742_vm2 = vcmask (!%p160_p3), 31744  }
   0x8   : > { %1032 = vmatpush3.bf16.msra.mxu0 (!%p160_p3), %v387_v1  ;;  %1066 = vmatpush3.bf16.msra.mxu1 (!%p160_p3), %v387_v1 }
   0xe   : > { %s1600_s12 = smov (!%p194_p4, %s1124_s12), 1 }
   0xf   : > { %s1012_s18 = sshll.u32 %s1600_s12, 7  ;;  %s1013_s25 = sshll.u32 %s1600_s12, 9 }
  0x10   : > { %s1182_s21 = scalar_lea.vmem %s1591_s0, %s1012_s18  ;;  %s1388_s28 = scalar_lea.vmem %s1594_s3, %s1013_s25 }
  0x11   : > { %v1094_v2 = vld [vmem:[%s1182_s21] sm:$0xff]   ;;  %v1096_v4 = vld [vmem:[%s1182_s21 + $0x8] sm:$0xff]   ;;  %v1098_v6 = vld [vmem:[%s1182_s21 + $0x10] sm:$0xff]  }
  0x12   : > { %v1095_v3 = vld [vmem:[%s1182_s21 + $0x40] sm:$0xff]   ;;  %1033 = vmatprep.mubr.msk.bf16.mxu0 %vm336_vm1, %v1094_v2  ;;  %v1097_v5 = vld [vmem:[%s1182_s21 + $0x48] sm:$0xff]   ;;  %v1100_v7 = vld [vmem:[%s1182_s21 + $0x50] sm:$0xff]  }
  0x13   : > { %1049 = vmatprep.mubr.msk.bf16.mxu1 %vm336_vm1, %v1095_v3  ;;  %1034 = vmatmul.mubr.msk.bf16.vlgmr.msra.gmra.mrb[0].mxu0 %vm336_vm1, %v1096_v4  ;;  %v1099_v8 = vld [vmem:[%s1182_s21 + $0x18] sm:$0xff]   ;;  %v1102_v10 = vld [vmem:[%s1182_s21 + $0x20] sm:$0xff]   ;;  %v1103_v12 = vld [vmem:[%s1182_s21 + $0x28] sm:$0xff]  }
  0x14   : > { %1050 = vmatmul.mubr.msk.bf16.vlgmr.msra.gmra.mrb[0].mxu1 %vm336_vm1, %v1097_v5  ;;  %1037 = vmatprep.mubr.msk.bf16.mxu0 %vm336_vm1, %v1098_v6  ;;  %v1101_v9 = vld [vmem:[%s1182_s21 + $0x58] sm:$0xff]   ;;  %v1104_v11 = vld [vmem:[%s1182_s21 + $0x60] sm:$0xff]   ;;  %v1105_v13 = vld [vmem:[%s1182_s21 + $0x68] sm:$0xff]  }
  0x15   : > { %1053 = vmatprep.mubr.msk.bf16.mxu1 %vm336_vm1, %v1100_v7  ;;  %v1106_v14 = vld [vmem:[%s1182_s21 + $0x30] sm:$0xff]   ;;  %v1107_v16 = vld [vmem:[%s1182_s21 + $0x38] sm:$0xff]  }
  0x16   : > { %v1108_v15 = vld [vmem:[%s1182_s21 + $0x70] sm:$0xff]   ;;  %v1109_v17 = vld [vmem:[%s1182_s21 + $0x78] sm:$0xff]  }
  0x1b   : > { %1038 = vmatmul.mubr.msk.bf16.gmra.mrb[4].mxu0 %vm336_vm1, %v1099_v8 }
  0x1c   : > { %1054 = vmatmul.mubr.msk.bf16.gmra.mrb[4].mxu1 %vm336_vm1, %v1101_v9  ;;  %1041 = vmatprep.mubr.msk.bf16.mxu0 %vm336_vm1, %v1102_v10 }
  0x1d   : > { %1057 = vmatprep.mubr.msk.bf16.mxu1 %vm336_vm1, %v1104_v11 }
  0x23   : > { %1042 = vmatmul.mubr.msk.bf16.gmra.mrb[8].mxu0 %vm336_vm1, %v1103_v12 }
  0x24   : > { %1058 = vmatmul.mubr.msk.bf16.gmra.mrb[8].mxu1 %vm336_vm1, %v1105_v13  ;;  %1045 = vmatprep.mubr.msk.bf16.mxu0 %vm336_vm1, %v1106_v14 }
  0x25   : > { %1061 = vmatprep.mubr.msk.bf16.mxu1 %vm336_vm1, %v1108_v15 }
  0x2b   : > { %1046 = vmatmul.mubr.msk.bf16.gmra.mrb[12].mxu0 %vm336_vm1, %v1107_v16 }
  0x2c   : > { %1062 = vmatmul.mubr.msk.bf16.gmra.mrb[12].mxu1 %vm336_vm1, %v1109_v17 }
  0xe6   : > { %v1035_v19 = vpop.f32.mrb[0].mxu0 }
  0xe7   : > { %v432_v20 = vadd.f32 %v1035_v19, %v1219_v18  ;;  %v1051_v21 = vpop.f32.mrb[0].mxu1  ;;  %v423_v22 = vpop.f32.mrb[1].mxu0 }
  0xe8   : > { %v496_v23 = vadd.f32 %v1051_v21, %v1219_v18  ;;  %v424_v24 = vadd.f32 %v1219_v18, %v423_v22  ;;  %v487_v25 = vpop.f32.mrb[1].mxu1  ;;  %v1036_v26 = vpop.f32.mrb[2].mxu0 }
  0xe9   : > { %v552_v27 = vmul.f32 0.1, %v432_v20  ;;  %v435_v28 = vadd.f32 %v1036_v26, %v1219_v18  ;;  %v1052_v29 = vpop.f32.mrb[2].mxu1  ;;  %v426_v30 = vpop.f32.mrb[3].mxu0  ;;  %v488_v37 = vadd.f32 %v1219_v18, %v487_v25 }
  0xea   : > { %v568_v31 = vmul.f32 0.1, %v496_v23  ;;  %v490_v32 = vpop.f32.mrb[3].mxu1  ;;  %v499_v34 = vadd.f32 %v1052_v29, %v1219_v18  ;;  %v550_v36 = vmul.f32 0.1, %v424_v24  ;;  %v427_v47 = vadd.f32 %v1219_v18, %v426_v30 }
  0xeb   : > { %v553_v33 = vmul.f32 0.1, %v435_v28  ;;  %v1226_v35 = vmax.f32 %v432_v20, %v552_v27  ;;  %v491_v42 = vadd.f32 %v1219_v18, %v490_v32  ;;  %v566_v46 = vmul.f32 0.1, %v488_v37 }
  0xec   : > { %v1229_v38 = vmax.f32 %v496_v23, %v568_v31  ;;  %v569_v41 = vmul.f32 0.1, %v499_v34  ;;  %v1238_v45 = vmax.f32 %v424_v24, %v550_v36  ;;  %v551_v57 = vmul.f32 0.1, %v427_v47 }
  0xed   : > { %650 = vrot.lane.b32.xlu1 %v1226_v35, %s1134_s24  ;;  %v1235_v40 = vmax.f32 %v435_v28, %v553_v33  ;;  %v567_v54 = vmul.f32 0.1, %v491_v42  ;;  %v1248_v56 = vmax.f32 %v488_v37, %v566_v46 }
  0xee   : > { %682 = vrot.lane.b32.xlu0 %v1229_v38, %s1134_s24  ;;  %v1039_v39 = vpop.f32.mrb[4].mxu0  ;;  %v1245_v53 = vmax.f32 %v499_v34, %v569_v41  ;;  %v1258_v1 = vmax.f32 %v427_v47, %v551_v57 }
  0xef   : > { %v439_v43 = vpop.f32.mrb[5].mxu0  ;;  %v1055_v44 = vpop.f32.mrb[4].mxu1  ;;  %v448_v58 = vadd.f32 %v1039_v39, %v1219_v18  ;;  %v1255_v60 = vmax.f32 %v491_v42, %v567_v54 }
  0xf0   : > { %v1040_v48 = vpop.f32.mrb[6].mxu0  ;;  %v503_v49 = vpop.f32.mrb[5].mxu1  ;;  %v512_v3 = vadd.f32 %v1055_v44, %v1219_v18  ;;  %v440_v13 = vadd.f32 %v1219_v18, %v439_v43 }
  0xf1   : > { %652 = vrot.lane.b32.xlu1 %v1235_v40, %s1134_s24  ;;  %v442_v50 = vpop.f32.mrb[7].mxu0  ;;  %v1056_v51 = vpop.f32.mrb[6].mxu1  ;;  %v451_v55 = vadd.f32 %v1040_v48, %v1219_v18  ;;  %v556_v2 = vmul.f32 0.1, %v448_v58  ;;  %v504_v24 = vadd.f32 %v1219_v18, %v503_v49 }
  0xf2   : > { %646 = vrot.lane.b32.xlu0 %v1238_v45, %s1134_s24  ;;  %v506_v52 = vpop.f32.mrb[7].mxu1  ;;  %v515_v62 = vadd.f32 %v1056_v51, %v1219_v18  ;;  %v443_v10 = vadd.f32 %v1219_v18, %v442_v50  ;;  %v572_v14 = vmul.f32 0.1, %v512_v3  ;;  %v554_v22 = vmul.f32 0.1, %v440_v13 }
  0xf3   : > { %v557_v61 = vmul.f32 0.1, %v451_v55  ;;  %v1268_v12 = vmax.f32 %v448_v58, %v556_v2  ;;  %v507_v19 = vadd.f32 %v1219_v18, %v506_v52  ;;  %v570_v34 = vmul.f32 0.1, %v504_v24 }
  0xf4   : > { %v573_v11 = vmul.f32 0.1, %v515_v62  ;;  %v555_v16 = vmul.f32 0.1, %v443_v10  ;;  %v1280_v23 = vmax.f32 %v512_v3, %v572_v14  ;;  %v1290_v33 = vmax.f32 %v440_v13, %v554_v22 }
  0xf5   : > { %684 = vrot.lane.b32.xlu1 %v1245_v53, %s1134_s24  ;;  %v1265_v9 = vmax.f32 %v451_v55, %v557_v61  ;;  %v571_v31 = vmul.f32 0.1, %v507_v19  ;;  %v1300_v42 = vmax.f32 %v504_v24, %v570_v34 }
  0xf6   : > { %678 = vrot.lane.b32.xlu0 %v1248_v56, %s1134_s24  ;;  %v1043_v59 = vpop.f32.mrb[8].mxu0  ;;  %v1275_v17 = vmax.f32 %v515_v62, %v573_v11  ;;  %v1287_v30 = vmax.f32 %v443_v10, %v555_v16 }
  0xf7   : > { %v455_v63 = vpop.f32.mrb[9].mxu0  ;;  %v1059_v0 = vpop.f32.mrb[8].mxu1  ;;  %v464_v36 = vadd.f32 %v1043_v59, %v1219_v18  ;;  %v1297_v37 = vmax.f32 %v507_v19, %v571_v31 }
  0xf8   : > { %v1044_v4 = vpop.f32.mrb[10].mxu0  ;;  %v519_v5 = vpop.f32.mrb[9].mxu1  ;;  %v528_v44 = vadd.f32 %v1059_v0, %v1219_v18  ;;  %v456_v50 = vadd.f32 %v1219_v18, %v455_v63 }
  0xf9   : > { %680 = vrot.lane.b32.xlu1 %v1255_v60, %s1134_s24  ;;  %v458_v6 = vpop.f32.mrb[11].mxu0  ;;  %v1060_v7 = vpop.f32.mrb[10].mxu1  ;;  %v467_v32 = vadd.f32 %v1044_v4, %v1219_v18  ;;  %v560_v43 = vmul.f32 0.1, %v464_v36  ;;  %v520_v59 = vadd.f32 %v1219_v18, %v519_v5 }
  0xfa   : > { %648 = vrot.lane.b32.xlu0 %v1258_v1, %s1134_s24  ;;  %v522_v8 = vpop.f32.mrb[11].mxu1  ;;  %v531_v41 = vadd.f32 %v1060_v7, %v1219_v18  ;;  %v459_v47 = vadd.f32 %v1219_v18, %v458_v6  ;;  %v576_v51 = vmul.f32 0.1, %v528_v44  ;;  %v558_v57 = vmul.f32 0.1, %v456_v50 }
  0xfb   : > { %v561_v39 = vmul.f32 0.1, %v467_v32  ;;  %v1310_v49 = vmax.f32 %v464_v36, %v560_v43  ;;  %v523_v55 = vadd.f32 %v1219_v18, %v522_v8  ;;  %v574_v2 = vmul.f32 0.1, %v520_v59 }
  0xfc   : > { %v577_v48 = vmul.f32 0.1, %v531_v41  ;;  %v559_v52 = vmul.f32 0.1, %v459_v47  ;;  %v1320_v58 = vmax.f32 %v528_v44, %v576_v51  ;;  %v1330_v0 = vmax.f32 %v456_v50, %v558_v57 }
  0xfd   : > { %660 = vrot.lane.b32.xlu1 %v1265_v9, %s1134_s24  ;;  %v1307_v46 = vmax.f32 %v467_v32, %v561_v39  ;;  %v575_v62 = vmul.f32 0.1, %v523_v55  ;;  %v1340_v7 = vmax.f32 %v520_v59, %v574_v2 }
  0xfe   : > { %658 = vrot.lane.b32.xlu0 %v1268_v12, %s1134_s24  ;;  %v1047_v15 = vpop.f32.mrb[12].mxu0  ;;  %v1317_v54 = vmax.f32 %v531_v41, %v577_v48  ;;  %v1327_v61 = vmax.f32 %v459_v47, %v559_v52 }
  0xff   : > { %v471_v20 = vpop.f32.mrb[13].mxu0  ;;  %v1278_v21 = vpop.f32.mrb[12].mxu1  ;;  %v480_v3 = vadd.f32 %v1047_v15, %v1219_v18  ;;  %v1337_v4 = vmax.f32 %v523_v55, %v575_v62 }
 0x100   : > { %v1048_v25 = vpop.f32.mrb[14].mxu0  ;;  %v535_v26 = vpop.f32.mrb[13].mxu1  ;;  %v472_v10 = vadd.f32 %v1219_v18, %v471_v20 }
 0x101   : > { %692 = vrot.lane.b32.xlu1 %v1275_v17, %s1134_s24  ;;  %v474_v27 = vpop.f32.mrb[15].mxu0  ;;  %v1064_v28 = vpop.f32.mrb[14].mxu1  ;;  %v483_v63 = vadd.f32 %v1048_v25, %v1219_v18  ;;  %v564_v8 = vmul.f32 0.1, %v480_v3  ;;  %v536_v19 = vadd.f32 %v1219_v18, %v535_v26 }
 0x102   : > { %690 = vrot.lane.b32.xlu0 %v1280_v23, %s1134_s24  ;;  %v538_v29 = vpop.f32.mrb[15].mxu1  ;;  %v475_v6 = vadd.f32 %v1219_v18, %v474_v27  ;;  %v562_v16 = vmul.f32 0.1, %v472_v10  ;;  %v547_v22 = vadd.f32 %v1064_v28, %v1219_v18  ;;  %v544_v27 = vadd.f32 %v1278_v21, %v1219_v18 }
 0x103   : > { %v565_v5 = vmul.f32 0.1, %v483_v63  ;;  %v539_v14 = vadd.f32 %v1219_v18, %v538_v29  ;;  %v1350_v15 = vmax.f32 %v480_v3, %v564_v8  ;;  %v578_v29 = vmul.f32 0.1, %v536_v19 }
 0x104   : > { %v563_v13 = vmul.f32 0.1, %v475_v6  ;;  %v1360_v25 = vmax.f32 %v472_v10, %v562_v16  ;;  %v581_v26 = vmul.f32 0.1, %v547_v22  ;;  %v580_v32 = vmul.f32 0.1, %v544_v27 }
 0x105   : > { %656 = vrot.lane.b32.xlu1 %v1287_v30, %s1134_s24  ;;  %v1347_v11 = vmax.f32 %v483_v63, %v565_v5  ;;  %v579_v24 = vmul.f32 0.1, %v539_v14  ;;  %v1370_v34 = vmax.f32 %v536_v19, %v578_v29 }
 0x106   : > { %654 = vrot.lane.b32.xlu0 %v1290_v33, %s1134_s24  ;;  %v1357_v20 = vmax.f32 %v475_v6, %v563_v13  ;;  %v1376_v18 = vmax.f32 %v547_v22, %v581_v26  ;;  %v1378_v21 = vmax.f32 %v544_v27, %v580_v32 }
 0x107   : > { %v1368_v31 = vmax.f32 %v539_v14, %v579_v24 }
 0x109   : > { %688 = vrot.lane.b32.xlu1 %v1297_v37, %s1134_s24 }
 0x10a   : > { %686 = vrot.lane.b32.xlu0 %v1300_v42, %s1134_s24 }
 0x10d   : > { %668 = vrot.lane.b32.xlu1 %v1307_v46, %s1134_s24 }
 0x10e   : > { %666 = vrot.lane.b32.xlu0 %v1310_v49, %s1134_s24 }
 0x111   : > { %700 = vrot.lane.b32.xlu1 %v1317_v54, %s1134_s24 }
 0x112   : > { %698 = vrot.lane.b32.xlu0 %v1320_v58, %s1134_s24 }
 0x115   : > { %664 = vrot.lane.b32.xlu1 %v1327_v61, %s1134_s24 }
 0x116   : > { %662 = vrot.lane.b32.xlu0 %v1330_v0, %s1134_s24 }
 0x119   : > { %696 = vrot.lane.b32.xlu1 %v1337_v4, %s1134_s24 }
 0x11a   : > { %694 = vrot.lane.b32.xlu0 %v1340_v7, %s1134_s24 }
 0x11d   : > { %676 = vrot.lane.b32.xlu1 %v1347_v11, %s1134_s24 }
 0x11e   : > { %674 = vrot.lane.b32.xlu0 %v1350_v15, %s1134_s24 }
 0x121   : > { %672 = vrot.lane.b32.xlu1 %v1357_v20, %s1134_s24 }
 0x122   : > { %670 = vrot.lane.b32.xlu0 %v1360_v25, %s1134_s24 }
 0x125   : > { %704 = vrot.lane.b32.xlu1 %v1368_v31, %s1134_s24 }
 0x126   : > { %702 = vrot.lane.b32.xlu0 %v1370_v34, %s1134_s24 }
 0x129   : > { %708 = vrot.lane.b32.xlu1 %v1376_v18, %s1134_s24 }
 0x12a   : > { %706 = vrot.lane.b32.xlu0 %v1378_v21, %s1134_s24 }
 0x15f   : > { %v651_v28 = vpop.permute.xlu1 %650 }
 0x160   : > { %v683_v36 = vpop.permute.xlu0 %682  ;;  %v745_v39 = vsel %vm742_vm2, %v1226_v35, %v651_v28 }
 0x161   : > { %v761_v41 = vsel %vm742_vm2, %v1229_v38, %v683_v36  ;;  %777 = vst.msk [vmem:[%s1388_s28 + $0x20] sm:$0xff] %vm336_vm1, %v745_v39  ;;  %980 = vst.msk [vmem:[%s1388_s28 + $0x30] sm:$0xff] %vm336_vm1, %v745_v39 }
 0x162   : > { %793 = vst.msk [vmem:[%s1388_s28 + $0x120] sm:$0xff] %vm336_vm1, %v761_v41  ;;  %996 = vst.msk [vmem:[%s1388_s28 + $0x130] sm:$0xff] %vm336_vm1, %v761_v41 }
 0x163   : > { %v653_v43 = vpop.permute.xlu1 %652 }
 0x164   : > { %v746_v44 = vsel %vm742_vm2, %v1235_v40, %v653_v43  ;;  %v647_v35 = vpop.permute.xlu0 %646 }
 0x165   : > { %778 = vst.msk [vmem:[%s1388_s28 + $0x28] sm:$0xff] %vm336_vm1, %v746_v44  ;;  %981 = vst.msk [vmem:[%s1388_s28 + $0x38] sm:$0xff] %vm336_vm1, %v746_v44  ;;  %v743_v38 = vsel %vm742_vm2, %v1238_v45, %v647_v35 }
 0x166   : > { %775 = vst.msk [vmem:[%s1388_s28] sm:$0xff] %vm336_vm1, %v743_v38  ;;  %978 = vst.msk [vmem:[%s1388_s28 + $0x10] sm:$0xff] %vm336_vm1, %v743_v38 }
 0x167   : > { %v685_v47 = vpop.permute.xlu1 %684 }
 0x168   : > { %v762_v40 = vsel %vm742_vm2, %v1245_v53, %v685_v47  ;;  %v679_v48 = vpop.permute.xlu0 %678 }
 0x169   : > { %794 = vst.msk [vmem:[%s1388_s28 + $0x128] sm:$0xff] %vm336_vm1, %v762_v40  ;;  %997 = vst.msk [vmem:[%s1388_s28 + $0x138] sm:$0xff] %vm336_vm1, %v762_v40  ;;  %v759_v45 = vsel %vm742_vm2, %v1248_v56, %v679_v48 }
 0x16a   : > { %791 = vst.msk [vmem:[%s1388_s28 + $0x100] sm:$0xff] %vm336_vm1, %v759_v45  ;;  %994 = vst.msk [vmem:[%s1388_s28 + $0x110] sm:$0xff] %vm336_vm1, %v759_v45 }
 0x16b   : > { %v681_v50 = vpop.permute.xlu1 %680 }
 0x16c   : > { %v760_v53 = vsel %vm742_vm2, %v1255_v60, %v681_v50  ;;  %v649_v51 = vpop.permute.xlu0 %648 }
 0x16d   : > { %792 = vst.msk [vmem:[%s1388_s28 + $0x108] sm:$0xff] %vm336_vm1, %v760_v53  ;;  %995 = vst.msk [vmem:[%s1388_s28 + $0x118] sm:$0xff] %vm336_vm1, %v760_v53  ;;  %v744_v56 = vsel %vm742_vm2, %v1258_v1, %v649_v51 }
 0x16e   : > { %776 = vst.msk [vmem:[%s1388_s28 + $0x8] sm:$0xff] %vm336_vm1, %v744_v56  ;;  %979 = vst.msk [vmem:[%s1388_s28 + $0x18] sm:$0xff] %vm336_vm1, %v744_v56 }
 0x16f   : > { %v661_v52 = vpop.permute.xlu1 %660 }
 0x170   : > { %v750_v60 = vsel %vm742_vm2, %v1265_v9, %v661_v52  ;;  %v659_v55 = vpop.permute.xlu0 %658 }
 0x171   : > { %782 = vst.msk [vmem:[%s1388_s28 + $0x68] sm:$0xff] %vm336_vm1, %v750_v60  ;;  %985 = vst.msk [vmem:[%s1388_s28 + $0x78] sm:$0xff] %vm336_vm1, %v750_v60  ;;  %v749_v1 = vsel %vm742_vm2, %v1268_v12, %v659_v55 }
 0x172   : > { %781 = vst.msk [vmem:[%s1388_s28 + $0x60] sm:$0xff] %vm336_vm1, %v749_v1  ;;  %984 = vst.msk [vmem:[%s1388_s28 + $0x70] sm:$0xff] %vm336_vm1, %v749_v1 }
 0x173   : > { %v693_v57 = vpop.permute.xlu1 %692 }
 0x174   : > { %v766_v9 = vsel %vm742_vm2, %v1275_v17, %v693_v57  ;;  %v691_v59 = vpop.permute.xlu0 %690 }
 0x175   : > { %798 = vst.msk [vmem:[%s1388_s28 + $0x168] sm:$0xff] %vm336_vm1, %v766_v9  ;;  %1001 = vst.msk [vmem:[%s1388_s28 + $0x178] sm:$0xff] %vm336_vm1, %v766_v9  ;;  %v765_v12 = vsel %vm742_vm2, %v1280_v23, %v691_v59 }
 0x176   : > { %797 = vst.msk [vmem:[%s1388_s28 + $0x160] sm:$0xff] %vm336_vm1, %v765_v12  ;;  %1000 = vst.msk [vmem:[%s1388_s28 + $0x170] sm:$0xff] %vm336_vm1, %v765_v12 }
 0x177   : > { %v657_v62 = vpop.permute.xlu1 %656 }
 0x178   : > { %v748_v17 = vsel %vm742_vm2, %v1287_v30, %v657_v62  ;;  %v655_v63 = vpop.permute.xlu0 %654 }
 0x179   : > { %780 = vst.msk [vmem:[%s1388_s28 + $0x48] sm:$0xff] %vm336_vm1, %v748_v17  ;;  %983 = vst.msk [vmem:[%s1388_s28 + $0x58] sm:$0xff] %vm336_vm1, %v748_v17  ;;  %v747_v23 = vsel %vm742_vm2, %v1290_v33, %v655_v63 }
 0x17a   : > { %779 = vst.msk [vmem:[%s1388_s28 + $0x40] sm:$0xff] %vm336_vm1, %v747_v23  ;;  %982 = vst.msk [vmem:[%s1388_s28 + $0x50] sm:$0xff] %vm336_vm1, %v747_v23 }
 0x17b   : > { %v689_v2 = vpop.permute.xlu1 %688 }
 0x17c   : > { %v764_v30 = vsel %vm742_vm2, %v1297_v37, %v689_v2  ;;  %v687_v3 = vpop.permute.xlu0 %686 }
 0x17d   : > { %796 = vst.msk [vmem:[%s1388_s28 + $0x148] sm:$0xff] %vm336_vm1, %v764_v30  ;;  %999 = vst.msk [vmem:[%s1388_s28 + $0x158] sm:$0xff] %vm336_vm1, %v764_v30  ;;  %v763_v33 = vsel %vm742_vm2, %v1300_v42, %v687_v3 }
 0x17e   : > { %795 = vst.msk [vmem:[%s1388_s28 + $0x140] sm:$0xff] %vm336_vm1, %v763_v33  ;;  %998 = vst.msk [vmem:[%s1388_s28 + $0x150] sm:$0xff] %vm336_vm1, %v763_v33 }
 0x17f   : > { %v669_v5 = vpop.permute.xlu1 %668 }
 0x180   : > { %v754_v37 = vsel %vm742_vm2, %v1307_v46, %v669_v5  ;;  %v667_v6 = vpop.permute.xlu0 %666 }
 0x181   : > { %786 = vst.msk [vmem:[%s1388_s28 + $0xa8] sm:$0xff] %vm336_vm1, %v754_v37  ;;  %989 = vst.msk [vmem:[%s1388_s28 + $0xb8] sm:$0xff] %vm336_vm1, %v754_v37  ;;  %v753_v42 = vsel %vm742_vm2, %v1310_v49, %v667_v6 }
 0x182   : > { %785 = vst.msk [vmem:[%s1388_s28 + $0xa0] sm:$0xff] %vm336_vm1, %v753_v42  ;;  %988 = vst.msk [vmem:[%s1388_s28 + $0xb0] sm:$0xff] %vm336_vm1, %v753_v42 }
 0x183   : > { %v701_v8 = vpop.permute.xlu1 %700 }
 0x184   : > { %v770_v46 = vsel %vm742_vm2, %v1317_v54, %v701_v8  ;;  %v699_v10 = vpop.permute.xlu0 %698 }
 0x185   : > { %802 = vst.msk [vmem:[%s1388_s28 + $0x1a8] sm:$0xff] %vm336_vm1, %v770_v46  ;;  %1005 = vst.msk [vmem:[%s1388_s28 + $0x1b8] sm:$0xff] %vm336_vm1, %v770_v46  ;;  %v769_v49 = vsel %vm742_vm2, %v1320_v58, %v699_v10 }
 0x186   : > { %801 = vst.msk [vmem:[%s1388_s28 + $0x1a0] sm:$0xff] %vm336_vm1, %v769_v49  ;;  %1004 = vst.msk [vmem:[%s1388_s28 + $0x1b0] sm:$0xff] %vm336_vm1, %v769_v49 }
 0x187   : > { %v665_v13 = vpop.permute.xlu1 %664 }
 0x188   : > { %v752_v54 = vsel %vm742_vm2, %v1327_v61, %v665_v13  ;;  %v663_v14 = vpop.permute.xlu0 %662 }
 0x189   : > { %784 = vst.msk [vmem:[%s1388_s28 + $0x88] sm:$0xff] %vm336_vm1, %v752_v54  ;;  %987 = vst.msk [vmem:[%s1388_s28 + $0x98] sm:$0xff] %vm336_vm1, %v752_v54  ;;  %v751_v58 = vsel %vm742_vm2, %v1330_v0, %v663_v14 }
 0x18a   : > { %783 = vst.msk [vmem:[%s1388_s28 + $0x80] sm:$0xff] %vm336_vm1, %v751_v58  ;;  %986 = vst.msk [vmem:[%s1388_s28 + $0x90] sm:$0xff] %vm336_vm1, %v751_v58 }
 0x18b   : > { %v697_v16 = vpop.permute.xlu1 %696 }
 0x18c   : > { %v768_v61 = vsel %vm742_vm2, %v1337_v4, %v697_v16  ;;  %v695_v19 = vpop.permute.xlu0 %694 }
 0x18d   : > { %800 = vst.msk [vmem:[%s1388_s28 + $0x188] sm:$0xff] %vm336_vm1, %v768_v61  ;;  %1003 = vst.msk [vmem:[%s1388_s28 + $0x198] sm:$0xff] %vm336_vm1, %v768_v61  ;;  %v767_v0 = vsel %vm742_vm2, %v1340_v7, %v695_v19 }
 0x18e   : > { %799 = vst.msk [vmem:[%s1388_s28 + $0x180] sm:$0xff] %vm336_vm1, %v767_v0  ;;  %1002 = vst.msk [vmem:[%s1388_s28 + $0x190] sm:$0xff] %vm336_vm1, %v767_v0 }
 0x18f   : > { %v677_v22 = vpop.permute.xlu1 %676 }
 0x190   : > { %v758_v4 = vsel %vm742_vm2, %v1347_v11, %v677_v22  ;;  %v675_v24 = vpop.permute.xlu0 %674 }
 0x191   : > { %790 = vst.msk [vmem:[%s1388_s28 + $0xe8] sm:$0xff] %vm336_vm1, %v758_v4  ;;  %993 = vst.msk [vmem:[%s1388_s28 + $0xf8] sm:$0xff] %vm336_vm1, %v758_v4  ;;  %v757_v7 = vsel %vm742_vm2, %v1350_v15, %v675_v24 }
 0x192   : > { %789 = vst.msk [vmem:[%s1388_s28 + $0xe0] sm:$0xff] %vm336_vm1, %v757_v7  ;;  %992 = vst.msk [vmem:[%s1388_s28 + $0xf0] sm:$0xff] %vm336_vm1, %v757_v7 }
 0x193   : > { %v673_v27 = vpop.permute.xlu1 %672 }
 0x194   : > { %v756_v11 = vsel %vm742_vm2, %v1357_v20, %v673_v27  ;;  %v671_v29 = vpop.permute.xlu0 %670 }
 0x195   : > { %788 = vst.msk [vmem:[%s1388_s28 + $0xc8] sm:$0xff] %vm336_vm1, %v756_v11  ;;  %991 = vst.msk [vmem:[%s1388_s28 + $0xd8] sm:$0xff] %vm336_vm1, %v756_v11  ;;  %v755_v15 = vsel %vm742_vm2, %v1360_v25, %v671_v29 }
 0x196   : > { %787 = vst.msk [vmem:[%s1388_s28 + $0xc0] sm:$0xff] %vm336_vm1, %v755_v15  ;;  %990 = vst.msk [vmem:[%s1388_s28 + $0xd0] sm:$0xff] %vm336_vm1, %v755_v15 }
 0x197   : > { %v705_v26 = vpop.permute.xlu1 %704 }
 0x198   : > { %v772_v20 = vsel %vm742_vm2, %v1368_v31, %v705_v26  ;;  %v703_v32 = vpop.permute.xlu0 %702 }
 0x199   : > { %804 = vst.msk [vmem:[%s1388_s28 + $0x1c8] sm:$0xff] %vm336_vm1, %v772_v20  ;;  %1007 = vst.msk [vmem:[%s1388_s28 + $0x1d8] sm:$0xff] %vm336_vm1, %v772_v20  ;;  %v771_v28 = vsel %vm742_vm2, %v1370_v34, %v703_v32 }
 0x19a   : > { %803 = vst.msk [vmem:[%s1388_s28 + $0x1c0] sm:$0xff] %vm336_vm1, %v771_v28  ;;  %1006 = vst.msk [vmem:[%s1388_s28 + $0x1d0] sm:$0xff] %vm336_vm1, %v771_v28 }
 0x19b   : > { %v709_v25 = vpop.permute.xlu1 %708 }
 0x19c   : > { %v774_v36 = vsel %vm742_vm2, %v1376_v18, %v709_v25  ;;  %v707_v39 = vpop.permute.xlu0 %706 }
 0x19d   : > { %806 = vst.msk [vmem:[%s1388_s28 + $0x1e8] sm:$0xff] %vm336_vm1, %v774_v36  ;;  %1009 = vst.msk [vmem:[%s1388_s28 + $0x1f8] sm:$0xff] %vm336_vm1, %v774_v36  ;;  %v773_v31 = vsel %vm742_vm2, %v1378_v21, %v707_v39 }
 0x19e   : > { %805 = vst.msk [vmem:[%s1388_s28 + $0x1e0] sm:$0xff] %vm336_vm1, %v773_v31  ;;  %1008 = vst.msk [vmem:[%s1388_s28 + $0x1f0] sm:$0xff] %vm336_vm1, %v773_v31 }
 0x19f PF: > { %s13_s14 = sadd.s32 1, %s1132_s14   ;;  %s1595_s12 = smov %s1128_s13 }
 0x1a0   : > { %p10_p5 = scmp.ge.s32.totalorder %s13_s14, 4   ;;  %s1596_s13 = smov %s1598_s15 }
 0x1a2   :  { %12 = sbr.rel (!%p10_p5) target bundleno = 2 (0x2), region = 63 }

// kernel: yolov3_upsample_block.7
= control target key start
LH: loop header
LB: loop body
LE: loop exit
PB: predicated region body
PF: predicated region fallthrough
CT: control target
= control target key end

     0   :  { %s6658_s12 = smov 0   ;;  %s6660_s13 = smov 0   ;;  %s8853_s0 = inlined_call_operand.vmem [shape: bf16[2,18,18,8], index: 0, kind: input, shape index: {}]   ;;  %s8854_s1 = inlined_call_operand.vmem [shape: bf16[3,3,8,16], index: 1, kind: input, shape index: {}]   ;;  %s8855_s2 = inlined_call_operand.vmem [shape: f32[1,16], index: 2, kind: input, shape index: {}]   ;;  %s8856_s3 = inlined_call_operand.vmem [shape: bf16[2,16,16,16], index: 3, kind: output, shape index: {}]  }
   0x1   :  { %s6662_s14 = smov 0  }
   0x2 LB: > { %s32_s15 = sadd.s32 1, %s6631_s13  ;;  %p5168_p0 = scmp.ge.s32.totalorder %s6635_s14, 1  ;;  %s6635_s14 = sphi %s6662_s14, %s13_s14   ;;  %s6631_s13 = sphi %s6660_s13, %s9038_s13   ;;  %s6627_s12 = sphi %s6658_s12, %s9037_s12  }
   0x3   : > { %p34_p1 = scmp.ge.s32.totalorder %s32_s15, 2  ;;  %p172_p2 = scmp.lt.s32.totalorder %s6635_s14, 3 }
   0x5   : > { %s9040_s15 = smov (%p34_p1, %s32_s15), 0  ;;  %p173_p3 = pnand %p5168_p0, %p172_p2 }
   0x7   : > { %176 = sbr.rel (%p173_p3) target bundleno = 565 (0x235), region = 32 }
   0xe   : > { %v353_v0 = vld [vmem:[%s8854_s1] sm:$0xf]  ;;  %vm483_vm0 = vcmask 1043456   ;;  %p208_p4 = scmp.lt.s32.totalorder %s6627_s12, 1  ;;  %v5367_v2 = vld [vmem:[%s8854_s1 + $0x10] sm:$0xf] }
   0xf   : > { %6429 = vmatprep.subr.msk.bf16.mxu1 %vm483_vm0, %v353_v0  ;;  %v485_v1 = vsel %vm483_vm0, %v353_v0, 0  ;;  %v5204_v3 = vld [vmem:[%s8854_s1 + $0x4] sm:$0xf]  ;;  %6433 = vmatprep.subr.msk.bf16.mxu0 %vm483_vm0, %v5367_v2  ;;  %v6691_v4 = vsel %vm483_vm0, %v5367_v2, 0  ;;  %v5416_v5 = vld [vmem:[%s8854_s1 + $0x14] sm:$0xf] }
  0x10   : > { %5834 = vmatpush3.bf16.msra.mxu1 %v485_v1  ;;  %s9042_s12 = smov (!%p208_p4, %s6627_s12), 1  ;;  %8887 = vst [vmem:[#allocation3_spill] sm:$0xff] %v6691_v4  ;;  %5970 = vmatpush3.bf16.msra.mxu0 %v6691_v4  ;;  %vm434_vm1 = vcmask 64512   ;;  %v1166_v6 = vsel %vm483_vm0, %v5204_v3, 0  ;;  %v6707_v7 = vsel %vm483_vm0, %v5416_v5, 0  ;;  %vm1377_vm5 = vcmask 1042432  }
  0x11   : > { %6430 = vmatprep.subr.msk.bf16.mxu1 %vm483_vm0, %v5204_v3  ;;  %s6439_s24 = smul.u32 216, %s9042_s12  ;;  %6435 = vmatprep.subr.msk.bf16.mxu0 %vm483_vm0, %v5416_v5  ;;  %v6712_v8 = vld [vmem:[%s8854_s1 + $0x18] sm:$0xf]  ;;  %v5253_v9 = vld [vmem:[%s8854_s1 + $0x8] sm:$0xf]  ;;  %vm1378_vm6 = vcmask 1046532  }
  0x12   : > { %v6740_v21 = vsel %vm483_vm0, %v6712_v8, 0  ;;  %v6756_v31 = vsel %vm483_vm0, %v5253_v9, 0  ;;  %vm680_vm2 = vsmask.f32 3328  ;;  %vm681_vm3 = vsmask.f32 7440  ;;  %vm7059_vm7 = vmor %vm1377_vm5, %vm1378_vm6 }
  0x13   : > { %s6703_s27 = scalar_lea.vmem %s8853_s0, %s6439_s24  ;;  %vm6837_vm4 = vmor %vm680_vm2, %vm681_vm3  ;;  %vm237_vm8 = vcmask 130048   ;;  %s5647_s19 = sshll.u32 %s9042_s12, 7  ;;  %vm5009_vm9 = vcmask 125952  }
  0x14   : > { %v6718_v10 = vld [vmem:[%s6703_s27] sm:$0xf]  ;;  %v6721_v11 = vld [vmem:[%s6703_s27 + $0x4] sm:$0xf]  ;;  %v6724_v12 = vld [vmem:[%s6703_s27 + $0xc] sm:$0xf]  ;;  %s8714_s12 = scalar_lea.vmem %s8856_s3, %s5647_s19 }
  0x15   : > { %8888 = vst [vmem:[#allocation4_spill] sm:$0xff] %v6718_v10  ;;  %8889 = vst [vmem:[#allocation5_spill] sm:$0xff] %v6721_v11  ;;  %v5172_v13 = vcombine.low %v6718_v10, %v6721_v11  ;;  %v684_v14 = vshrl.u32 %v6718_v10, 16  ;;  %v687_v15 = vshll.u32 %v6718_v10, 16  ;;  %v693_v16 = vshll.u32 %v6721_v11, 16 }
  0x16   : > { %8890 = vst [vmem:[#allocation6_spill] sm:$0xff] %v6724_v12  ;;  %v6732_v17 = vld [vmem:[%s6703_s27 + $0x10] sm:$0xf]  ;;  %v697_v18 = vshrl.u32 %v6721_v11, 16  ;;  %v8858_v19 = vrot.slane %v6721_v11, 5  ;;  %v708_v25 = vshrl.u32 %v6724_v12, 16 }
  0x17   : > { %8891 = vst [vmem:[#allocation7_spill] sm:$0xff] %v6732_v17  ;;  %v5173_v20 = vcombine.low %v6724_v12, %v6732_v17  ;;  %5835 = vmatprep.mubr.msk.bf16.mxu1 %vm434_vm1, %v5172_v13  ;;  %v686_v22 = vrot.slane %v684_v14, 4  ;;  %v689_v23 = vrot.slane %v687_v15, 5  ;;  %v6743_v24 = vrot.slane %v693_v16, 5  ;;  %v6747_v26 = vld [vmem:[%s6703_s27 + $0x18] sm:$0xf] }
  0x18   : > { %v699_v27 = vrot.slane %v697_v18, 4  ;;  %v711_v28 = vshll.u32 %v6724_v12, 16  ;;  %v717_v29 = vshll.u32 %v6732_v17, 16  ;;  %v6753_v30 = vld [vmem:[%s6703_s27 + $0x1c] sm:$0xf]  ;;  %v710_v34 = vrot.slane %v708_v25, 4 }
  0x19   : > { %5836 = vmatmul.mubr.msk.bf16.vlgmr.msra.gmra.mrb[0].mxu1 %vm434_vm1, %v5173_v20  ;;  %v690_v32 = vor.u32 %v689_v23, %v686_v22  ;;  %v721_v35 = vshrl.u32 %v6732_v17, 16  ;;  %v6761_v36 = vld [vmem:[%s6703_s27 + $0x24] sm:$0xf]  ;;  %v8857_v40 = vrot.slane %v6732_v17, 5  ;;  %v6768_v41 = vld [vmem:[%s6703_s27 + $0x28] sm:$0xf]  ;;  %v5174_v45 = vcombine.low %v6747_v26, %v6753_v30 }
  0x1a   : > { %5868 = vmatpush3.bf16.msra.mxu1 %v1166_v6  ;;  %v700_v37 = vor.u32 %v699_v27, %v6743_v24  ;;  %v713_v38 = vrot.slane %v711_v28, 5  ;;  %v6764_v39 = vrot.slane %v717_v29, 5  ;;  %v6773_v42 = vrot.slane %v8858_v19, 4  ;;  %v6779_v46 = vld [vmem:[%s6703_s27 + $0xc] sm:$0xf] }
  0x1b   : > { %6431 = vmatprep.subr.msk.bf16.mxu1 %vm483_vm0, %v5253_v9  ;;  %v723_v43 = vrot.slane %v721_v35, 4  ;;  %v6781_v47 = vrot.slane %v690_v32, 4  ;;  %v6787_v51 = vld [vmem:[%s6703_s27 + $0x10] sm:$0xf]  ;;  %v6791_v52 = vrot.slane %v8857_v40, 4  ;;  %5839 = vmatprep.mubr.msk.bf16.mxu1 %vm434_vm1, %v5174_v45  ;;  %v5175_v54 = vcombine.low %v6761_v36, %v6768_v41 }
  0x1c   : > { %8892 = vst [vmem:[#allocation8_spill] sm:$0xff] %v6773_v42  ;;  %v6783_v48 = vrot.slane %v700_v37, 4  ;;  %v714_v49 = vor.u32 %v713_v38, %v710_v34  ;;  %v6798_v55 = vld [vmem:[%s6703_s27 + $0x14] sm:$0x1]  ;;  %v6801_v56 = vld [vmem:[%s6703_s27 + $0x18] sm:$0xf] }
  0x1d   : > { %8893 = vst [vmem:[#allocation9_spill] sm:$0xff] %v6791_v52  ;;  %v724_v57 = vor.u32 %v723_v43, %v6764_v39  ;;  %v2165_v60 = vshrl.u32 %v6779_v46, 16  ;;  %v2168_v62 = vshll.u32 %v6779_v46, 16  ;;  %v2174_v63 = vshll.u32 %v6787_v51, 16  ;;  %v6813_v1 = vld [vmem:[%s6703_s27 + $0x1c] sm:$0xf] }
  0x1e   : > { %v6807_v61 = vrot.slane %v714_v49, 4  ;;  %v2178_v0 = vshrl.u32 %v6787_v51, 16  ;;  %v2184_v5 = vshll.u32 %v6798_v55, 16  ;;  %v6819_v6 = vld [vmem:[%s6703_s27 + $0x20] sm:$0x1]  ;;  %v2189_v9 = vshrl.u32 %v6801_v56, 16 }
  0x1f   : > { %v2167_v3 = vrot.slane %v2165_v60, 4  ;;  %v2170_v13 = vrot.slane %v2168_v62, 5  ;;  %v2176_v14 = vrot.slane %v2174_v63, 5  ;;  %v2192_v16 = vshll.u32 %v6801_v56, 16  ;;  %v6827_v32 = vld [vmem:[%s6703_s27 + $0x30] sm:$0xf] }
  0x20   : > { %v2180_v15 = vrot.slane %v2178_v0, 4  ;;  %v2186_v18 = vrot.slane %v2184_v5, 5  ;;  %v2191_v20 = vrot.slane %v2189_v9, 4  ;;  %v2198_v22 = vshll.u32 %v6813_v1, 16  ;;  %8894 = vst [vmem:[#allocation10_spill] sm:$0xff] %v6827_v32 }
  0x21   : > { %5840 = vmatmul.mubr.msk.bf16.gmra.mrb[4].mxu1 %vm434_vm1, %v5175_v54  ;;  %v2202_v23 = vshrl.u32 %v6813_v1, 16  ;;  %v2171_v25 = vor.u32 %v2170_v13, %v2167_v3  ;;  %v2194_v28 = vrot.slane %v2192_v16, 5  ;;  %v2208_v29 = vshll.u32 %v6819_v6, 16  ;;  %v6830_v34 = vld [vmem:[%s6703_s27 + $0x34] sm:$0xf] }
  0x22   : > { %v2181_v27 = vor.u32 %v2180_v15, %v2176_v14  ;;  %8895 = vst [vmem:[#allocation11_spill] sm:$0xff] %v6830_v34  ;;  %v6832_v35 = vrot.slane %v724_v57, 4  ;;  %v2200_v43 = vrot.slane %v2198_v22, 5  ;;  %v6842_v62 = vld [vmem:[%s6703_s27 + $0x3c] sm:$0xf]  ;;  %v5176_v5 = vcombine.low %v6827_v32, %v6830_v34 }
  0x23   : > { %v2204_v45 = vrot.slane %v2202_v23, 4  ;;  %v2172_v49 = vrot.slane %v2171_v25, 4  ;;  %v2195_v60 = vor.u32 %v2194_v28, %v2191_v20  ;;  %8898 = vst [vmem:[#allocation12_spill] sm:$0xff] %v6842_v62  ;;  %v6845_v63 = vld [vmem:[%s6703_s27 + $0x40] sm:$0xf]  ;;  %v2210_v3 = vrot.slane %v2208_v29, 5 }
  0x24   : > { %v2182_v54 = vrot.slane %v2181_v27, 4  ;;  %8899 = vst [vmem:[#allocation13_spill] sm:$0xff] %v6845_v63  ;;  %v6851_v9 = vld [vmem:[%s6703_s27 + $0x24] sm:$0xf]  ;;  %v6859_v22 = vld [vmem:[%s6703_s27 + $0x28] sm:$0xf]  ;;  %5843 = vmatprep.mubr.msk.bf16.mxu1 %vm434_vm1, %v5176_v5  ;;  %v5177_v28 = vcombine.low %v6842_v62, %v6845_v63 }
  0x25   : > { %v2205_v0 = vor.u32 %v2204_v45, %v2200_v43  ;;  %v2177_v13 = vsel %vm6837_vm4, %v2172_v49, %v2176_v14  ;;  %v2196_v16 = vrot.slane %v2195_v60, 4  ;;  %v6866_v14 = vld [vmem:[%s6703_s27 + $0x2c] sm:$0x1]  ;;  %v6869_v29 = vld [vmem:[%s6703_s27 + $0x30] sm:$0xf]  ;;  %v2216_v5 = vshll.u32 %v6851_v9, 16 }
  0x26   : > { %v2187_v15 = vsel %vm6837_vm4, %v2182_v54, %v2186_v18  ;;  %v2213_v54 = vshrl.u32 %v6851_v9, 16  ;;  %v6877_v60 = vld [vmem:[%s6703_s27 + $0x34] sm:$0xf]  ;;  %v2232_v40 = vshll.u32 %v6866_v14, 16  ;;  %v6892_v33 = vld [vmem:[%s6703_s27 + $0x48] sm:$0xf] }
  0x27   : > { %v5368_v23 = vcombine.low %v2177_v13, %v2187_v15  ;;  %v2206_v25 = vrot.slane %v2205_v0, 4  ;;  %v2201_v18 = vsel %vm6837_vm4, %v2196_v16, %v2200_v43  ;;  %v2222_v43 = vshll.u32 %v6859_v22, 16  ;;  %v6887_v15 = vld [vmem:[%s6703_s27 + $0x38] sm:$0x1]  ;;  %8900 = vst [vmem:[#allocation14_spill] sm:$0xff] %v6892_v33 }
  0x28   : > { %v2226_v13 = vshrl.u32 %v6859_v22, 16  ;;  %v2215_v44 = vrot.slane %v2213_v54, 4  ;;  %v2240_v19 = vshll.u32 %v6869_v29, 16  ;;  %v6896_v49 = vld [vmem:[%s6703_s27 + $0x4c] sm:$0xf]  ;;  %v2234_v45 = vrot.slane %v2232_v40, 5 }
  0x29   : > { %5971 = vmatprep.mubr.msk.bf16.mxu0 %vm434_vm1, %v5368_v23  ;;  %v2211_v0 = vsel %vm6837_vm4, %v2206_v25, %v2210_v3  ;;  %5844 = vmatmul.mubr.msk.bf16.gmra.mrb[8].mxu1 %vm434_vm1, %v5177_v28  ;;  %v2237_v23 = vshrl.u32 %v6869_v29, 16  ;;  %v2218_v3 = vrot.slane %v2216_v5, 5  ;;  %v2224_v25 = vrot.slane %v2222_v43, 5  ;;  %8901 = vst [vmem:[#allocation15_spill] sm:$0xff] %v6896_v49  ;;  %v6907_v59 = vld [vmem:[%s6703_s27 + $0x58] sm:$0xf] }
  0x2a   : > { %v5369_v16 = vcombine.low %v2201_v18, %v2211_v0  ;;  %v2228_v28 = vrot.slane %v2226_v13, 4  ;;  %v2246_v54 = vshll.u32 %v6877_v60, 16  ;;  %v2250_v0 = vshrl.u32 %v6877_v60, 16  ;;  %v6904_v13 = vld [vmem:[%s6703_s27 + $0x54] sm:$0xf]  ;;  %8903 = vst [vmem:[#allocation17_spill] sm:$0xff] %v6907_v59 }
  0x2b   : > { %v2239_v18 = vrot.slane %v2237_v23, 4  ;;  %v2219_v37 = vor.u32 %v2218_v3, %v2215_v44  ;;  %v2242_v5 = vrot.slane %v2240_v19, 5  ;;  %v2256_v43 = vshll.u32 %v6887_v15, 16  ;;  %8902 = vst [vmem:[#allocation16_spill] sm:$0xff] %v6904_v13  ;;  %v6960_v57 = vld [vmem:[%s6703_s27 + $0x64] sm:$0xf] }
  0x2c   : > { %5972 = vmatmul.mubr.msk.bf16.vlgmr.msra.gmra.mrb[0].mxu0 %vm434_vm1, %v5369_v16  ;;  %v2229_v2 = vor.u32 %v2228_v28, %v2224_v25  ;;  %v2248_v16 = vrot.slane %v2246_v54, 5  ;;  %v2252_v23 = vrot.slane %v2250_v0, 4  ;;  %v5178_v58 = vcombine.low %v6892_v33, %v6896_v49  ;;  %v6920_v0 = vld [vmem:[%s6703_s27 + $0x3c] sm:$0xf]  ;;  %v6978_v12 = vld [vmem:[%s6703_s27 + $0x54] sm:$0xf] }
  0x2d   : > { %6004 = vmatpush3.bf16.msra.mxu0 %v6707_v7  ;;  %v2220_v19 = vrot.slane %v2219_v37, 4  ;;  %v2243_v3 = vor.u32 %v2242_v5, %v2239_v18  ;;  %v2258_v50 = vrot.slane %v2256_v43, 5  ;;  %v5179_v54 = vcombine.low %v6904_v13, %v6907_v59  ;;  %v6931_v5 = vld [vmem:[%s6703_s27 + $0x44] sm:$0x1]  ;;  %v6940_v7 = vld [vmem:[%s6703_s27 + $0x4c] sm:$0xf] }
  0x2e   : > { %6436 = vmatprep.subr.msk.bf16.mxu0 %vm483_vm0, %v6712_v8  ;;  %v2230_v44 = vrot.slane %v2229_v2, 4  ;;  %v2253_v53 = vor.u32 %v2252_v23, %v2248_v16  ;;  %5847 = vmatprep.mubr.msk.bf16.mxu1 %vm434_vm1, %v5178_v58  ;;  %v6923_v8 = vld [vmem:[%s6703_s27 + $0x40] sm:$0xf]  ;;  %v6934_v58 = vld [vmem:[%s6703_s27 + $0x48] sm:$0xf]  ;;  %v2294_v52 = vshll.u32 %v6940_v7, 16 }
  0x2f   : > { %v2225_v2 = vsel %vm6837_vm4, %v2220_v19, %v2224_v25  ;;  %v2244_v18 = vrot.slane %v2243_v3, 4  ;;  %v2261_v25 = vshrl.u32 %v6920_v0, 16  ;;  %v2264_v19 = vshll.u32 %v6920_v0, 16  ;;  %v6948_v3 = vld [vmem:[%s6703_s27 + $0x50] sm:$0x1] }
  0x30   : > { %v2235_v37 = vsel %vm6837_vm4, %v2230_v44, %v2234_v45  ;;  %v2254_v23 = vrot.slane %v2253_v53, 4  ;;  %v2270_v44 = vshll.u32 %v6923_v8, 16  ;;  %v6984_v10 = vld [vmem:[%s6703_s27 + $0x58] sm:$0xf] }
  0x31   : > { %v5370_v43 = vcombine.low %v2225_v2, %v2235_v37  ;;  %5848 = vmatmul.mubr.msk.bf16.gmra.mrb[12].mxu1 %vm434_vm1, %v5179_v54  ;;  %v2249_v45 = vsel %vm6837_vm4, %v2244_v18, %v2248_v16  ;;  %v2274_v54 = vshrl.u32 %v6923_v8, 16  ;;  %v2280_v2 = vshll.u32 %v6931_v5, 16  ;;  %v6957_v16 = vld [vmem:[%s6703_s27 + $0x60] sm:$0xf] }
  0x32   : > { %v2259_v53 = vsel %vm6837_vm4, %v2254_v23, %v2258_v50  ;;  %v2285_v37 = vshrl.u32 %v6934_v58, 16  ;;  %8904 = vst [vmem:[#allocation18_spill] sm:$0xff] %v6957_v16  ;;  %v2263_v40 = vrot.slane %v2261_v25, 4  ;;  %v2266_v28 = vrot.slane %v2264_v19, 5 }
  0x33   : > { %5975 = vmatprep.mubr.msk.bf16.mxu0 %vm434_vm1, %v5370_v43  ;;  %v5371_v18 = vcombine.low %v2249_v45, %v2259_v53  ;;  %v2272_v27 = vrot.slane %v2270_v44, 5  ;;  %v2276_v20 = vrot.slane %v2274_v54, 4  ;;  %v2288_v23 = vshll.u32 %v6934_v58, 16  ;;  %v6974_v43 = vld [vmem:[%s6703_s27 + $0x70] sm:$0xf] }
  0x34   : > { %v2287_v50 = vrot.slane %v2285_v37, 4  ;;  %v2267_v4 = vor.u32 %v2266_v28, %v2263_v40  ;;  %v2298_v45 = vshrl.u32 %v6940_v7, 16  ;;  %v2304_v25 = vshll.u32 %v6948_v3, 16  ;;  %v6971_v37 = vld [vmem:[%s6703_s27 + $0x6c] sm:$0xf] }
  0x35   : > { %5976 = vmatmul.mubr.msk.bf16.gmra.mrb[4].mxu0 %vm434_vm1, %v5371_v18  ;;  %v2277_v19 = vor.u32 %v2276_v20, %v2272_v27  ;;  %v2282_v44 = vrot.slane %v2280_v2, 5  ;;  %v2290_v53 = vrot.slane %v2288_v23, 5  ;;  %v5180_v54 = vcombine.low %v6957_v16, %v6960_v57  ;;  %v6994_v20 = vld [vmem:[%s6703_s27 + $0x60] sm:$0xf] }
  0x36   : > { %v2268_v28 = vrot.slane %v2267_v4, 4  ;;  %v2296_v18 = vrot.slane %v2294_v52, 5  ;;  %v2300_v42 = vrot.slane %v2298_v45, 4  ;;  %v2306_v4 = vrot.slane %v2304_v25, 5  ;;  %v6991_v45 = vld [vmem:[%s6703_s27 + $0x5c] sm:$0x1] }
  0x37   : > { %v2278_v23 = vrot.slane %v2277_v19, 4  ;;  %v2291_v17 = vor.u32 %v2290_v53, %v2287_v50  ;;  %5851 = vmatprep.mubr.msk.bf16.mxu1 %vm434_vm1, %v5180_v54  ;;  %v5181_v52 = vcombine.low %v6971_v37, %v6974_v43  ;;  %v2312_v2 = vshll.u32 %v6978_v12, 16 }
  0x38   : > { %v2273_v40 = vsel %vm6837_vm4, %v2268_v28, %v2272_v27  ;;  %v2301_v11 = vor.u32 %v2300_v42, %v2296_v18  ;;  %v7001_v27 = vld [vmem:[%s6703_s27 + $0x64] sm:$0xf]  ;;  %v2309_v28 = vshrl.u32 %v6978_v12, 16  ;;  %v2322_v54 = vshrl.u32 %v6984_v10, 16 }
  0x39   : > { %v2283_v50 = vsel %vm6837_vm4, %v2278_v23, %v2282_v44  ;;  %v2292_v19 = vrot.slane %v2291_v17, 4  ;;  %5852 = vmatmul.mubr.msk.bf16.gmra.mrb[16].mxu1 %vm434_vm1, %v5181_v52  ;;  %v7007_v44 = vld [vmem:[%s6703_s27 + $0x68] sm:$0x1]  ;;  %v2318_v23 = vshll.u32 %v6984_v10, 16  ;;  %v2328_v53 = vshll.u32 %v6991_v45, 16 }
  0x3a   : > { %v5372_v42 = vcombine.low %v2273_v40, %v2283_v50  ;;  %v2302_v25 = vrot.slane %v2301_v11, 4  ;;  %v7015_v40 = vld [vmem:[%s6703_s27 + $0x78] sm:$0xf]  ;;  %v2311_v52 = vrot.slane %v2309_v28, 4  ;;  %v2314_v50 = vrot.slane %v2312_v2, 5 }
  0x3b   : > { %v2297_v17 = vsel %vm6837_vm4, %v2292_v19, %v2296_v18  ;;  %v2333_v16 = vshrl.u32 %v6994_v20, 16  ;;  %v7022_v18 = vld [vmem:[%s6703_s27 + $0x7c] sm:$0xf]  ;;  %v2320_v59 = vrot.slane %v2318_v23, 5  ;;  %v2324_v13 = vrot.slane %v2322_v54, 4 }
  0x3c   : > { %5979 = vmatprep.mubr.msk.bf16.mxu0 %vm434_vm1, %v5372_v42  ;;  %v2307_v11 = vsel %vm6837_vm4, %v2302_v25, %v2306_v4  ;;  %v2330_v49 = vrot.slane %v2328_v53, 5  ;;  %v2315_v33 = vor.u32 %v2314_v50, %v2311_v52  ;;  %v2336_v62 = vshll.u32 %v6994_v20, 16  ;;  %v7035_v54 = vld [vmem:[%s6703_s27 + $0x88] sm:$0xf] }
  0x3d   : > { %v5373_v19 = vcombine.low %v2297_v17, %v2307_v11  ;;  %v2335_v63 = vrot.slane %v2333_v16, 4  ;;  %v2342_v42 = vshll.u32 %v7001_v27, 16  ;;  %v2325_v4 = vor.u32 %v2324_v13, %v2320_v59  ;;  %v7032_v17 = vld [vmem:[%s6703_s27 + $0x84] sm:$0xf] }
  0x3e   : > { %v2346_v2 = vshrl.u32 %v7001_v27, 16  ;;  %v2352_v25 = vshll.u32 %v7007_v44, 16  ;;  %v5182_v28 = vcombine.low %v7015_v40, %v7022_v18  ;;  %v2316_v53 = vrot.slane %v2315_v33, 4 }
  0x3f   : > { %5980 = vmatmul.mubr.msk.bf16.gmra.mrb[8].mxu0 %vm434_vm1, %v5373_v19  ;;  %v2338_v23 = vrot.slane %v2336_v62, 5  ;;  %v2344_v11 = vrot.slane %v2342_v42, 5  ;;  %v2326_v50 = vrot.slane %v2325_v4, 4  ;;  %v5183_v33 = vcombine.low %v7032_v17, %v7035_v54 }
  0x40   : > { %v2348_v19 = vrot.slane %v2346_v2, 4  ;;  %5855 = vmatprep.mubr.msk.bf16.mxu1 %vm434_vm1, %v5182_v28  ;;  %v2321_v32 = vsel %vm6837_vm4, %v2316_v53, %v2320_v59  ;;  %v2354_v52 = vrot.slane %v2352_v25, 5  ;;  %v924_v4 = vshrl.u32 %v7015_v40, 16  ;;  %v7050_v2 = vld [vmem:[%s6703_s27 + $0x90] sm:$0xf] }
  0x41   : > { %v2339_v16 = vor.u32 %v2338_v23, %v2335_v63  ;;  %v2331_v62 = vsel %vm6837_vm4, %v2326_v50, %v2330_v49  ;;  %v7053_v28 = vld [vmem:[%s6703_s27 + $0x94] sm:$0xf]  ;;  %5856 = vmatmul.mubr.msk.bf16.gmra.mrb[20].mxu1 %vm434_vm1, %v5183_v33  ;;  %v5400_v49 = vrot.slane %v6779_v46, 9  ;;  %v7065_v25 = vld [vmem:[%s6703_s27 + $0x9c] sm:$0xf]  ;;  %v2860_v23 = vrot.slane %v6787_v51, 5 }
  0x42   : > { %v2349_v42 = vor.u32 %v2348_v19, %v2344_v11  ;;  %v5374_v34 = vcombine.low %v2321_v32, %v2331_v62  ;;  %v5401_v32 = vrot.slane %v6801_v56, 9  ;;  %v7072_v19 = vld [vmem:[%s6703_s27 + $0xa0] sm:$0xf]  ;;  %v5184_v51 = vcombine.low %v7050_v2, %v7053_v28 }
  0x43   : > { %v2340_v13 = vrot.slane %v2339_v16, 4  ;;  %v8907_v16 = vrot.slane %v6813_v1, 5  ;;  %v5185_v46 = vcombine.low %v7065_v25, %v7072_v19  ;;  %v8908_v62 = vrot.slane %v6798_v55, 5 }
  0x44   : > { %v2350_v53 = vrot.slane %v2349_v42, 4  ;;  %5983 = vmatprep.mubr.msk.bf16.mxu0 %vm434_vm1, %v5374_v34  ;;  %v951_v42 = vshll.u32 %v7032_v17, 16  ;;  %v2861_v34 = vsel %vm7059_vm7, %v5400_v49, %v2860_v23  ;;  %5859 = vmatprep.mubr.msk.bf16.mxu1 %vm434_vm1, %v5184_v51 }
  0x45   : > { %v2869_v50 = vrot.slane %v8907_v16, 4  ;;  %v2345_v33 = vsel %vm6837_vm4, %v2340_v13, %v2344_v11  ;;  %v2862_v16 = vrot.slane %v2860_v23, 4  ;;  %v961_v11 = vshrl.u32 %v7035_v54, 16  ;;  %v7108_v13 = vld [vmem:[%s6703_s27 + $0xac] sm:$0xf] }
  0x46   : > { %v2355_v56 = vsel %vm6837_vm4, %v2350_v53, %v2354_v52  ;;  %v8909_v53 = vrot.slane %v6813_v1, 5  ;;  %v8910_v23 = vrot.slane %v6819_v6, 5  ;;  %v2877_v6 = vrot.slane %v6866_v14, 5  ;;  %v7125_v14 = vld [vmem:[%s6703_s27 + $0xb4] sm:$0xf] }
  0x47   : > { %v5375_v59 = vcombine.low %v2345_v33, %v2355_v56  ;;  %v2864_v52 = vsel %vm7059_vm7, %v2862_v16, %v8908_v62  ;;  %v7105_v56 = vld [vmem:[%s6703_s27 + $0xa8] sm:$0xf]  ;;  %v5402_v62 = vrot.slane %v6851_v9, 9  ;;  %v2881_v16 = vrot.slane %v6877_v60, 5  ;;  %v5319_v1 = vld [vmem:[%s6703_s27 + $0x90] sm:$0xf] }
  0x48   : > { %v2868_v49 = vsel %vm7059_vm7, %v5401_v32, %v8909_v53  ;;  %v2871_v33 = vsel %vm7059_vm7, %v2869_v50, %v8910_v23  ;;  %v5417_v55 = vcombine.low %v2861_v34, %v2864_v52  ;;  %v2874_v32 = vrot.slane %v6859_v22, 5  ;;  %v7131_v52 = vld [vmem:[%s6703_s27 + $0xb8] sm:$0xf] }
  0x49   : > { %5984 = vmatmul.mubr.msk.bf16.gmra.mrb[12].mxu0 %vm434_vm1, %v5375_v59  ;;  %v5403_v50 = vrot.slane %v6869_v29, 9  ;;  %v2884_v53 = vrot.slane %v6887_v15, 5  ;;  %v5418_v23 = vcombine.low %v2868_v49, %v2871_v33  ;;  %5860 = vmatmul.mubr.msk.bf16.gmra.mrb[24].mxu1 %vm434_vm1, %v5185_v46  ;;  %v5186_v22 = vcombine.low %v7105_v56, %v7108_v13 }
  0x4a   : > { %6005 = vmatprep.mubr.msk.bf16.mxu0 %vm434_vm1, %v5417_v55  ;;  %v2875_v9 = vsel %vm7059_vm7, %v5402_v62, %v2874_v32  ;;  %v2876_v59 = vrot.slane %v2874_v32, 4  ;;  %v2883_v34 = vrot.slane %v2881_v16, 4  ;;  %v7141_v62 = vld [vmem:[%s6703_s27 + $0x8] sm:$0x1]  ;;  %v5404_v29 = vrot.slane %v6920_v0, 9 }
  0x4b   : > { %v2882_v49 = vsel %vm7059_vm7, %v5403_v50, %v2881_v16  ;;  %5863 = vmatprep.mubr.msk.bf16.mxu1 %vm434_vm1, %v5186_v22  ;;  %v5187_v50 = vcombine.low %v7125_v14, %v7131_v52  ;;  %v2888_v16 = vrot.slane %v6923_v8, 5  ;;  %v5405_v22 = vrot.slane %v6934_v58, 9 }
  0x4c   : > { %v2878_v46 = vsel %vm7059_vm7, %v2876_v59, %v2877_v6  ;;  %v2885_v15 = vsel %vm7059_vm7, %v2883_v34, %v2884_v53  ;;  %v7148_v6 = vld [vmem:[%s6703_s27 + $0x14] sm:$0x1]  ;;  %v2891_v59 = vrot.slane %v6931_v5, 5  ;;  %v2898_v53 = vrot.slane %v6948_v3, 5 }
  0x4d   : > { %v5419_v32 = vcombine.low %v2875_v9, %v2878_v46  ;;  %v5420_v55 = vcombine.low %v2882_v49, %v2885_v15  ;;  %v2895_v9 = vrot.slane %v6940_v7, 5  ;;  %v703_v34 = vshll.u32 %v7141_v62, 16 }
  0x4e   : > { %v2889_v0 = vsel %vm7059_vm7, %v5404_v29, %v2888_v16  ;;  %v2890_v46 = vrot.slane %v2888_v16, 4  ;;  %v696_v8 = vsel %vm6837_vm4, %v6781_v47, %v6743_v24  ;;  %v727_v5 = vshll.u32 %v7148_v6, 16  ;;  %v7198_v16 = vld [vmem:[%s6703_s27 + $0x20] sm:$0x1] }
  0x4f   : > { %v2897_v7 = vrot.slane %v2895_v9, 4  ;;  %v705_v58 = vrot.slane %v703_v34, 5  ;;  %v720_v3 = vsel %vm6837_vm4, %v6807_v61, %v6764_v39  ;;  %v2902_v29 = vrot.slane %v6984_v10, 5 }
  0x50   : > { %v2892_v24 = vsel %vm7059_vm7, %v2890_v46, %v2891_v59  ;;  %v729_v47 = vrot.slane %v727_v5, 5  ;;  %v2905_v39 = vrot.slane %v6991_v45, 5  ;;  %v5407_v10 = vrot.slane %v6994_v20, 9  ;;  %v7203_v59 = vld [vmem:[%s8854_s1 + $0x1c] sm:$0xf] }
  0x51   : > { %6006 = vmatmul.mubr.msk.bf16.vlgmr.msra.gmra.mrb[0].mxu0 %vm434_vm1, %v5418_v23  ;;  %v5406_v23 = vrot.slane %v6978_v12, 9  ;;  %5864 = vmatmul.mubr.msk.bf16.gmra.mrb[28].mxu1 %vm434_vm1, %v5187_v50  ;;  %v5421_v15 = vcombine.low %v2889_v0, %v2892_v24  ;;  %v7183_v49 = vsel %vm7059_vm7, %v2897_v7, %v2898_v53  ;;  %v706_v12 = vsel %vm6837_vm4, %v6783_v48, %v705_v58 }
  0x52   : > { %6038 = vmatpush3.bf16.msra.mxu0 %v6740_v21  ;;  %6009 = vmatprep.mubr.msk.bf16.mxu0 %vm434_vm1, %v5419_v32  ;;  %v7178_v21 = vsel %vm7059_vm7, %v5405_v22, %v2895_v9  ;;  %v5205_v61 = vcombine.low %v696_v8, %v706_v12  ;;  %v730_v32 = vsel %vm6837_vm4, %v6832_v35, %v729_v47  ;;  %v2904_v45 = vrot.slane %v2902_v29, 4 }
  0x53   : > { %v7194_v50 = vsel %vm7059_vm7, %v5406_v23, %v2902_v29  ;;  %v5206_v48 = vcombine.low %v720_v3, %v730_v32  ;;  %v2909_v22 = vrot.slane %v7001_v27, 5  ;;  %v2912_v35 = vrot.slane %v7007_v44, 5  ;;  %6437 = vmatprep.subr.msk.bf16.mxu0 %vm483_vm0, %v7203_v59  ;;  %v7228_v3 = vld [vmem:[%s6703_s27 + $0x2c] sm:$0x1] }
  0x54   : > { %5869 = vmatprep.mubr.msk.bf16.mxu1 %vm434_vm1, %v5205_v61  ;;  %v8911_v20 = vshrl.u32 %v6747_v26, 16  ;;  %v8912_v53 = vshll.u32 %v6747_v26, 16  ;;  %v741_v0 = vshll.u32 %v6753_v30, 16  ;;  %v8913_v46 = vshrl.u32 %v6753_v30, 16  ;;  %v5312_v61 = vld [vmem:[%s6703_s27 + $0x74] sm:$0x1] }
  0x55   : > { %v5422_v44 = vcombine.low %v7178_v21, %v7183_v49  ;;  %v2906_v8 = vsel %vm7059_vm7, %v2904_v45, %v2905_v39  ;;  %v2911_v5 = vrot.slane %v2909_v22, 4  ;;  %v751_v7 = vshll.u32 %v7198_v16, 16  ;;  %v5310_v21 = vld [vmem:[%s6703_s27 + $0x6c] sm:$0xf]  ;;  %v5311_v39 = vld [vmem:[%s6703_s27 + $0x70] sm:$0xf] }
  0x56   : > { %v734_v9 = vrot.slane %v8911_v20, 4  ;;  %v737_v34 = vrot.slane %v8912_v53, 5  ;;  %v747_v27 = vrot.slane %v8913_v46, 4  ;;  %v7225_v26 = vsel %vm7059_vm7, %v5407_v10, %v2909_v22 }
  0x57   : > { %v743_v30 = vrot.slane %v741_v0, 5  ;;  %v8914_v23 = vshrl.u32 %v6761_v36, 16  ;;  %v5423_v47 = vcombine.low %v7194_v50, %v2906_v8  ;;  %v7237_v29 = vsel %vm7059_vm7, %v2911_v5, %v2912_v35  ;;  %v7252_v0 = vld [vmem:[%s6703_s27 + $0x78] sm:$0xf]  ;;  %v8926_v5 = vld [vmem:[#allocation13_spill] sm:$0xff] }
  0x58   : > { %v738_v58 = vor.u32 %v737_v34, %v734_v9  ;;  %v765_v12 = vshll.u32 %v6768_v41, 16  ;;  %v753_v45 = vrot.slane %v751_v7, 5  ;;  %v5408_v20 = vrot.slane %v5310_v21, 9 }
  0x59   : > { %6010 = vmatmul.mubr.msk.bf16.gmra.mrb[4].mxu0 %vm434_vm1, %v5420_v55  ;;  %v758_v24 = vrot.slane %v8914_v23, 4  ;;  %v8915_v55 = vshll.u32 %v6761_v36, 16  ;;  %5870 = vmatmul.mubr.msk.bf16.vlgmr.msra.gmra.mrb[0].mxu1 %vm434_vm1, %v5206_v48  ;;  %v748_v10 = vor.u32 %v747_v27, %v743_v30  ;;  %v775_v36 = vshll.u32 %v7228_v3, 16 }
  0x5a   : > { %6013 = vmatprep.mubr.msk.bf16.mxu0 %vm434_vm1, %v5421_v15  ;;  %v739_v32 = vrot.slane %v738_v58, 4  ;;  %v8916_v15 = vshrl.u32 %v6768_v41, 16  ;;  %5902 = vmatpush3.bf16.msra.mxu1 %v6756_v31  ;;  %v767_v35 = vrot.slane %v765_v12, 5  ;;  %v2916_v34 = vrot.slane %v5311_v39, 5 }
  0x5b   : > { %v761_v49 = vrot.slane %v8915_v55, 5  ;;  %v749_v53 = vrot.slane %v748_v10, 4  ;;  %v2919_v48 = vrot.slane %v5312_v61, 5  ;;  %v777_v41 = vrot.slane %v775_v36, 5  ;;  %v7264_v55 = vld [vmem:[%s6703_s27 + $0x7c] sm:$0xf] }
  0x5c   : > { %v771_v50 = vrot.slane %v8916_v15, 4  ;;  %v744_v9 = vsel %vm6837_vm4, %v739_v32, %v743_v30  ;;  %v2381_v31 = vshrl.u32 %v7252_v0, 16  ;;  %v2918_v58 = vrot.slane %v2916_v34, 4  ;;  %v7273_v61 = vld [vmem:[%s6703_s27 + $0x80] sm:$0x1] }
  0x5d   : > { %v762_v22 = vor.u32 %v761_v49, %v758_v24  ;;  %v754_v7 = vsel %vm6837_vm4, %v749_v53, %v753_v45  ;;  %v2917_v21 = vsel %vm7059_vm7, %v5408_v20, %v2916_v34  ;;  %v5424_v12 = vcombine.low %v7225_v26, %v7237_v29  ;;  %v7279_v10 = vld [vmem:[%s8854_s1 + $0xc] sm:$0xf]  ;;  %v5317_v49 = vld [vmem:[%s6703_s27 + $0x88] sm:$0xf]  ;;  %v5327_v36 = vld [vmem:[%s6703_s27 + $0xb0] sm:$0x1] }
  0x5e   : > { %v772_v27 = vor.u32 %v771_v50, %v767_v35  ;;  %v5207_v30 = vcombine.low %v744_v9, %v754_v7  ;;  %v2920_v39 = vsel %vm7059_vm7, %v2918_v58, %v2919_v48  ;;  %v2384_v32 = vshll.u32 %v7252_v0, 16  ;;  %6432 = vmatprep.subr.msk.bf16.mxu1 %vm483_vm0, %v7279_v10  ;;  %v8918_v9 = vld [vmem:[#allocation10_spill] sm:$0xff]  ;;  %v8921_v7 = vld [vmem:[#allocation11_spill] sm:$0xff] }
  0x5f   : > { %v763_v46 = vrot.slane %v762_v22, 4  ;;  %v7285_v26 = vrot.slane %v2381_v31, 4  ;;  %v5409_v45 = vrot.slane %v7252_v0, 9  ;;  %v5425_v50 = vcombine.low %v2917_v21, %v2920_v39 }
  0x60   : > { %v773_v24 = vrot.slane %v772_v27, 4  ;;  %5873 = vmatprep.mubr.msk.bf16.mxu1 %vm434_vm1, %v5207_v30  ;;  %v2926_v20 = vrot.slane %v7273_v61, 5  ;;  %v8919_v53 = vshrl.u32 %v8918_v9, 16  ;;  %v8920_v48 = vshll.u32 %v8918_v9, 16  ;;  %v7303_v27 = vld [vmem:[%s6703_s27 + $0x44] sm:$0x1] }
  0x61   : > { %v768_v23 = vsel %vm6837_vm4, %v763_v46, %v767_v35  ;;  %6014 = vmatmul.mubr.msk.bf16.gmra.mrb[8].mxu0 %vm434_vm1, %v5422_v44  ;;  %8917 = vst [vmem:[#allocation19_spill] sm:$0xff] %v7285_v26  ;;  %v2923_v35 = vrot.slane %v7264_v55, 5  ;;  %v789_v58 = vshll.u32 %v8921_v7, 16  ;;  %v8922_v30 = vshrl.u32 %v8921_v7, 16  ;;  %v6533_v26 = vld [vmem:[%s6703_s27 + $0x88] sm:$0xf] }
  0x62   : > { %6017 = vmatprep.mubr.msk.bf16.mxu0 %vm434_vm1, %v5423_v47  ;;  %v778_v44 = vsel %vm6837_vm4, %v773_v24, %v777_v41  ;;  %v7292_v47 = vld [vmem:[%s6703_s27 + $0x38] sm:$0x1]  ;;  %v782_v34 = vrot.slane %v8919_v53, 4  ;;  %v785_v46 = vrot.slane %v8920_v48, 5  ;;  %v5316_v24 = vld [vmem:[%s6703_s27 + $0x84] sm:$0xf] }
  0x63   : > { %v5208_v15 = vcombine.low %v768_v23, %v778_v44  ;;  %v2924_v41 = vsel %vm7059_vm7, %v5409_v45, %v2923_v35  ;;  %v2925_v31 = vrot.slane %v2923_v35, 4  ;;  %v795_v23 = vrot.slane %v8922_v30, 4  ;;  %v8923_v44 = vld [vmem:[#allocation12_spill] sm:$0xff] }
  0x64   : > { %v786_v21 = vor.u32 %v785_v46, %v782_v34  ;;  %v799_v39 = vshll.u32 %v7292_v47, 16  ;;  %v8924_v9 = vshrl.u32 %v8923_v44, 16  ;;  %v8925_v48 = vshll.u32 %v8923_v44, 16  ;;  %v5318_v34 = vld [vmem:[%s6703_s27 + $0x8c] sm:$0x1] }
  0x65   : > { %5874 = vmatmul.mubr.msk.bf16.gmra.mrb[4].mxu1 %vm434_vm1, %v5208_v15  ;;  %v2927_v45 = vsel %vm7059_vm7, %v2925_v31, %v2926_v20  ;;  %v791_v35 = vrot.slane %v789_v58, 5  ;;  %v813_v7 = vshll.u32 %v8926_v5, 16  ;;  %v8927_v30 = vshrl.u32 %v8926_v5, 16  ;;  %v5320_v31 = vld [vmem:[%s6703_s27 + $0x94] sm:$0xf] }
  0x66   : > { %v806_v53 = vrot.slane %v8924_v9, 4  ;;  %v809_v15 = vrot.slane %v8925_v48, 5  ;;  %v5426_v46 = vcombine.low %v2924_v41, %v2927_v45  ;;  %v787_v60 = vrot.slane %v786_v21, 4 }
  0x67   : > { %v819_v8 = vrot.slane %v8927_v30, 4  ;;  %v801_v33 = vrot.slane %v799_v39, 5  ;;  %v796_v44 = vor.u32 %v795_v23, %v791_v35  ;;  %v815_v48 = vrot.slane %v813_v7, 5  ;;  %v5321_v39 = vld [vmem:[%s6703_s27 + $0x98] sm:$0x1] }
  0x68   : > { %v810_v9 = vor.u32 %v809_v15, %v806_v53  ;;  %v823_v51 = vshll.u32 %v7303_v27, 16  ;;  %v5410_v20 = vrot.slane %v5316_v24, 9  ;;  %v792_v5 = vsel %vm6837_vm4, %v787_v60, %v791_v35 }
  0x69   : > { %6018 = vmatmul.mubr.msk.bf16.gmra.mrb[12].mxu0 %vm434_vm1, %v5424_v12  ;;  %v2930_v58 = vrot.slane %v5317_v49, 5  ;;  %v2933_v21 = vrot.slane %v5318_v34, 5  ;;  %v797_v53 = vrot.slane %v796_v44, 4  ;;  %v820_v15 = vor.u32 %v819_v8, %v815_v48  ;;  %v7339_v49 = vld [vmem:[%s6703_s27 + $0x50] sm:$0x1]  ;;  %v8928_v34 = vld [vmem:[#allocation14_spill] sm:$0xff] }
  0x6a   : > { %6021 = vmatprep.mubr.msk.bf16.mxu0 %vm434_vm1, %v5425_v50  ;;  %v811_v41 = vrot.slane %v810_v9, 4  ;;  %v825_v45 = vrot.slane %v823_v51, 5  ;;  %v5411_v12 = vrot.slane %v5319_v1, 9  ;;  %v2937_v50 = vrot.slane %v5320_v31, 5 }
  0x6b   : > { %v2931_v24 = vsel %vm7059_vm7, %v5410_v20, %v2930_v58  ;;  %v2932_v7 = vrot.slane %v2930_v58, 4  ;;  %v802_v60 = vsel %vm6837_vm4, %v797_v53, %v801_v33  ;;  %v821_v35 = vrot.slane %v820_v15, 4  ;;  %v8931_v58 = vld [vmem:[#allocation15_spill] sm:$0xff] }
  0x6c   : > { %v816_v23 = vsel %vm6837_vm4, %v811_v41, %v815_v48  ;;  %v2940_v30 = vrot.slane %v5321_v39, 5  ;;  %v8929_v8 = vshrl.u32 %v8928_v34, 16  ;;  %v5209_v1 = vcombine.low %v792_v5, %v802_v60 }
  0x6d   : > { %v2934_v9 = vsel %vm7059_vm7, %v2932_v7, %v2933_v21  ;;  %v2938_v44 = vsel %vm7059_vm7, %v5411_v12, %v2937_v50  ;;  %v2939_v48 = vrot.slane %v2937_v50, 4  ;;  %v826_v33 = vsel %vm6837_vm4, %v821_v35, %v825_v45  ;;  %v7359_v45 = vld [vmem:[%s6703_s27 + $0x5c] sm:$0x1]  ;;  %v8933_v35 = vld [vmem:[#allocation16_spill] sm:$0xff] }
  0x6e   : > { %v830_v51 = vrot.slane %v8929_v8, 4  ;;  %v5427_v20 = vcombine.low %v2931_v24, %v2934_v9  ;;  %v8930_v31 = vshll.u32 %v8928_v34, 16  ;;  %v837_v39 = vshll.u32 %v8931_v58, 16  ;;  %5877 = vmatprep.mubr.msk.bf16.mxu1 %vm434_vm1, %v5209_v1  ;;  %v5322_v24 = vld [vmem:[%s6703_s27 + $0x9c] sm:$0xf] }
  0x6f   : > { %v5210_v5 = vcombine.low %v816_v23, %v826_v33  ;;  %v2941_v21 = vsel %vm7059_vm7, %v2939_v48, %v2940_v30  ;;  %v8932_v53 = vshrl.u32 %v8931_v58, 16  ;;  %v847_v12 = vshll.u32 %v7339_v49, 16  ;;  %v5323_v8 = vld [vmem:[%s6703_s27 + $0xa0] sm:$0xf]  ;;  %v5324_v30 = vld [vmem:[%s6703_s27 + $0xa4] sm:$0x1] }
  0x70   : > { %v833_v41 = vrot.slane %v8930_v31, 5  ;;  %v5428_v7 = vcombine.low %v2938_v44, %v2941_v21  ;;  %v839_v60 = vrot.slane %v837_v39, 5  ;;  %v8934_v23 = vshrl.u32 %v8933_v35, 16  ;;  %v8936_v33 = vld [vmem:[#allocation17_spill] sm:$0xff]  ;;  %v5325_v31 = vld [vmem:[%s6703_s27 + $0xa8] sm:$0xf] }
  0x71   : > { %v843_v15 = vrot.slane %v8932_v53, 4  ;;  %6022 = vmatmul.mubr.msk.bf16.gmra.mrb[16].mxu0 %vm434_vm1, %v5426_v46  ;;  %5878 = vmatmul.mubr.msk.bf16.gmra.mrb[8].mxu1 %vm434_vm1, %v5210_v5  ;;  %v849_v1 = vrot.slane %v847_v12, 5  ;;  %v8935_v9 = vshll.u32 %v8933_v35, 16  ;;  %v861_v46 = vshll.u32 %v8936_v33, 16  ;;  %v5326_v53 = vld [vmem:[%s6703_s27 + $0xac] sm:$0xf] }
  0x72   : > { %v834_v50 = vor.u32 %v833_v41, %v830_v51  ;;  %v854_v34 = vrot.slane %v8934_v23, 4  ;;  %6025 = vmatprep.mubr.msk.bf16.mxu0 %vm434_vm1, %v5427_v20  ;;  %v8937_v51 = vshrl.u32 %v8936_v33, 16  ;;  %v871_v39 = vshll.u32 %v7359_v45, 16 }
  0x73   : > { %v857_v48 = vrot.slane %v8935_v9, 5  ;;  %v844_v58 = vor.u32 %v843_v15, %v839_v60  ;;  %v5412_v21 = vrot.slane %v5322_v24, 9  ;;  %v863_v23 = vrot.slane %v861_v46, 5 }
  0x74   : > { %v867_v44 = vrot.slane %v8937_v51, 4  ;;  %v835_v41 = vrot.slane %v834_v50, 4  ;;  %v2944_v20 = vrot.slane %v5323_v8, 5  ;;  %v2947_v12 = vrot.slane %v5324_v30, 5  ;;  %v7385_v8 = vld [vmem:[%s6703_s27 + $0x68] sm:$0x1] }
  0x75   : > { %v858_v5 = vor.u32 %v857_v48, %v854_v34  ;;  %v845_v9 = vrot.slane %v844_v58, 4  ;;  %v873_v22 = vrot.slane %v871_v39, 5  ;;  %v5413_v33 = vrot.slane %v5325_v31, 9  ;;  %v8938_v30 = vld [vmem:[#allocation18_spill] sm:$0xff] }
  0x76   : > { %v840_v35 = vsel %vm6837_vm4, %v835_v41, %v839_v60  ;;  %v868_v29 = vor.u32 %v867_v44, %v863_v23  ;;  %v2945_v15 = vsel %vm7059_vm7, %v5412_v21, %v2944_v20  ;;  %v2946_v50 = vrot.slane %v2944_v20, 4 }
  0x77   : > { %v859_v51 = vrot.slane %v858_v5, 4  ;;  %v850_v24 = vsel %vm6837_vm4, %v845_v9, %v849_v1  ;;  %v2951_v34 = vrot.slane %v5326_v53, 5  ;;  %v2954_v48 = vrot.slane %v5327_v36, 5 }
  0x78   : > { %v8939_v46 = vshrl.u32 %v8938_v30, 16  ;;  %v5211_v41 = vcombine.low %v840_v35, %v850_v24  ;;  %v869_v44 = vrot.slane %v868_v29, 4  ;;  %v2948_v58 = vsel %vm7059_vm7, %v2946_v50, %v2947_v12  ;;  %v7406_v12 = vld [vmem:[%s6703_s27 + $0x74] sm:$0x1]  ;;  %v5329_v50 = vld [vmem:[%s6703_s27 + $0xb8] sm:$0xf] }
  0x79   : > { %v864_v31 = vsel %vm6837_vm4, %v859_v51, %v863_v23  ;;  %6026 = vmatmul.mubr.msk.bf16.gmra.mrb[20].mxu0 %vm434_vm1, %v5428_v7  ;;  %v5429_v1 = vcombine.low %v2945_v15, %v2948_v58  ;;  %v2952_v36 = vsel %vm7059_vm7, %v5413_v33, %v2951_v34  ;;  %v2953_v39 = vrot.slane %v2951_v34, 4  ;;  %v5328_v15 = vld [vmem:[%s6703_s27 + $0xb4] sm:$0xf] }
  0x7a   : > { %v878_v60 = vrot.slane %v8939_v46, 4  ;;  %v8940_v21 = vshll.u32 %v8938_v30, 16  ;;  %5881 = vmatprep.mubr.msk.bf16.mxu1 %vm434_vm1, %v5211_v41  ;;  %v874_v29 = vsel %vm6837_vm4, %v869_v44, %v873_v22  ;;  %v885_v5 = vshll.u32 %v6960_v57, 16  ;;  %v5330_v41 = vld [vmem:[%s6703_s27 + $0xbc] sm:$0x1] }
  0x7b   : > { %v8941_v7 = vshrl.u32 %v6960_v57, 16  ;;  %v895_v20 = vshll.u32 %v7385_v8, 16  ;;  %v5212_v35 = vcombine.low %v864_v31, %v874_v29  ;;  %6029 = vmatprep.mubr.msk.bf16.mxu0 %vm434_vm1, %v5429_v1  ;;  %v2955_v9 = vsel %vm7059_vm7, %v2953_v39, %v2954_v48  ;;  %v5331_v1 = vld [vmem:[%s6703_s27 + $0xc0] sm:$0xf]  ;;  %v5332_v29 = vld [vmem:[%s6703_s27 + $0xc4] sm:$0xf] }
  0x7c   : > { %v881_v53 = vrot.slane %v8940_v21, 5  ;;  %v8942_v22 = vshrl.u32 %v6971_v37, 16  ;;  %v5430_v57 = vcombine.low %v2952_v36, %v2955_v9  ;;  %v887_v24 = vrot.slane %v885_v5, 5  ;;  %v5333_v5 = vld [vmem:[%s6703_s27 + $0xc8] sm:$0x1] }
  0x7d   : > { %v891_v23 = vrot.slane %v8941_v7, 4  ;;  %v897_v34 = vrot.slane %v895_v20, 5  ;;  %v8943_v30 = vshll.u32 %v6971_v37, 16  ;;  %5882 = vmatmul.mubr.msk.bf16.gmra.mrb[12].mxu1 %vm434_vm1, %v5212_v35  ;;  %v909_v48 = vshll.u32 %v6974_v43, 16 }
  0x7e   : > { %v882_v33 = vor.u32 %v881_v53, %v878_v60  ;;  %v902_v51 = vrot.slane %v8942_v22, 4  ;;  %v8944_v60 = vshrl.u32 %v6974_v43, 16  ;;  %v919_v58 = vshll.u32 %v7406_v12, 16 }
  0x7f   : > { %v905_v46 = vrot.slane %v8943_v30, 5  ;;  %v892_v39 = vor.u32 %v891_v23, %v887_v24  ;;  %v5414_v21 = vrot.slane %v5328_v15, 9  ;;  %v2958_v53 = vrot.slane %v5329_v50, 5 }
  0x80   : > { %v883_v31 = vrot.slane %v882_v33, 4  ;;  %v915_v44 = vrot.slane %v8944_v60, 4  ;;  %v911_v7 = vrot.slane %v909_v48, 5  ;;  %v921_v20 = vrot.slane %v919_v58, 5 }
  0x81   : > { %v906_v36 = vor.u32 %v905_v46, %v902_v51  ;;  %v2961_v35 = vrot.slane %v5330_v41, 5  ;;  %v893_v9 = vrot.slane %v892_v39, 4  ;;  %v2959_v43 = vsel %vm7059_vm7, %v5414_v21, %v2958_v53  ;;  %6030 = vmatmul.mubr.msk.bf16.gmra.mrb[24].mxu0 %vm434_vm1, %v5430_v57  ;;  %v7438_v41 = vld [vmem:[%s6703_s27 + $0x80] sm:$0x1] }
  0x82   : > { %v888_v37 = vsel %vm6837_vm4, %v883_v31, %v887_v24  ;;  %v2960_v22 = vrot.slane %v2958_v53, 4  ;;  %v916_v23 = vor.u32 %v915_v44, %v911_v7  ;;  %v5415_v51 = vrot.slane %v5331_v1, 9 }
  0x83   : > { %v907_v33 = vrot.slane %v906_v36, 4  ;;  %v2965_v15 = vrot.slane %v5332_v29, 5  ;;  %v2968_v50 = vrot.slane %v5333_v5, 5  ;;  %v898_v30 = vsel %vm6837_vm4, %v893_v9, %v897_v34  ;;  %v7455_v29 = vld [vmem:[%s6703_s27 + $0x8c] sm:$0x1] }
  0x84   : > { %v2962_v46 = vsel %vm7059_vm7, %v2960_v22, %v2961_v35  ;;  %v926_v31 = vrot.slane %v924_v4, 4  ;;  %v5213_v57 = vcombine.low %v888_v37, %v898_v30  ;;  %v917_v48 = vrot.slane %v916_v23, 4  ;;  %v7475_v30 = vld [vmem:[%s6703_s27 + $0x24] sm:$0xf] }
  0x85   : > { %v912_v24 = vsel %vm6837_vm4, %v907_v33, %v911_v7  ;;  %v5431_v60 = vcombine.low %v2959_v43, %v2962_v46  ;;  %v2966_v44 = vsel %vm7059_vm7, %v5415_v51, %v2965_v15  ;;  %v2967_v34 = vrot.slane %v2965_v15, 4  ;;  %v7467_v33 = vld [vmem:[%s6703_s27 + $0x1c] sm:$0xf] }
  0x86   : > { %v8945_v58 = vshll.u32 %v7015_v40, 16  ;;  %v933_v39 = vshll.u32 %v7022_v18, 16  ;;  %v8946_v36 = vshrl.u32 %v7022_v18, 16  ;;  %5885 = vmatprep.mubr.msk.bf16.mxu1 %vm434_vm1, %v5213_v57  ;;  %v922_v4 = vsel %vm6837_vm4, %v917_v48, %v921_v20  ;;  %v7464_v20 = vld [vmem:[%s6703_s27 + $0x18] sm:$0xf] }
  0x87   : > { %6033 = vmatprep.mubr.msk.bf16.mxu0 %vm434_vm1, %v5431_v60  ;;  %v943_v53 = vshll.u32 %v7438_v41, 16  ;;  %v8947_v40 = vshrl.u32 %v7032_v17, 16  ;;  %v953_v37 = vrot.slane %v951_v42, 5  ;;  %v5214_v18 = vcombine.low %v912_v24, %v922_v4  ;;  %v7485_v48 = vld [vmem:[%s6703_s27 + $0x28] sm:$0xf] }
  0x88   : > { %v929_v1 = vrot.slane %v8945_v58, 5  ;;  %v939_v21 = vrot.slane %v8946_v36, 4  ;;  %v2969_v7 = vsel %vm7059_vm7, %v2967_v34, %v2968_v50  ;;  %v935_v9 = vrot.slane %v933_v39, 5 }
  0x89   : > { %v950_v5 = vrot.slane %v8947_v40, 4  ;;  %v5432_v43 = vcombine.low %v2966_v44, %v2969_v7  ;;  %v945_v22 = vrot.slane %v943_v53, 5  ;;  %v957_v51 = vshll.u32 %v7035_v54, 16  ;;  %5886 = vmatmul.mubr.msk.bf16.gmra.mrb[16].mxu1 %vm434_vm1, %v5214_v18 }
  0x8a   : > { %v930_v35 = vor.u32 %v929_v1, %v926_v31  ;;  %v940_v42 = vor.u32 %v939_v21, %v935_v9  ;;  %v963_v15 = vrot.slane %v961_v11, 4  ;;  %v967_v50 = vshll.u32 %v7455_v29, 16  ;;  %v7504_v21 = vld [vmem:[%s6703_s27 + $0x98] sm:$0x1] }
  0x8b   : > { %v954_v23 = vor.u32 %v953_v37, %v950_v5  ;;  %v7479_v24 = vrot.slane %v2384_v32, 5  ;;  %6034 = vmatmul.mubr.msk.bf16.gmra.mrb[28].mxu0 %vm434_vm1, %v5432_v43  ;;  %v959_v31 = vrot.slane %v957_v51, 5  ;;  %v5498_v57 = vcombine.low %v7464_v20, %v7467_v33 }
  0x8c   : > { %v931_v17 = vrot.slane %v930_v35, 4  ;;  %v8949_v54 = vshll.u32 %v7264_v55, 16  ;;  %v8951_v60 = vshrl.u32 %v7264_v55, 16  ;;  %v941_v32 = vrot.slane %v940_v42, 4  ;;  %v7518_v35 = vld [vmem:[%s6703_s27 + $0xa4] sm:$0x1] }
  0x8d   : > { %8948 = vst [vmem:[#allocation10_spill] sm:$0xff] %v7479_v24  ;;  %v955_v46 = vrot.slane %v954_v23, 4  ;;  %v8953_v34 = vshll.u32 %v7273_v61, 16  ;;  %v964_v1 = vor.u32 %v963_v15, %v959_v31  ;;  %v969_v39 = vrot.slane %v967_v50, 5  ;;  %6039 = vmatprep.mubr.msk.bf16.mxu0 %vm434_vm1, %v5498_v57  ;;  %v7527_v42 = vld [vmem:[%s6703_s27 + $0x30] sm:$0xf] }
  0x8e   : > { %v7489_v11 = vrot.slane %v8949_v54, 5  ;;  %v7493_v44 = vrot.slane %v8951_v60, 4  ;;  %v936_v0 = vsel %vm6837_vm4, %v931_v17, %v935_v9  ;;  %v946_v55 = vsel %vm6837_vm4, %v941_v32, %v945_v22  ;;  %v7538_v57 = vld [vmem:[%s6703_s27 + $0x34] sm:$0xf]  ;;  %v7544_v32 = vld [vmem:[%s8854_s1 + $0x20] sm:$0xf] }
  0x8f   : > { %v7499_v58 = vrot.slane %v8953_v34, 5  ;;  %v960_v4 = vsel %vm6837_vm4, %v955_v46, %v959_v31  ;;  %v5499_v61 = vcombine.low %v7475_v30, %v7485_v48  ;;  %v5215_v40 = vcombine.low %v936_v0, %v946_v55  ;;  %v6525_v54 = vld [vmem:[%s6703_s27 + $0x58] sm:$0xf]  ;;  %v7840_v24 = vld [vmem:[%s6703_s27 + $0xd0] sm:$0xf] }
  0x90   : > { %8950 = vst [vmem:[#allocation11_spill] sm:$0xff] %v7489_v11  ;;  %8952 = vst [vmem:[#allocation12_spill] sm:$0xff] %v7493_v44  ;;  %v965_v5 = vrot.slane %v964_v1, 4  ;;  %v4125_v37 = vsel %vm483_vm0, %v7203_v59, 0  ;;  %v8955_v18 = vshrl.u32 %v7050_v2, 16  ;;  %v8956_v9 = vshll.u32 %v7050_v2, 16 }
  0x91   : > { %8954 = vst [vmem:[#allocation13_spill] sm:$0xff] %v7499_v58  ;;  %v981_v22 = vshll.u32 %v7053_v28, 16  ;;  %v8957_v23 = vshrl.u32 %v7053_v28, 16  ;;  %v991_v17 = vshll.u32 %v7504_v21, 16  ;;  %5889 = vmatprep.mubr.msk.bf16.mxu1 %vm434_vm1, %v5215_v40  ;;  %v8958_v15 = vshrl.u32 %v7065_v25, 16 }
  0x92   : > { %v974_v7 = vrot.slane %v8955_v18, 4  ;;  %v977_v43 = vrot.slane %v8956_v9, 5  ;;  %v970_v59 = vsel %vm6837_vm4, %v965_v5, %v969_v39  ;;  %v8959_v2 = vshll.u32 %v7065_v25, 16  ;;  %v7796_v44 = vld [vmem:[%s6703_s27 + $0xb8] sm:$0xf] }
  0x93   : > { %v987_v51 = vrot.slane %v8957_v23, 4  ;;  %v998_v50 = vrot.slane %v8958_v15, 4  ;;  %v1005_v31 = vshll.u32 %v7072_v19, 16  ;;  %v5216_v28 = vcombine.low %v960_v4, %v970_v59  ;;  %6040 = vmatmul.mubr.msk.bf16.vlgmr.msra.gmra.mrb[0].mxu0 %vm434_vm1, %v5499_v61  ;;  %v7557_v61 = vld [vmem:[%s6703_s27 + $0x40] sm:$0xf] }
  0x94   : > { %v1001_v46 = vrot.slane %v8959_v2, 5  ;;  %v978_v60 = vor.u32 %v977_v43, %v974_v7  ;;  %v983_v0 = vrot.slane %v981_v22, 5  ;;  %v8960_v1 = vshrl.u32 %v7072_v19, 16  ;;  %6072 = vmatpush3.bf16.msra.mxu0 %v4125_v37  ;;  %v7554_v7 = vld [vmem:[%s6703_s27 + $0x3c] sm:$0xf] }
  0x95   : > { %v1007_v34 = vrot.slane %v1005_v31, 5  ;;  %v1015_v55 = vshll.u32 %v7518_v35, 16  ;;  %5890 = vmatmul.mubr.msk.bf16.gmra.mrb[20].mxu1 %vm434_vm1, %v5216_v28  ;;  %v993_v5 = vrot.slane %v991_v17, 5  ;;  %v5500_v18 = vcombine.low %v7527_v42, %v7538_v57  ;;  %6438 = vmatprep.subr.msk.bf16.mxu0 %vm483_vm0, %v7544_v32 }
  0x96   : > { %v1002_v25 = vor.u32 %v1001_v46, %v998_v50  ;;  %v1011_v39 = vrot.slane %v8960_v1, 4  ;;  %v979_v4 = vrot.slane %v978_v60, 4  ;;  %v988_v40 = vor.u32 %v987_v51, %v983_v0  ;;  %v7573_v46 = vld [vmem:[%s6703_s27 + $0xb0] sm:$0x1] }
  0x97   : > { %v1017_v22 = vrot.slane %v1015_v55, 5  ;;  %6043 = vmatprep.mubr.msk.bf16.mxu0 %vm434_vm1, %v5500_v18  ;;  %v5501_v2 = vcombine.low %v7554_v7, %v7557_v61  ;;  %v8961_v60 = vshrl.u32 %v7105_v56, 16  ;;  %v7591_v18 = vld [vmem:[%s6703_s27 + $0x48] sm:$0xf]  ;;  %v1431_v53 = vrot.slane %v6525_v54, 5 }
  0x98   : > { %v1003_v19 = vrot.slane %v1002_v25, 4  ;;  %v1012_v43 = vor.u32 %v1011_v39, %v1007_v34  ;;  %v984_v51 = vsel %vm6837_vm4, %v979_v4, %v983_v0  ;;  %v989_v17 = vrot.slane %v988_v40, 4 }
  0x99   : > { %v1022_v0 = vrot.slane %v8961_v60, 4  ;;  %v8962_v25 = vshll.u32 %v7105_v56, 16  ;;  %v1029_v4 = vshll.u32 %v7108_v13, 16  ;;  %v8963_v40 = vshrl.u32 %v7108_v13, 16 }
  0x9a   : > { %v1008_v59 = vsel %vm6837_vm4, %v1003_v19, %v1007_v34  ;;  %v1013_v15 = vrot.slane %v1012_v43, 4  ;;  %v994_v31 = vsel %vm6837_vm4, %v989_v17, %v993_v5  ;;  %v7583_v34 = vld [vmem:[%s6703_s27 + $0xbc] sm:$0x1]  ;;  %v7594_v19 = vld [vmem:[%s6703_s27 + $0x4c] sm:$0xf]  ;;  %v1039_v17 = vshll.u32 %v7573_v46, 16 }
  0x9b   : > { %v1025_v1 = vrot.slane %v8962_v25, 5  ;;  %v5217_v39 = vcombine.low %v984_v51, %v994_v31  ;;  %v1035_v5 = vrot.slane %v8963_v40, 4  ;;  %v8964_v51 = vshrl.u32 %v7125_v14, 16  ;;  %6044 = vmatmul.mubr.msk.bf16.gmra.mrb[4].mxu0 %vm434_vm1, %v5501_v2 }
  0x9c   : > { %v1018_v55 = vsel %vm6837_vm4, %v1013_v15, %v1017_v22  ;;  %v1031_v22 = vrot.slane %v1029_v4, 5  ;;  %v8965_v13 = vshll.u32 %v7125_v14, 16  ;;  %v1053_v60 = vshll.u32 %v7131_v52, 16  ;;  %v7615_v14 = vld [vmem:[%s6703_s27 + $0x58] sm:$0xf] }
  0x9d   : > { %v5218_v43 = vcombine.low %v1008_v59, %v1018_v55  ;;  %v1026_v56 = vor.u32 %v1025_v1, %v1022_v0  ;;  %v1046_v31 = vrot.slane %v8964_v51, 4  ;;  %5893 = vmatprep.mubr.msk.bf16.mxu1 %vm434_vm1, %v5217_v39  ;;  %v8966_v25 = vshrl.u32 %v7131_v52, 16  ;;  %v7607_v55 = vld [vmem:[%s6703_s27 + $0x54] sm:$0xf] }
  0x9e   : > { %v1049_v15 = vrot.slane %v8965_v13, 5  ;;  %v1063_v39 = vshll.u32 %v7583_v34, 16  ;;  %v5502_v2 = vcombine.low %v7591_v18, %v7594_v19  ;;  %v1036_v4 = vor.u32 %v1035_v5, %v1031_v22  ;;  %v7625_v5 = vld [vmem:[%s6703_s27 + $0x60] sm:$0xf] }
  0x9f   : > { %v1059_v59 = vrot.slane %v8966_v25, 4  ;;  %5894 = vmatmul.mubr.msk.bf16.gmra.mrb[24].mxu1 %vm434_vm1, %v5218_v43  ;;  %v1027_v1 = vrot.slane %v1026_v56, 4  ;;  %v1041_v40 = vrot.slane %v1039_v17, 5  ;;  %v1055_v51 = vrot.slane %v1053_v60, 5  ;;  %v7628_v17 = vld [vmem:[%s6703_s27 + $0x64] sm:$0xf] }
  0xa0   : > { %v1050_v52 = vor.u32 %v1049_v15, %v1046_v31  ;;  %v1065_v25 = vrot.slane %v1063_v39, 5  ;;  %6047 = vmatprep.mubr.msk.bf16.mxu0 %vm434_vm1, %v5502_v2  ;;  %v1037_v0 = vrot.slane %v1036_v4, 4  ;;  %v5503_v23 = vcombine.low %v7607_v55, %v7615_v14  ;;  %v8967_v60 = vld [vmem:[#allocation5_spill] sm:$0xff]  ;;  %v8969_v39 = vld [vmem:[#allocation4_spill] sm:$0xff]  ;;  %v8971_v13 = vld [vmem:[#allocation7_spill] sm:$0xff] }
  0xa1   : > { %v1032_v56 = vsel %vm6837_vm4, %v1027_v1, %v1031_v22  ;;  %v1060_v50 = vor.u32 %v1059_v59, %v1055_v51  ;;  %v8968_v1 = vrot.slane %v8967_v60, 5  ;;  %v8970_v2 = vrot.slane %v8969_v39, 9  ;;  %v8973_v22 = vld [vmem:[#allocation6_spill] sm:$0xff] }
  0xa2   : > { %v1051_v28 = vrot.slane %v1050_v52, 4  ;;  %v1042_v4 = vsel %vm6837_vm4, %v1037_v0, %v1041_v40  ;;  %v1385_v31 = vrot.slane %v7141_v62, 5  ;;  %v8972_v37 = vrot.slane %v8971_v13, 5  ;;  %v8975_v40 = vld [vmem:[#allocation8_spill] sm:$0xff] }
  0xa3   : > { %v1383_v59 = vsel %vm7059_vm7, %v8970_v2, %v8968_v1  ;;  %v1061_v43 = vrot.slane %v1060_v50, 4  ;;  %v5219_v15 = vcombine.low %v1032_v56, %v1042_v4  ;;  %v8974_v9 = vrot.slane %v8973_v22, 9  ;;  %6048 = vmatmul.mubr.msk.bf16.gmra.mrb[8].mxu0 %vm434_vm1, %v5503_v23  ;;  %v7673_v56 = vld [vmem:[%s6703_s27 + $0x70] sm:$0xf]  ;;  %v7683_v2 = vld [vmem:[%s6703_s27 + $0x7c] sm:$0xf] }
  0xa4   : > { %v1056_v52 = vsel %vm6837_vm4, %v1051_v28, %v1055_v51  ;;  %v1392_v1 = vrot.slane %v7148_v6, 5  ;;  %v5504_v0 = vcombine.low %v7625_v5, %v7628_v17  ;;  %v6513_v4 = vld [vmem:[%s6703_s27 + $0x18] sm:$0xf]  ;;  %v7727_v51 = vld [vmem:[%s6703_s27 + $0x90] sm:$0xf]  ;;  %v1420_v28 = vrot.slane %v7303_v27, 5 }
  0xa5   : > { %v7650_v60 = vsel %vm7059_vm7, %v8974_v9, %v8972_v37  ;;  %v1066_v50 = vsel %vm6837_vm4, %v1061_v43, %v1065_v25  ;;  %v1386_v9 = vsel %vm7059_vm7, %v8975_v40, %v1385_v31  ;;  %v7664_v37 = vld [vmem:[%s6703_s27 + $0x6c] sm:$0xf]  ;;  %5897 = vmatprep.mubr.msk.bf16.mxu1 %vm434_vm1, %v5219_v15  ;;  %v8976_v43 = vld [vmem:[#allocation9_spill] sm:$0xff]  ;;  %v7676_v25 = vld [vmem:[%s6703_s27 + $0x78] sm:$0xf]  ;;  %v1433_v54 = vrot.slane %v1431_v53, 4 }
  0xa6   : > { %v5220_v6 = vcombine.low %v1056_v52, %v1066_v50  ;;  %v5254_v13 = vcombine.low %v1383_v59, %v1386_v9  ;;  %v1393_v23 = vsel %vm7059_vm7, %v8976_v43, %v1392_v1  ;;  %6051 = vmatprep.mubr.msk.bf16.mxu0 %vm434_vm1, %v5504_v0  ;;  %v5239_v52 = vrot.slane %v6513_v4, 9  ;;  %v6514_v1 = vld [vmem:[%s6703_s27 + $0x1c] sm:$0xf]  ;;  %v6515_v40 = vld [vmem:[%s6703_s27 + $0x24] sm:$0xf] }
  0xa7   : > { %v5255_v15 = vcombine.low %v7650_v60, %v1393_v23  ;;  %v1396_v0 = vrot.slane %v6514_v1, 5  ;;  %v1399_v50 = vrot.slane %v7198_v16, 5  ;;  %v5505_v60 = vcombine.low %v7664_v37, %v7673_v56  ;;  %v6516_v43 = vld [vmem:[%s6703_s27 + $0x28] sm:$0xf]  ;;  %v6520_v22 = vld [vmem:[%s6703_s27 + $0x40] sm:$0xf] }
  0xa8   : > { %5898 = vmatmul.mubr.msk.bf16.gmra.mrb[28].mxu1 %vm434_vm1, %v5220_v6  ;;  %v5240_v9 = vrot.slane %v6515_v40, 9  ;;  %v1403_v23 = vrot.slane %v6516_v43, 5  ;;  %v1406_v6 = vrot.slane %v7228_v3, 5  ;;  %v5506_v16 = vcombine.low %v7676_v25, %v7683_v2  ;;  %v7709_v59 = vld [vmem:[%s6703_s27 + $0x88] sm:$0xf] }
  0xa9   : > { %5903 = vmatprep.mubr.msk.bf16.mxu1 %vm434_vm1, %v5254_v13  ;;  %v1397_v4 = vsel %vm7059_vm7, %v5239_v52, %v1396_v0  ;;  %v1398_v1 = vrot.slane %v1396_v0, 4  ;;  %v7702_v13 = vld [vmem:[%s6703_s27 + $0x84] sm:$0xf]  ;;  %v1969_v3 = vsel %vm483_vm0, %v7279_v10, 0  ;;  %v1417_v39 = vrot.slane %v6520_v22, 5 }
  0xaa   : > { %v1405_v43 = vrot.slane %v1403_v23, 4  ;;  %v7715_v0 = vsel %vm7059_vm7, %v5240_v9, %v1403_v23  ;;  %v7730_v9 = vld [vmem:[%s6703_s27 + $0x94] sm:$0xf]  ;;  %v5507_v23 = vcombine.low %v7702_v13, %v7709_v59  ;;  %v7752_v31 = vld [vmem:[%s6703_s27 + $0xa0] sm:$0xf]  ;;  %v8980_v22 = vshll.u32 %v7464_v20, 16 }
  0xab   : > { %v1400_v52 = vsel %vm7059_vm7, %v1398_v1, %v1399_v50  ;;  %6052 = vmatmul.mubr.msk.bf16.gmra.mrb[12].mxu0 %vm434_vm1, %v5505_v60  ;;  %v6517_v50 = vld [vmem:[%s6703_s27 + $0x30] sm:$0xf]  ;;  %v6518_v60 = vld [vmem:[%s6703_s27 + $0x34] sm:$0xf] }
  0xac   : > { %v5256_v40 = vcombine.low %v1397_v4, %v1400_v52  ;;  %v7722_v10 = vsel %vm7059_vm7, %v1405_v43, %v1406_v6  ;;  %v5241_v1 = vrot.slane %v6517_v50, 9  ;;  %6055 = vmatprep.mubr.msk.bf16.mxu0 %vm434_vm1, %v5506_v16  ;;  %v1410_v4 = vrot.slane %v6518_v60, 5  ;;  %v6519_v43 = vld [vmem:[%s6703_s27 + $0x3c] sm:$0xf]  ;;  %v6524_v50 = vld [vmem:[%s6703_s27 + $0x54] sm:$0xf] }
  0xad   : > { %v1413_v6 = vrot.slane %v7292_v47, 5  ;;  %v5242_v52 = vrot.slane %v6519_v43, 9  ;;  %v5257_v16 = vcombine.low %v7715_v0, %v7722_v10  ;;  %v5508_v47 = vcombine.low %v7727_v51, %v7730_v9  ;;  %v7749_v43 = vld [vmem:[%s6703_s27 + $0x9c] sm:$0xf] }
  0xae   : > { %v1412_v62 = vrot.slane %v1410_v4, 4  ;;  %v1411_v27 = vsel %vm7059_vm7, %v5241_v1, %v1410_v4  ;;  %v6522_v4 = vld [vmem:[%s8854_s1 + $0x10] sm:$0xf] }
  0xaf   : > { %v7763_v60 = vsel %vm7059_vm7, %v5242_v52, %v1417_v39  ;;  %v1427_v52 = vrot.slane %v7339_v49, 5  ;;  %v7834_v49 = vld [vmem:[%s6703_s27 + $0xcc] sm:$0xf] }
  0xb0   : > { %5904 = vmatmul.mubr.msk.bf16.vlgmr.msra.gmra.mrb[0].mxu1 %vm434_vm1, %v5255_v15  ;;  %v1419_v15 = vrot.slane %v1417_v39, 4  ;;  %v1414_v10 = vsel %vm7059_vm7, %v1412_v62, %v1413_v6  ;;  %v5509_v62 = vcombine.low %v7749_v43, %v7752_v31  ;;  %v6523_v39 = vld [vmem:[%s6703_s27 + $0x4c] sm:$0xf] }
  0xb1   : > { %5907 = vmatprep.mubr.msk.bf16.mxu1 %vm434_vm1, %v5256_v40  ;;  %5936 = vmatpush3.bf16.msra.mxu1 %v1969_v3  ;;  %v6521_v3 = vld [vmem:[%s6703_s27 + $0x48] sm:$0xf]  ;;  %v1424_v6 = vrot.slane %v6523_v39, 5  ;;  %v7783_v40 = vld [vmem:[%s6703_s27 + $0xac] sm:$0xf]  ;;  %v5258_v39 = vcombine.low %v1411_v27, %v1414_v10 }
  0xb2   : > { %v5243_v1 = vrot.slane %v6521_v3, 9  ;;  %6434 = vmatprep.subr.msk.bf16.mxu1 %vm483_vm0, %v6522_v4  ;;  %v7773_v0 = vsel %vm7059_vm7, %v1419_v15, %v1420_v28  ;;  %v7780_v3 = vld [vmem:[%s6703_s27 + $0xa8] sm:$0xf]  ;;  %v5244_v4 = vrot.slane %v6524_v50, 9  ;;  %v1434_v28 = vrot.slane %v7359_v45, 5 }
  0xb3   : > { %v7790_v15 = vld [vmem:[%s6703_s27 + $0xb4] sm:$0xf]  ;;  %6056 = vmatmul.mubr.msk.bf16.gmra.mrb[16].mxu0 %vm434_vm1, %v5507_v23  ;;  %v1426_v58 = vrot.slane %v1424_v6, 4  ;;  %v5259_v50 = vcombine.low %v7763_v60, %v7773_v0  ;;  %v5510_v23 = vcombine.low %v7780_v3, %v7783_v40 }
  0xb4   : > { %6059 = vmatprep.mubr.msk.bf16.mxu0 %vm434_vm1, %v5508_v47  ;;  %v1425_v45 = vsel %vm7059_vm7, %v5243_v1, %v1424_v6  ;;  %v7809_v10 = vsel %vm7059_vm7, %v5244_v4, %v1431_v53  ;;  %v7816_v0 = vsel %vm7059_vm7, %v1433_v54, %v1434_v28  ;;  %v6526_v53 = vld [vmem:[%s6703_s27 + $0x60] sm:$0xf]  ;;  %v7826_v4 = vld [vmem:[%s6703_s27 + $0xc4] sm:$0xf]  ;;  %v1441_v54 = vrot.slane %v7385_v8, 5 }
  0xb5   : > { %v1428_v27 = vsel %vm7059_vm7, %v1426_v58, %v1427_v52  ;;  %v5245_v6 = vrot.slane %v6526_v53, 9  ;;  %v7823_v52 = vld [vmem:[%s6703_s27 + $0xc0] sm:$0xf]  ;;  %8978 = vst [vmem:[#allocation15_spill] sm:$0xff] %v7826_v4  ;;  %v6527_v47 = vld [vmem:[%s6703_s27 + $0x64] sm:$0xf] }
  0xb6   : > { %8977 = vst [vmem:[#allocation14_spill] sm:$0xff] %v7823_v52  ;;  %v1438_v28 = vrot.slane %v6527_v47, 5  ;;  %v6528_v1 = vld [vmem:[%s6703_s27 + $0x6c] sm:$0xf]  ;;  %v5260_v36 = vcombine.low %v1425_v45, %v1428_v27  ;;  %v6529_v58 = vld [vmem:[%s6703_s27 + $0x70] sm:$0xf] }
  0xb7   : > { %v5246_v60 = vrot.slane %v6528_v1, 9  ;;  %v1445_v11 = vrot.slane %v6529_v58, 5  ;;  %v1448_v8 = vrot.slane %v7406_v12, 5  ;;  %v5512_v1 = vcombine.low %v7823_v52, %v7826_v4  ;;  %v6530_v58 = vld [vmem:[%s6703_s27 + $0x78] sm:$0xf] }
  0xb8   : > { %5908 = vmatmul.mubr.msk.bf16.gmra.mrb[4].mxu1 %vm434_vm1, %v5257_v16  ;;  %v1440_v47 = vrot.slane %v1438_v28, 4  ;;  %v7849_v45 = vsel %vm7059_vm7, %v5245_v6, %v1438_v28  ;;  %v5247_v27 = vrot.slane %v6530_v58, 9  ;;  %v6531_v16 = vld [vmem:[%s6703_s27 + $0x7c] sm:$0xf]  ;;  %v1459_v28 = vrot.slane %v6533_v26, 5 }
  0xb9   : > { %5911 = vmatprep.mubr.msk.bf16.mxu1 %vm434_vm1, %v5258_v39  ;;  %v7861_v53 = vsel %vm7059_vm7, %v5246_v60, %v1445_v11  ;;  %v1447_v6 = vrot.slane %v1445_v11, 4  ;;  %v1455_v60 = vrot.slane %v7438_v41, 5  ;;  %v6532_v39 = vld [vmem:[%s6703_s27 + $0x84] sm:$0xf]  ;;  %v7876_v4 = vld [vmem:[%s6703_s27 + $0x20] sm:$0x1] }
  0xba   : > { %v7857_v12 = vsel %vm7059_vm7, %v1440_v47, %v1441_v54  ;;  %v1452_v54 = vrot.slane %v6531_v16, 5  ;;  %v5248_v11 = vrot.slane %v6532_v39, 9  ;;  %v8979_v58 = vshrl.u32 %v7464_v20, 16 }
  0xbb   : > { %6060 = vmatmul.mubr.msk.bf16.gmra.mrb[20].mxu0 %vm434_vm1, %v5509_v62  ;;  %v5262_v47 = vcombine.low %v7849_v45, %v7857_v12  ;;  %v1462_v62 = vrot.slane %v7455_v29, 5  ;;  %v3648_v45 = vrot.slane %v8980_v22, 5  ;;  %v7887_v41 = vsel %vm7059_vm7, %v1447_v6, %v1448_v8  ;;  %v7898_v22 = vld [vmem:[%s6703_s27 + $0x2c] sm:$0x1] }
  0xbc   : > { %6063 = vmatprep.mubr.msk.bf16.mxu0 %vm434_vm1, %v5510_v23  ;;  %v1454_v23 = vrot.slane %v1452_v54, 4  ;;  %v3645_v16 = vrot.slane %v8979_v58, 4  ;;  %v1461_v26 = vrot.slane %v1459_v28, 4  ;;  %v3652_v39 = vshll.u32 %v7467_v33, 16 }
  0xbd   : > { %v7894_v29 = vsel %vm7059_vm7, %v5247_v27, %v1452_v54  ;;  %v3662_v20 = vshll.u32 %v7876_v4, 16  ;;  %v8983_v27 = vshll.u32 %v7475_v30, 16 }
  0xbe   : > { %v3649_v58 = vor.u32 %v3648_v45, %v3645_v16  ;;  %v7904_v8 = vsel %vm7059_vm7, %v1454_v23, %v1455_v60  ;;  %v3654_v6 = vrot.slane %v3652_v39, 5  ;;  %v7914_v16 = vsel %vm7059_vm7, %v1461_v26, %v1462_v62 }
  0xbf   : > { %v3672_v54 = vrot.slane %v8983_v27, 5  ;;  %v8984_v60 = vcombine.low %v7790_v15, %v7796_v44  ;;  %v8985_v23 = vshrl.u32 %v7485_v48, 16  ;;  %v3686_v39 = vshll.u32 %v7898_v22, 16 }
  0xc0   : > { %5912 = vmatmul.mubr.msk.bf16.gmra.mrb[8].mxu1 %vm434_vm1, %v5259_v50  ;;  %v8981_v50 = vshrl.u32 %v7467_v33, 16  ;;  %v7908_v33 = vsel %vm7059_vm7, %v5248_v11, %v1459_v28  ;;  %v3650_v45 = vrot.slane %v3649_v58, 4  ;;  %v5263_v62 = vcombine.low %v7861_v53, %v7887_v41 }
  0xc1   : > { %5915 = vmatprep.mubr.msk.bf16.mxu1 %vm434_vm1, %v5260_v36  ;;  %v8982_v36 = vshrl.u32 %v7475_v30, 16  ;;  %v3682_v30 = vrot.slane %v8985_v23, 4  ;;  %v5264_v26 = vcombine.low %v7894_v29, %v7904_v8  ;;  %v8986_v53 = vcombine.low %v7809_v10, %v7816_v0  ;;  %v6536_v8 = vld [vmem:[%s6703_s27 + $0xa0] sm:$0xf]  ;;  %v6537_v23 = vld [vmem:[%s6703_s27 + $0x9c] sm:$0xf] }
  0xc2   : > { %v3658_v12 = vrot.slane %v8981_v50, 4  ;;  %v3664_v50 = vrot.slane %v3662_v20, 5  ;;  %v6534_v20 = vld [vmem:[%s6703_s27 + $0x90] sm:$0xf]  ;;  %v1469_v29 = vrot.slane %v7504_v21, 5 }
  0xc3   : > { %v3669_v52 = vrot.slane %v8982_v36, 4  ;;  %v3676_v36 = vshll.u32 %v7485_v48, 16  ;;  %6064 = vmatmul.mubr.msk.bf16.gmra.mrb[24].mxu0 %vm434_vm1, %v8984_v60  ;;  %v5249_v27 = vrot.slane %v6534_v20, 9  ;;  %v3655_v48 = vsel %vm6837_vm4, %v3650_v45, %v3654_v6  ;;  %v7950_v21 = vld [vmem:[%s6703_s27 + $0x38] sm:$0x1] }
  0xc4   : > { %v3659_v28 = vor.u32 %v3658_v12, %v3654_v6  ;;  %6067 = vmatprep.mubr.msk.bf16.mxu0 %vm434_vm1, %v5512_v1  ;;  %v3688_v45 = vrot.slane %v3686_v39, 5  ;;  %v5250_v20 = vrot.slane %v6537_v23, 9 }
  0xc5   : > { %v3673_v11 = vor.u32 %v3672_v54, %v3669_v52  ;;  %v3678_v58 = vrot.slane %v3676_v36, 5  ;;  %v5265_v52 = vcombine.low %v7908_v33, %v7914_v16  ;;  %v6535_v54 = vld [vmem:[%s6703_s27 + $0x94] sm:$0xf]  ;;  %v1473_v36 = vrot.slane %v6536_v8, 5 }
  0xc6   : > { %v3660_v12 = vrot.slane %v3659_v28, 4  ;;  %v1466_v60 = vrot.slane %v6535_v54, 5  ;;  %v3772_v33 = vshll.u32 %v7615_v14, 16 }
  0xc7   : > { %v3674_v1 = vrot.slane %v3673_v11, 4  ;;  %v3683_v41 = vor.u32 %v3682_v30, %v3678_v58  ;;  %v1475_v11 = vrot.slane %v1473_v36, 4  ;;  %v8987_v30 = vshrl.u32 %v7527_v42, 16 }
  0xc8   : > { %5916 = vmatmul.mubr.msk.bf16.gmra.mrb[12].mxu1 %vm434_vm1, %v8986_v53  ;;  %v3665_v6 = vsel %vm6837_vm4, %v3660_v12, %v3664_v50  ;;  %v1468_v28 = vrot.slane %v1466_v60, 4  ;;  %v7947_v0 = vsel %vm7059_vm7, %v5249_v27, %v1466_v60  ;;  %v1476_v50 = vrot.slane %v7518_v35, 5 }
  0xc9   : > { %5919 = vmatprep.mubr.msk.bf16.mxu1 %vm434_vm1, %v5262_v47  ;;  %v5531_v54 = vcombine.low %v3655_v48, %v3665_v6  ;;  %v3684_v10 = vrot.slane %v3683_v41, 4  ;;  %v3693_v39 = vrot.slane %v8987_v30, 4  ;;  %v8988_v48 = vshll.u32 %v7527_v42, 16 }
  0xca   : > { %v7954_v47 = vsel %vm7059_vm7, %v1468_v28, %v1469_v29  ;;  %v3679_v27 = vsel %vm6837_vm4, %v3674_v1, %v3678_v58  ;;  %v4547_v60 = vsel %vm483_vm0, %v7544_v32, 0  ;;  %v3700_v53 = vshll.u32 %v7538_v57, 16  ;;  %v7980_v1 = vld [vmem:[%s6703_s27 + $0x44] sm:$0x1] }
  0xcb   : > { %v3696_v12 = vrot.slane %v8988_v48, 5  ;;  %v8989_v41 = vshrl.u32 %v7538_v57, 16  ;;  %v8990_v35 = vcombine.low %v7834_v49, %v7840_v24  ;;  %v3689_v42 = vsel %vm6837_vm4, %v3684_v10, %v3688_v45 }
  0xcc   : > { %v7976_v8 = vsel %vm7059_vm7, %v5250_v20, %v1473_v36  ;;  %v3710_v32 = vshll.u32 %v7950_v21, 16  ;;  %v5266_v57 = vcombine.low %v7947_v0, %v7954_v47  ;;  %v3702_v6 = vrot.slane %v3700_v53, 5 }
  0xcd   : > { %v3706_v29 = vrot.slane %v8989_v41, 4  ;;  %6068 = vmatmul.mubr.msk.bf16.gmra.mrb[28].mxu0 %vm434_vm1, %v8990_v35  ;;  %v3697_v58 = vor.u32 %v3696_v12, %v3693_v39  ;;  %v8991_v28 = vshrl.u32 %v7554_v7, 16  ;;  %v8992_v45 = vshll.u32 %v7554_v7, 16  ;;  %v6539_v41 = vld [vmem:[%s6703_s27 + $0xac] sm:$0xf] }
  0xce   : > { %6073 = vmatprep.mubr.msk.bf16.mxu0 %vm434_vm1, %v5531_v54  ;;  %v7991_v20 = vsel %vm7059_vm7, %v1475_v11, %v1476_v50  ;;  %v3724_v30 = vshll.u32 %v7557_v61, 16  ;;  %v8993_v54 = vshrl.u32 %v7557_v61, 16  ;;  %v3712_v47 = vrot.slane %v3710_v32, 5  ;;  %v6538_v11 = vld [vmem:[%s6703_s27 + $0xa8] sm:$0xf] }
  0xcf   : > { %v3717_v23 = vrot.slane %v8991_v28, 4  ;;  %v3720_v36 = vrot.slane %v8992_v45, 5  ;;  %v3698_v10 = vrot.slane %v3697_v58, 4  ;;  %v3707_v0 = vor.u32 %v3706_v29, %v3702_v6 }
  0xd0   : > { %v3730_v39 = vrot.slane %v8993_v54, 4  ;;  %5920 = vmatmul.mubr.msk.bf16.gmra.mrb[16].mxu1 %vm434_vm1, %v5263_v62  ;;  %v3734_v7 = vshll.u32 %v7980_v1, 16  ;;  %v5532_v12 = vcombine.low %v3679_v27, %v3689_v42  ;;  %v3726_v53 = vrot.slane %v3724_v30, 5  ;;  %v6540_v27 = vld [vmem:[%s6703_s27 + $0xb8] sm:$0xf] }
  0xd1   : > { %v3721_v48 = vor.u32 %v3720_v36, %v3717_v23  ;;  %5923 = vmatprep.mubr.msk.bf16.mxu1 %vm434_vm1, %v5264_v26  ;;  %v5251_v50 = vrot.slane %v6538_v11, 9  ;;  %v1480_v35 = vrot.slane %v6539_v41, 5  ;;  %v5267_v61 = vcombine.low %v7976_v8, %v7991_v20  ;;  %v6541_v36 = vld [vmem:[%s6703_s27 + $0xb4] sm:$0xf]  ;;  %v8011_v54 = vld [vmem:[%s6703_s27 + $0x50] sm:$0x1] }
  0xd2   : > { %v3703_v62 = vsel %vm6837_vm4, %v3698_v10, %v3702_v6  ;;  %v3708_v29 = vrot.slane %v3707_v0, 4  ;;  %v3731_v32 = vor.u32 %v3730_v39, %v3726_v53  ;;  %v3736_v28 = vrot.slane %v3734_v7, 5 }
  0xd3   : > { %v3722_v58 = vrot.slane %v3721_v48, 4  ;;  %v1483_v26 = vrot.slane %v7573_v46, 5  ;;  %v1487_v42 = vrot.slane %v6540_v27, 5  ;;  %v1482_v45 = vrot.slane %v1480_v35, 4 }
  0xd4   : > { %v3713_v23 = vsel %vm6837_vm4, %v3708_v29, %v3712_v47  ;;  %v5252_v30 = vrot.slane %v6541_v36, 9  ;;  %v8994_v11 = vshrl.u32 %v7591_v18, 16  ;;  %v3732_v39 = vrot.slane %v3731_v32, 4 }
  0xd5   : > { %6074 = vmatmul.mubr.msk.bf16.vlgmr.msra.gmra.mrb[0].mxu0 %vm434_vm1, %v5532_v12  ;;  %v5533_v10 = vcombine.low %v3703_v62, %v3713_v23  ;;  %v3727_v46 = vsel %vm6837_vm4, %v3722_v58, %v3726_v53  ;;  %v1481_v0 = vsel %vm7059_vm7, %v5251_v50, %v1480_v35  ;;  %v1489_v47 = vrot.slane %v1487_v42, 4  ;;  %v8031_v50 = vld [vmem:[%s6703_s27 + $0x5c] sm:$0x1] }
  0xd6   : > { %v3741_v6 = vrot.slane %v8994_v11, 4  ;;  %6106 = vmatpush3.bf16.msra.mxu0 %v4547_v60  ;;  %v1490_v48 = vrot.slane %v7583_v34, 5  ;;  %v8995_v7 = vshll.u32 %v7591_v18, 16  ;;  %v3748_v29 = vshll.u32 %v7594_v19, 16 }
  0xd7   : > { %6077 = vmatprep.mubr.msk.bf16.mxu0 %vm434_vm1, %v5533_v10  ;;  %v3737_v12 = vsel %vm6837_vm4, %v3732_v39, %v3736_v28  ;;  %v8996_v53 = vshrl.u32 %v7594_v19, 16  ;;  %v3758_v58 = vshll.u32 %v8011_v54, 16  ;;  %v8997_v60 = vshrl.u32 %v7607_v55, 16  ;;  %v8057_v10 = vld [vmem:[%s6703_s27 + $0x68] sm:$0x1] }
  0xd8   : > { %v3744_v41 = vrot.slane %v8995_v7, 5  ;;  %5924 = vmatmul.mubr.msk.bf16.gmra.mrb[20].mxu1 %vm434_vm1, %v5265_v52  ;;  %v1484_v18 = vsel %vm7059_vm7, %v1482_v45, %v1483_v26  ;;  %v8043_v35 = vsel %vm7059_vm7, %v5252_v30, %v1487_v42  ;;  %v3750_v32 = vrot.slane %v3748_v29, 5 }
  0xd9   : > { %v3754_v62 = vrot.slane %v8996_v53, 4  ;;  %v3765_v34 = vrot.slane %v8997_v60, 4  ;;  %5927 = vmatprep.mubr.msk.bf16.mxu1 %vm434_vm1, %v5266_v57  ;;  %v5534_v28 = vcombine.low %v3727_v46, %v3737_v12  ;;  %v3760_v27 = vrot.slane %v3758_v58, 5  ;;  %v8073_v60 = vld [vmem:[%s6703_s27 + $0x74] sm:$0x1] }
  0xda   : > { %v3745_v19 = vor.u32 %v3744_v41, %v3741_v6  ;;  %v8998_v23 = vshll.u32 %v7607_v55, 16  ;;  %v8999_v26 = vshrl.u32 %v7615_v14, 16  ;;  %v3782_v42 = vshll.u32 %v8031_v50, 16 }
  0xdb   : > { %v3755_v52 = vor.u32 %v3754_v62, %v3750_v32  ;;  %v5268_v30 = vcombine.low %v1481_v0, %v1484_v18  ;;  %v8054_v11 = vsel %vm7059_vm7, %v1489_v47, %v1490_v48  ;;  %v3774_v6 = vrot.slane %v3772_v33, 5 }
  0xdc   : > { %v3768_v36 = vrot.slane %v8998_v23, 5  ;;  %v3746_v16 = vrot.slane %v3745_v19, 4  ;;  %v3778_v45 = vrot.slane %v8999_v26, 4  ;;  %v3784_v39 = vrot.slane %v3782_v42, 5 }
  0xdd   : > { %v3756_v46 = vrot.slane %v3755_v52, 4  ;;  %v9000_v14 = vshrl.u32 %v7625_v5, 16  ;;  %6078 = vmatmul.mubr.msk.bf16.gmra.mrb[4].mxu0 %vm434_vm1, %v5534_v28  ;;  %v9001_v47 = vshll.u32 %v7625_v5, 16  ;;  %v3796_v29 = vshll.u32 %v7628_v17, 16 }
  0xde   : > { %v3769_v57 = vor.u32 %v3768_v36, %v3765_v34  ;;  %v3751_v55 = vsel %vm6837_vm4, %v3746_v16, %v3750_v32  ;;  %v3779_v41 = vor.u32 %v3778_v45, %v3774_v6  ;;  %v9002_v53 = vshrl.u32 %v7628_v17, 16 }
  0xdf   : > { %v3789_v7 = vrot.slane %v9000_v14, 4  ;;  %v3792_v48 = vrot.slane %v9001_v47, 5  ;;  %v3761_v12 = vsel %vm6837_vm4, %v3756_v46, %v3760_v27  ;;  %v3806_v58 = vshll.u32 %v8057_v10, 16 }
  0xe0   : > { %v3770_v0 = vrot.slane %v3769_v57, 4  ;;  %v3802_v62 = vrot.slane %v9002_v53, 4  ;;  %v9003_v34 = vshrl.u32 %v7664_v37, 16  ;;  %v5535_v19 = vcombine.low %v3751_v55, %v3761_v12  ;;  %5928 = vmatmul.mubr.msk.bf16.gmra.mrb[24].mxu1 %vm434_vm1, %v5267_v61  ;;  %v8094_v57 = vld [vmem:[%s6703_s27 + $0x80] sm:$0x1] }
  0xe1   : > { %v3780_v32 = vrot.slane %v3779_v41, 4  ;;  %v3793_v28 = vor.u32 %v3792_v48, %v3789_v7  ;;  %v3798_v17 = vrot.slane %v3796_v29, 5  ;;  %v3808_v27 = vrot.slane %v3806_v58, 5  ;;  %5931 = vmatprep.mubr.msk.bf16.mxu1 %vm434_vm1, %v5268_v30  ;;  %v6543_v55 = vld [vmem:[%s6703_s27 + $0x10] sm:$0xf] }
  0xe2   : > { %v3813_v18 = vrot.slane %v9003_v34, 4  ;;  %v3775_v5 = vsel %vm6837_vm4, %v3770_v0, %v3774_v6  ;;  %v9004_v23 = vshll.u32 %v7664_v37, 16  ;;  %v3820_v33 = vshll.u32 %v7673_v56, 16  ;;  %6081 = vmatprep.mubr.msk.bf16.mxu0 %vm434_vm1, %v5535_v19  ;;  %v6542_v6 = vld [vmem:[%s6703_s27 + $0xc] sm:$0xf] }
  0xe3   : > { %v3785_v16 = vsel %vm6837_vm4, %v3780_v32, %v3784_v39  ;;  %v3794_v8 = vrot.slane %v3793_v28, 4  ;;  %v9005_v20 = vshrl.u32 %v7673_v56, 16  ;;  %v3830_v52 = vshll.u32 %v8073_v60, 16 }
  0xe4   : > { %v3816_v36 = vrot.slane %v9004_v23, 5  ;;  %v5536_v26 = vcombine.low %v3775_v5, %v3785_v16  ;;  %v3803_v45 = vor.u32 %v3802_v62, %v3798_v17  ;;  %v3822_v42 = vrot.slane %v3820_v33, 5 }
  0xe5   : > { %v3826_v61 = vrot.slane %v9005_v20, 4  ;;  %v5269_v30 = vcombine.low %v8043_v35, %v8054_v11  ;;  %v5335_v46 = vcombine.low %v6542_v6, %v6543_v55  ;;  %v3799_v39 = vsel %vm6837_vm4, %v3794_v8, %v3798_v17  ;;  %v8136_v55 = vld [vmem:[%s6703_s27 + $0x98] sm:$0x1] }
  0xe6   : > { %v3817_v37 = vor.u32 %v3816_v36, %v3813_v18  ;;  %v3832_v56 = vrot.slane %v3830_v52, 5  ;;  %v3804_v14 = vrot.slane %v3803_v45, 4  ;;  %v9006_v41 = vshrl.u32 %v7676_v25, 16  ;;  %6082 = vmatmul.mubr.msk.bf16.gmra.mrb[8].mxu0 %vm434_vm1, %v5536_v26  ;;  %v8116_v18 = vld [vmem:[%s6703_s27 + $0x8c] sm:$0x1] }
  0xe7   : > { %v3827_v0 = vor.u32 %v3826_v61, %v3822_v42  ;;  %v9007_v48 = vshll.u32 %v7676_v25, 16  ;;  %v3844_v35 = vshll.u32 %v7683_v2, 16  ;;  %v9008_v11 = vshrl.u32 %v7683_v2, 16  ;;  %v6544_v26 = vld [vmem:[%s6703_s27 + $0x18] sm:$0xf] }
  0xe8   : > { %v3818_v7 = vrot.slane %v3817_v37, 4  ;;  %v3837_v47 = vrot.slane %v9006_v41, 4  ;;  %v3854_v53 = vshll.u32 %v8094_v57, 16  ;;  %v3809_v62 = vsel %vm6837_vm4, %v3804_v14, %v3808_v27  ;;  %5932 = vmatmul.mubr.msk.bf16.gmra.mrb[28].mxu1 %vm434_vm1, %v5269_v30  ;;  %v6545_v45 = vld [vmem:[%s6703_s27 + $0x1c] sm:$0xf] }
  0xe9   : > { %v3840_v29 = vrot.slane %v9007_v48, 5  ;;  %v3850_v12 = vrot.slane %v9008_v11, 4  ;;  %v3828_v34 = vrot.slane %v3827_v0, 4  ;;  %v9009_v19 = vshrl.u32 %v7702_v13, 16  ;;  %5937 = vmatprep.mubr.msk.bf16.mxu1 %vm434_vm1, %v5335_v46 }
  0xea   : > { %v3823_v58 = vsel %vm6837_vm4, %v3818_v7, %v3822_v42  ;;  %v5537_v5 = vcombine.low %v3799_v39, %v3809_v62  ;;  %v3846_v2 = vrot.slane %v3844_v35, 5  ;;  %v3856_v28 = vrot.slane %v3854_v53, 5  ;;  %v6547_v42 = vld [vmem:[%s6703_s27 + $0x28] sm:$0xf]  ;;  %v8152_v62 = vld [vmem:[%s6703_s27 + $0xa4] sm:$0x1] }
  0xeb   : > { %v3861_v25 = vrot.slane %v9009_v19, 4  ;;  %v3841_v32 = vor.u32 %v3840_v29, %v3837_v47  ;;  %v3833_v17 = vsel %vm6837_vm4, %v3828_v34, %v3832_v56  ;;  %v9010_v27 = vshll.u32 %v7702_v13, 16  ;;  %v6546_v13 = vld [vmem:[%s6703_s27 + $0x24] sm:$0xf] }
  0xec   : > { %v3868_v36 = vshll.u32 %v7709_v59, 16  ;;  %v9011_v33 = vshrl.u32 %v7709_v59, 16  ;;  %6085 = vmatprep.mubr.msk.bf16.mxu0 %vm434_vm1, %v5537_v5  ;;  %v5538_v8 = vcombine.low %v3823_v58, %v3833_v17  ;;  %v3851_v61 = vor.u32 %v3850_v12, %v3846_v2 }
  0xed   : > { %v3864_v23 = vrot.slane %v9010_v27, 5  ;;  %v3842_v20 = vrot.slane %v3841_v32, 4  ;;  %v3878_v52 = vshll.u32 %v8116_v18, 16  ;;  %v5336_v37 = vcombine.low %v6544_v26, %v6545_v45  ;;  %v8171_v26 = vld [vmem:[%s6703_s27 + $0xb0] sm:$0x1] }
  0xee   : > { %v3874_v16 = vrot.slane %v9011_v33, 4  ;;  %v5337_v30 = vcombine.low %v6546_v13, %v6547_v42  ;;  %v3870_v59 = vrot.slane %v3868_v36, 5  ;;  %v3852_v39 = vrot.slane %v3851_v61, 4  ;;  %6086 = vmatmul.mubr.msk.bf16.gmra.mrb[12].mxu0 %vm434_vm1, %v5538_v8  ;;  %v6549_v13 = vld [vmem:[%s6703_s27 + $0x34] sm:$0xf] }
  0xef   : > { %v3865_v6 = vor.u32 %v3864_v23, %v3861_v25  ;;  %v3847_v46 = vsel %vm6837_vm4, %v3842_v20, %v3846_v2  ;;  %v3880_v56 = vrot.slane %v3878_v52, 5  ;;  %v9012_v14 = vshrl.u32 %v7727_v51, 16 }
  0xf0   : > { %v3875_v41 = vor.u32 %v3874_v16, %v3870_v59  ;;  %v9013_v47 = vshll.u32 %v7727_v51, 16  ;;  %v3892_v29 = vshll.u32 %v7730_v9, 16  ;;  %v3857_v35 = vsel %vm6837_vm4, %v3852_v39, %v3856_v28  ;;  %5938 = vmatmul.mubr.msk.bf16.vlgmr.msra.gmra.mrb[0].mxu1 %vm434_vm1, %v5336_v37  ;;  %v6548_v37 = vld [vmem:[%s6703_s27 + $0x30] sm:$0xf] }
  0xf1   : > { %v3885_v7 = vrot.slane %v9012_v14, 4  ;;  %v3866_v0 = vrot.slane %v3865_v6, 4  ;;  %v9014_v11 = vshrl.u32 %v7730_v9, 16  ;;  %v3902_v53 = vshll.u32 %v8136_v55, 16  ;;  %5941 = vmatprep.mubr.msk.bf16.mxu1 %vm434_vm1, %v5337_v30 }
  0xf2   : > { %v3888_v48 = vrot.slane %v9013_v47, 5  ;;  %v9015_v58 = vshrl.u32 %v7749_v43, 16  ;;  %v5539_v19 = vcombine.low %v3847_v46, %v3857_v35  ;;  %v3876_v25 = vrot.slane %v3875_v41, 4  ;;  %v6551_v35 = vld [vmem:[%s6703_s27 + $0x40] sm:$0xf] }
  0xf3   : > { %v3898_v12 = vrot.slane %v9014_v11, 4  ;;  %v3871_v51 = vsel %vm6837_vm4, %v3866_v0, %v3870_v59  ;;  %v3894_v32 = vrot.slane %v3892_v29, 5  ;;  %v3904_v2 = vrot.slane %v3902_v53, 5  ;;  %v6550_v29 = vld [vmem:[%s6703_s27 + $0x3c] sm:$0xf] }
  0xf4   : > { %v3909_v34 = vrot.slane %v9015_v58, 4  ;;  %v3889_v5 = vor.u32 %v3888_v48, %v3885_v7  ;;  %v9016_v28 = vshll.u32 %v7749_v43, 16  ;;  %v3916_v17 = vshll.u32 %v7752_v31, 16  ;;  %6089 = vmatprep.mubr.msk.bf16.mxu0 %vm434_vm1, %v5539_v19  ;;  %v9018_v43 = vld [vmem:[#allocation3_spill] sm:$0xff]  ;;  %v8192_v58 = vld [vmem:[%s6703_s27 + $0xbc] sm:$0x1] }
  0xf5   : > { %v3881_v27 = vsel %vm6837_vm4, %v3876_v25, %v3880_v56  ;;  %v9017_v36 = vshrl.u32 %v7752_v31, 16  ;;  %v3926_v16 = vshll.u32 %v8152_v62, 16  ;;  %6140 = vmatpush3.bf16.msra.mxu1 %v9018_v43  ;;  %v3899_v20 = vor.u32 %v3898_v12, %v3894_v32 }
  0xf6   : > { %v3912_v9 = vrot.slane %v9016_v28, 5  ;;  %v3890_v23 = vrot.slane %v3889_v5, 4  ;;  %v5540_v8 = vcombine.low %v3871_v51, %v3881_v27  ;;  %v3918_v52 = vrot.slane %v3916_v17, 5 }
  0xf7   : > { %v3922_v33 = vrot.slane %v9017_v36, 4  ;;  %v4016_v45 = vshrl.u32 %v7840_v24, 16  ;;  %v5338_v31 = vcombine.low %v6548_v37, %v6549_v13  ;;  %v3928_v30 = vrot.slane %v3926_v16, 5  ;;  %v6552_v16 = vld [vmem:[%s6703_s27 + $0x48] sm:$0xf] }
  0xf8   : > { %v3913_v61 = vor.u32 %v3912_v9, %v3909_v34  ;;  %v3895_v42 = vsel %vm6837_vm4, %v3890_v23, %v3894_v32  ;;  %v3900_v6 = vrot.slane %v3899_v20, 4  ;;  %v9019_v39 = vshrl.u32 %v7780_v3, 16  ;;  %6090 = vmatmul.mubr.msk.bf16.gmra.mrb[16].mxu0 %vm434_vm1, %v5540_v8 }
  0xf9   : > { %v3923_v46 = vor.u32 %v3922_v33, %v3918_v52  ;;  %v9020_v14 = vshll.u32 %v7780_v3, 16  ;;  %v3940_v0 = vshll.u32 %v7783_v40, 16  ;;  %v9021_v41 = vshrl.u32 %v7783_v40, 16  ;;  %5942 = vmatmul.mubr.msk.bf16.gmra.mrb[4].mxu1 %vm434_vm1, %v5338_v31  ;;  %v9025_v31 = vld [vmem:[#allocation14_spill] sm:$0xff] }
  0xfa   : > { %v3914_v59 = vrot.slane %v3913_v61, 4  ;;  %v3933_v56 = vrot.slane %v9019_v39, 4  ;;  %v3950_v48 = vshll.u32 %v8171_v26, 16  ;;  %v5339_v11 = vcombine.low %v6550_v29, %v6551_v35 }
  0xfb   : > { %v3936_v7 = vrot.slane %v9020_v14, 5  ;;  %v3946_v47 = vrot.slane %v9021_v41, 4  ;;  %v3905_v12 = vsel %vm6837_vm4, %v3900_v6, %v3904_v2  ;;  %v3924_v53 = vrot.slane %v3923_v46, 4 }
  0xfc   : > { %v9022_v3 = vshrl.u32 %v7790_v15, 16  ;;  %v5541_v19 = vcombine.low %v3895_v42, %v3905_v12  ;;  %v3919_v40 = vsel %vm6837_vm4, %v3914_v59, %v3918_v52  ;;  %v3942_v25 = vrot.slane %v3940_v0, 5  ;;  %5945 = vmatprep.mubr.msk.bf16.mxu1 %vm434_vm1, %v5339_v11  ;;  %v6554_v11 = vld [vmem:[%s6703_s27 + $0x54] sm:$0xf]  ;;  %v6555_v12 = vld [vmem:[%s6703_s27 + $0x58] sm:$0xf] }
  0xfd   : > { %v3937_v51 = vor.u32 %v3936_v7, %v3933_v56  ;;  %v3929_v5 = vsel %vm6837_vm4, %v3924_v53, %v3928_v30  ;;  %v9023_v32 = vshll.u32 %v7790_v15, 16  ;;  %v3964_v28 = vshll.u32 %v7796_v44, 16  ;;  %v6553_v15 = vld [vmem:[%s6703_s27 + $0x4c] sm:$0xf]  ;;  %v9028_v56 = vld [vmem:[#allocation15_spill] sm:$0xff] }
  0xfe   : > { %v3957_v34 = vrot.slane %v9022_v3, 4  ;;  %v9024_v9 = vshrl.u32 %v7796_v44, 16  ;;  %6093 = vmatprep.mubr.msk.bf16.mxu0 %vm434_vm1, %v5541_v19  ;;  %v3947_v23 = vor.u32 %v3946_v47, %v3942_v25  ;;  %v3952_v36 = vrot.slane %v3950_v48, 5  ;;  %v8212_v44 = vld [vmem:[%s6703_s27 + $0xc8] sm:$0x1] }
  0xff   : > { %v3960_v2 = vrot.slane %v9023_v32, 5  ;;  %v3938_v27 = vrot.slane %v3937_v51, 4  ;;  %v3974_v33 = vshll.u32 %v8192_v58, 16  ;;  %v5340_v43 = vcombine.low %v6552_v16, %v6553_v15  ;;  %v8227_v48 = vld [vmem:[%s6703_s27 + $0xd4] sm:$0x1] }
 0x100   : > { %v3970_v17 = vrot.slane %v9024_v9, 4  ;;  %v5542_v8 = vcombine.low %v3919_v40, %v3929_v5  ;;  %v3966_v61 = vrot.slane %v3964_v28, 5  ;;  %v3948_v37 = vrot.slane %v3947_v23, 4  ;;  %v6557_v16 = vld [vmem:[%s6703_s27 + $0x64] sm:$0xf] }
 0x101   : > { %v3961_v20 = vor.u32 %v3960_v2, %v3957_v34  ;;  %v3943_v52 = vsel %vm6837_vm4, %v3938_v27, %v3942_v25  ;;  %v3976_v13 = vrot.slane %v3974_v33, 5  ;;  %v9026_v42 = vshrl.u32 %v9025_v31, 16  ;;  %5946 = vmatmul.mubr.msk.bf16.gmra.mrb[8].mxu1 %vm434_vm1, %v5340_v43  ;;  %v6556_v33 = vld [vmem:[%s6703_s27 + $0x60] sm:$0xf] }
 0x102   : > { %v3971_v59 = vor.u32 %v3970_v17, %v3966_v61  ;;  %v9027_v46 = vshll.u32 %v9025_v31, 16  ;;  %v3988_v14 = vshll.u32 %v9028_v56, 16  ;;  %v3953_v7 = vsel %vm6837_vm4, %v3948_v37, %v3952_v36  ;;  %6094 = vmatmul.mubr.msk.bf16.gmra.mrb[20].mxu0 %vm434_vm1, %v5542_v8 }
 0x103   : > { %v3981_v30 = vrot.slane %v9026_v42, 4  ;;  %v3962_v6 = vrot.slane %v3961_v20, 4  ;;  %v9029_v0 = vshrl.u32 %v9028_v56, 16  ;;  %v3998_v47 = vshll.u32 %v8212_v44, 16  ;;  %v8260_v56 = vld [vmem:[%s6703_s27 + $0x70] sm:$0xf] }
 0x104   : > { %v3984_v39 = vrot.slane %v9027_v46, 5  ;;  %v9030_v29 = vshrl.u32 %v7834_v49, 16  ;;  %v5341_v53 = vcombine.low %v6554_v11, %v6555_v12  ;;  %v5543_v3 = vcombine.low %v3943_v52, %v3953_v7  ;;  %v6558_v52 = vld [vmem:[%s6703_s27 + $0x18] sm:$0xf]  ;;  %v8277_v11 = vld [vmem:[%s6703_s27 + $0x84] sm:$0xf] }
 0x105   : > { %v3994_v41 = vrot.slane %v9029_v0, 4  ;;  %v3972_v34 = vrot.slane %v3971_v59, 4  ;;  %v3967_v40 = vsel %vm6837_vm4, %v3962_v6, %v3966_v61  ;;  %v3990_v51 = vrot.slane %v3988_v14, 5  ;;  %v6561_v59 = vld [vmem:[%s6703_s27 + $0x28] sm:$0xf] }
 0x106   : > { %v4005_v35 = vrot.slane %v9030_v29, 4  ;;  %v3985_v19 = vor.u32 %v3984_v39, %v3981_v30  ;;  %v9031_v25 = vshll.u32 %v7834_v49, 16  ;;  %v4012_v32 = vshll.u32 %v7840_v24, 16  ;;  %6097 = vmatprep.mubr.msk.bf16.mxu0 %vm434_vm1, %v5543_v3  ;;  %5949 = vmatprep.mubr.msk.bf16.mxu1 %vm434_vm1, %v5341_v53  ;;  %v6560_v30 = vld [vmem:[%s6703_s27 + $0x24] sm:$0xf] }
 0x107   : > { %v3977_v2 = vsel %vm6837_vm4, %v3972_v34, %v3976_v13  ;;  %v4018_v9 = vrot.slane %v4016_v45, 4  ;;  %v4022_v17 = vshll.u32 %v8227_v48, 16  ;;  %v3995_v27 = vor.u32 %v3994_v41, %v3990_v51  ;;  %v6559_v13 = vld [vmem:[%s6703_s27 + $0x1c] sm:$0xf]  ;;  %v8257_v39 = vld [vmem:[%s6703_s27 + $0x6c] sm:$0xf] }
 0x108   : > { %v4008_v5 = vrot.slane %v9031_v25, 5  ;;  %v3986_v28 = vrot.slane %v3985_v19, 4  ;;  %v4000_v49 = vrot.slane %v3998_v47, 5  ;;  %v4014_v36 = vrot.slane %v4012_v32, 5  ;;  %v8272_v47 = vld [vmem:[%s6703_s27 + $0x7c] sm:$0xf] }
 0x109   : > { %v5342_v15 = vcombine.low %v6556_v33, %v6557_v16  ;;  %v5544_v24 = vcombine.low %v3967_v40, %v3977_v2  ;;  %v4024_v8 = vrot.slane %v4022_v17, 5  ;;  %v3996_v43 = vrot.slane %v3995_v27, 4  ;;  %v8280_v12 = vld [vmem:[%s6703_s27 + $0x88] sm:$0xf]  ;;  %v6569_v2 = vld [vmem:[%s6703_s27 + $0x34] sm:$0xf] }
 0x10a   : > { %v4009_v23 = vor.u32 %v4008_v5, %v4005_v35  ;;  %v3991_v45 = vsel %vm6837_vm4, %v3986_v28, %v3990_v51  ;;  %v4019_v61 = vor.u32 %v4018_v9, %v4014_v36  ;;  %v5563_v37 = vrot.slane %v6558_v52, 9  ;;  %v6568_v5 = vld [vmem:[%s6703_s27 + $0x30] sm:$0xf]  ;;  %v8304_v17 = vld [vmem:[%s6703_s27 + $0x94] sm:$0xf] }
 0x10b   : > { %v4338_v31 = vrot.slane %v6559_v13, 5  ;;  %v4341_v42 = vrot.slane %v7876_v4, 5  ;;  %v5564_v6 = vrot.slane %v6560_v30, 9  ;;  %v4345_v46 = vrot.slane %v6561_v59, 5  ;;  %6098 = vmatmul.mubr.msk.bf16.gmra.mrb[24].mxu0 %vm434_vm1, %v5544_v24  ;;  %v8269_v4 = vld [vmem:[%s6703_s27 + $0x78] sm:$0xf]  ;;  %5950 = vmatmul.mubr.msk.bf16.gmra.mrb[12].mxu1 %vm434_vm1, %v5342_v15 }
 0x10c   : > { %v4010_v20 = vrot.slane %v4009_v23, 4  ;;  %v5343_v14 = vcombine.low %v8257_v39, %v8260_v56  ;;  %v4001_v7 = vsel %vm6837_vm4, %v3996_v43, %v4000_v49  ;;  %v4020_v0 = vrot.slane %v4019_v61, 4  ;;  %v8301_v9 = vld [vmem:[%s6703_s27 + $0x90] sm:$0xf]  ;;  %v8313_v23 = vld [vmem:[%s6703_s27 + $0x9c] sm:$0xf] }
 0x10d   : > { %v4348_v41 = vrot.slane %v7898_v22, 5  ;;  %v5344_v29 = vcombine.low %v8269_v4, %v8272_v47  ;;  %v5545_v35 = vcombine.low %v3991_v45, %v4001_v7  ;;  %v5345_v22 = vcombine.low %v8277_v11, %v8280_v12  ;;  %v6574_v45 = vld [vmem:[%s6703_s27 + $0x3c] sm:$0xf]  ;;  %v6575_v43 = vld [vmem:[%s6703_s27 + $0x40] sm:$0xf] }
 0x10e   : > { %v4340_v53 = vrot.slane %v4338_v31, 4  ;;  %v4015_v3 = vsel %vm6837_vm4, %v4010_v20, %v4014_v36  ;;  %v4025_v34 = vsel %vm6837_vm4, %v4020_v0, %v4024_v8  ;;  %v4339_v19 = vsel %vm7059_vm7, %v5563_v37, %v4338_v31  ;;  %v8316_v36 = vld [vmem:[%s6703_s27 + $0xa0] sm:$0xf]  ;;  %5953 = vmatprep.mubr.msk.bf16.mxu1 %vm434_vm1, %v5343_v14  ;;  %v8327_v37 = vld [vmem:[%s6703_s27 + $0xa8] sm:$0xf] }
 0x10f   : > { %v4347_v40 = vrot.slane %v4345_v46, 4  ;;  %6101 = vmatprep.mubr.msk.bf16.mxu0 %vm434_vm1, %v5545_v35  ;;  %v8295_v25 = vsel %vm7059_vm7, %v5564_v6, %v4345_v46  ;;  %v5565_v32 = vrot.slane %v6568_v5, 9  ;;  %v4352_v28 = vrot.slane %v6569_v2, 5  ;;  %v6578_v59 = vld [vmem:[%s6703_s27 + $0x4c] sm:$0xf] }
 0x110   : > { %v4342_v51 = vsel %vm7059_vm7, %v4340_v53, %v4341_v42  ;;  %v5346_v27 = vcombine.low %v8301_v9, %v8304_v17  ;;  %v5347_v33 = vcombine.low %v8313_v23, %v8316_v36  ;;  %v4355_v16 = vrot.slane %v7950_v21, 5  ;;  %v8330_v21 = vld [vmem:[%s6703_s27 + $0xac] sm:$0xf]  ;;  %v8345_v14 = vld [vmem:[%s6703_s27 + $0xb4] sm:$0xf] }
 0x111   : > { %v8310_v49 = vsel %vm7059_vm7, %v4347_v40, %v4348_v41  ;;  %v5546_v15 = vcombine.low %v4015_v3, %v4025_v34  ;;  %v4354_v24 = vrot.slane %v4352_v28, 4  ;;  %v5566_v8 = vrot.slane %v6574_v45, 9  ;;  %v8348_v7 = vld [vmem:[%s6703_s27 + $0xb8] sm:$0xf]  ;;  %v6581_v41 = vld [vmem:[%s6703_s27 + $0x48] sm:$0xf] }
 0x112   : > { %v4359_v20 = vrot.slane %v6575_v43, 5  ;;  %v5580_v61 = vcombine.low %v4339_v19, %v4342_v51  ;;  %v5581_v52 = vcombine.low %v8295_v25, %v8310_v49  ;;  %v5348_v13 = vcombine.low %v8327_v37, %v8330_v21  ;;  %v6582_v53 = vld [vmem:[%s6703_s27 + $0x54] sm:$0xf]  ;;  %v6583_v34 = vld [vmem:[%s6703_s27 + $0x58] sm:$0xf] }
 0x113   : > { %v8336_v31 = vsel %vm7059_vm7, %v5565_v32, %v4352_v28  ;;  %v8340_v42 = vsel %vm7059_vm7, %v4354_v24, %v4355_v16  ;;  %v4362_v6 = vrot.slane %v7980_v1, 5  ;;  %v4366_v46 = vrot.slane %v6578_v59, 5  ;;  %6102 = vmatmul.mubr.msk.bf16.gmra.mrb[28].mxu0 %vm434_vm1, %v5546_v15  ;;  %v8361_v40 = vld [vmem:[%s6703_s27 + $0xc0] sm:$0xf]  ;;  %v8364_v51 = vld [vmem:[%s6703_s27 + $0xc4] sm:$0xf]  ;;  %5954 = vmatmul.mubr.msk.bf16.gmra.mrb[16].mxu1 %vm434_vm1, %v5344_v29 }
 0x114   : > { %v4361_v30 = vrot.slane %v4359_v20, 4  ;;  %v5349_v0 = vcombine.low %v8345_v14, %v8348_v7  ;;  %v5567_v35 = vrot.slane %v6581_v41, 9  ;;  %v5568_v3 = vrot.slane %v6582_v53, 9  ;;  %6107 = vmatprep.mubr.msk.bf16.mxu0 %vm434_vm1, %v5580_v61  ;;  %5957 = vmatprep.mubr.msk.bf16.mxu1 %vm434_vm1, %v5345_v22  ;;  %v9034_v22 = vld [vmem:[#allocation11_spill] sm:$0xff]  ;;  %v9035_v59 = vld [vmem:[#allocation12_spill] sm:$0xff] }
 0x115   : > { %v4373_v19 = vrot.slane %v6583_v34, 5  ;;  %v8358_v1 = vsel %vm7059_vm7, %v5566_v8, %v4359_v20  ;;  %v5350_v25 = vcombine.low %v8361_v40, %v8364_v51  ;;  %v4368_v5 = vrot.slane %v4366_v46, 4  ;;  %v6587_v53 = vld [vmem:[%s6703_s27 + $0x60] sm:$0xf]  ;;  %v6588_v34 = vld [vmem:[%s6703_s27 + $0x64] sm:$0xf] }
 0x116   : > { %v4369_v32 = vrot.slane %v8011_v54, 5  ;;  %v5582_v2 = vcombine.low %v8336_v31, %v8340_v42  ;;  %v4376_v49 = vrot.slane %v8031_v50, 5  ;;  %v2357_v16 = vshrl.u32 %v8257_v39, 16  ;;  %v9032_v42 = vld [vmem:[#allocation19_spill] sm:$0xff] }
 0x117   : > { %v4375_v28 = vrot.slane %v4373_v19, 4  ;;  %v8376_v15 = vsel %vm7059_vm7, %v4361_v30, %v4362_v6  ;;  %v2360_v24 = vshll.u32 %v8257_v39, 16  ;;  %v2366_v45 = vshll.u32 %v8260_v56, 16  ;;  %v6586_v39 = vld [vmem:[%s6703_s27 + $0x74] sm:$0x1]  ;;  %v9033_v30 = vld [vmem:[#allocation10_spill] sm:$0xff] }
 0x118   : > { %v2370_v54 = vshrl.u32 %v8260_v56, 16  ;;  %v8387_v50 = vsel %vm7059_vm7, %v5567_v35, %v4366_v46  ;;  %v8391_v8 = vsel %vm7059_vm7, %v5568_v3, %v4373_v19  ;;  %v2359_v43 = vrot.slane %v2357_v16, 4  ;;  %v6589_v16 = vld [vmem:[%s6703_s27 + $0x6c] sm:$0xf] }
 0x119   : > { %v2376_v20 = vshll.u32 %v6586_v39, 16  ;;  %v8400_v56 = vsel %vm7059_vm7, %v4368_v5, %v4369_v32  ;;  %v2362_v4 = vrot.slane %v2360_v24, 5  ;;  %v8402_v47 = vrot.slane %v2366_v45, 5 }
 0x11a   : > { %v2372_v29 = vrot.slane %v2370_v54, 4  ;;  %v8406_v61 = vsel %vm7059_vm7, %v4375_v28, %v4376_v49  ;;  %v2387_v6 = vor.u32 %v9033_v30, %v9032_v42  ;;  %v2397_v46 = vor.u32 %v9035_v59, %v9034_v22  ;;  %v6590_v49 = vld [vmem:[%s6703_s27 + $0x70] sm:$0xf] }
 0x11b   : > { %v8408_v31 = vrot.slane %v2376_v20, 5  ;;  %v2363_v41 = vor.u32 %v2362_v4, %v2359_v43  ;;  %v5569_v3 = vrot.slane %v6587_v53, 9  ;;  %v4380_v19 = vrot.slane %v6588_v34, 5  ;;  %6108 = vmatmul.mubr.msk.bf16.vlgmr.msra.gmra.mrb[0].mxu0 %vm434_vm1, %v5581_v52  ;;  %v9036_v4 = vld [vmem:[#allocation13_spill] sm:$0xff]  ;;  %5958 = vmatmul.mubr.msk.bf16.gmra.mrb[20].mxu1 %vm434_vm1, %v5346_v27 }
 0x11c   : > { %v2373_v35 = vor.u32 %v2372_v29, %v8402_v47  ;;  %v2388_v5 = vrot.slane %v2387_v6, 4  ;;  %v2398_v32 = vrot.slane %v2397_v46, 4  ;;  %v5570_v28 = vrot.slane %v6589_v16, 9  ;;  %6111 = vmatprep.mubr.msk.bf16.mxu0 %vm434_vm1, %v5582_v2  ;;  %5961 = vmatprep.mubr.msk.bf16.mxu1 %vm434_vm1, %v5347_v33 }
 0x11d   : > { %v4387_v24 = vrot.slane %v6590_v49, 5  ;;  %v5583_v45 = vcombine.low %v8358_v1, %v8376_v15  ;;  %v5584_v54 = vcombine.low %v8387_v50, %v8400_v56  ;;  %v2364_v43 = vrot.slane %v2363_v41, 4 }
 0x11e   : > { %v2374_v39 = vrot.slane %v2373_v35, 4  ;;  %v2393_v20 = vsel %vm6837_vm4, %v2388_v5, %v9034_v22  ;;  %v2403_v29 = vsel %vm6837_vm4, %v2398_v32, %v9036_v4  ;;  %v4382_v42 = vrot.slane %v4380_v19, 4  ;;  %v6594_v4 = vld [vmem:[%s6703_s27 + $0x7c] sm:$0xf] }
 0x11f   : > { %v4383_v52 = vrot.slane %v8057_v10, 5  ;;  %v5585_v1 = vcombine.low %v8391_v8, %v8406_v61  ;;  %v8436_v15 = vsel %vm7059_vm7, %v5569_v3, %v4380_v19  ;;  %v8440_v2 = vsel %vm7059_vm7, %v5570_v28, %v4387_v24  ;;  %v6591_v3 = vld [vmem:[%s6703_s27 + $0x8c] sm:$0x1]  ;;  %v6592_v28 = vld [vmem:[%s6703_s27 + $0x98] sm:$0x1] }
 0x120   : > { %v4389_v50 = vrot.slane %v4387_v24, 4  ;;  %v2369_v10 = vsel %vm6837_vm4, %v2364_v43, %v8402_v47  ;;  %v2379_v56 = vsel %vm6837_vm4, %v2374_v39, %v8408_v31  ;;  %v4390_v30 = vrot.slane %v8073_v60, 5  ;;  %v6593_v39 = vld [vmem:[%s6703_s27 + $0x78] sm:$0xf] }
 0x121   : > { %v2405_v6 = vshrl.u32 %v8277_v11, 16  ;;  %v8458_v22 = vcombine.low %v2393_v20, %v2403_v29  ;;  %v2408_v27 = vshll.u32 %v8277_v11, 16  ;;  %v2414_v47 = vshll.u32 %v8280_v12, 16 }
 0x122   : > { %v2418_v59 = vshrl.u32 %v8280_v12, 16  ;;  %v4384_v31 = vsel %vm7059_vm7, %v4382_v42, %v4383_v52  ;;  %v2429_v60 = vshrl.u32 %v8301_v9, 16  ;;  %v2432_v41 = vshll.u32 %v8301_v9, 16 }
 0x123   : > { %v2407_v46 = vrot.slane %v2405_v6, 4  ;;  %v2410_v35 = vrot.slane %v2408_v27, 5  ;;  %v8467_v53 = vrot.slane %v2414_v47, 5  ;;  %v2424_v11 = vshll.u32 %v6591_v3, 16  ;;  %6112 = vmatmul.mubr.msk.bf16.gmra.mrb[4].mxu0 %vm434_vm1, %v5583_v45  ;;  %5962 = vmatmul.mubr.msk.bf16.gmra.mrb[24].mxu1 %vm434_vm1, %v5348_v13  ;;  %v6595_v47 = vld [vmem:[%s6703_s27 + $0x84] sm:$0xf] }
 0x124   : > { %v2420_v33 = vrot.slane %v2418_v59, 4  ;;  %v8472_v12 = vsel %vm7059_vm7, %v4389_v50, %v4390_v30  ;;  %v2431_v34 = vrot.slane %v2429_v60, 4  ;;  %v2434_v19 = vrot.slane %v2432_v41, 5  ;;  %6115 = vmatprep.mubr.msk.bf16.mxu0 %vm434_vm1, %v5584_v54  ;;  %5965 = vmatprep.mubr.msk.bf16.mxu1 %vm434_vm1, %v5349_v0  ;;  %v6596_v59 = vld [vmem:[%s6703_s27 + $0x88] sm:$0xf] }
 0x125   : > { %v2438_v5 = vshll.u32 %v8304_v17, 16  ;;  %v2411_v32 = vor.u32 %v2410_v35, %v2407_v46  ;;  %v2442_v16 = vshrl.u32 %v8304_v17, 16  ;;  %v2448_v49 = vshll.u32 %v6592_v28, 16 }
 0x126   : > { %v2421_v9 = vor.u32 %v2420_v33, %v8467_v53  ;;  %v2435_v24 = vor.u32 %v2434_v19, %v2431_v34  ;;  %v5571_v20 = vrot.slane %v6593_v39, 9  ;;  %v4394_v29 = vrot.slane %v6594_v4, 5  ;;  %v6597_v34 = vld [vmem:[%s6703_s27 + $0xa4] sm:$0x1]  ;;  %v6598_v4 = vld [vmem:[%s6703_s27 + $0xb0] sm:$0x1] }
 0x127   : > { %v8480_v43 = vrot.slane %v2438_v5, 5  ;;  %v5376_v42 = vcombine.low %v2369_v10, %v2379_v56  ;;  %v5586_v45 = vcombine.low %v8436_v15, %v4384_v31  ;;  %v8485_v52 = vrot.slane %v2411_v32, 4 }
 0x128   : > { %v2444_v50 = vrot.slane %v2442_v16, 4  ;;  %v2422_v17 = vrot.slane %v2421_v9, 4  ;;  %v2426_v54 = vrot.slane %v2424_v11, 5  ;;  %v4396_v30 = vrot.slane %v4394_v29, 4 }
 0x129   : > { %v4397_v6 = vrot.slane %v8094_v57, 5  ;;  %v5587_v15 = vcombine.low %v8440_v2, %v8472_v12  ;;  %v8498_v10 = vrot.slane %v2435_v24, 4  ;;  %v8501_v27 = vrot.slane %v2448_v49, 5 }
 0x12a   : > { %v2445_v56 = vor.u32 %v2444_v50, %v8480_v43  ;;  %v2417_v13 = vsel %vm6837_vm4, %v8485_v52, %v8467_v53  ;;  %v4395_v57 = vsel %vm7059_vm7, %v5571_v20, %v4394_v29  ;;  %v5572_v0 = vrot.slane %v6595_v47, 9 }
 0x12b   : > { %v4401_v31 = vrot.slane %v6596_v59, 5  ;;  %v4398_v46 = vsel %vm7059_vm7, %v4396_v30, %v4397_v6  ;;  %v4404_v60 = vrot.slane %v8116_v18, 5  ;;  %v2453_v41 = vshrl.u32 %v8313_v23, 16  ;;  %6116 = vmatmul.mubr.msk.bf16.gmra.mrb[8].mxu0 %vm434_vm1, %v5585_v1  ;;  %5966 = vmatmul.mubr.msk.bf16.gmra.mrb[28].mxu1 %vm434_vm1, %v5350_v25  ;;  %v6600_v30 = vld [vmem:[%s6703_s27 + $0x94] sm:$0xf] }
 0x12c   : > { %v2446_v2 = vrot.slane %v2445_v56, 4  ;;  %v2427_v35 = vsel %vm6837_vm4, %v2422_v17, %v2426_v54  ;;  %v2456_v33 = vshll.u32 %v8313_v23, 16  ;;  %v2462_v3 = vshll.u32 %v8316_v36, 16  ;;  %6119 = vmatprep.mubr.msk.bf16.mxu0 %vm434_vm1, %v5586_v45  ;;  %5987 = vmatprep.mubr.msk.bf16.mxu1 %vm434_vm1, %v5376_v42  ;;  %v6599_v17 = vld [vmem:[%s6703_s27 + $0x90] sm:$0xf] }
 0x12d   : > { %v4403_v53 = vrot.slane %v4401_v31, 4  ;;  %v2441_v18 = vsel %vm6837_vm4, %v8498_v10, %v8480_v43  ;;  %v2455_v11 = vrot.slane %v2453_v41, 4  ;;  %v2466_v12 = vshrl.u32 %v8316_v36, 16 }
 0x12e   : > { %v2472_v19 = vshll.u32 %v6597_v34, 16  ;;  %v5588_v23 = vcombine.low %v4395_v57, %v4398_v46  ;;  %v8532_v5 = vsel %vm7059_vm7, %v5572_v0, %v4401_v31  ;;  %v2458_v8 = vrot.slane %v2456_v33, 5  ;;  %v6601_v0 = vld [vmem:[%s6703_s27 + $0x9c] sm:$0xf]  ;;  %v6602_v31 = vld [vmem:[%s6703_s27 + $0xa0] sm:$0xf] }
 0x12f   : > { %v2464_v61 = vrot.slane %v2462_v3, 5  ;;  %v2451_v1 = vsel %vm6837_vm4, %v2446_v2, %v8501_v27  ;;  %v8539_v32 = vsel %vm7059_vm7, %v4403_v53, %v4404_v60  ;;  %v2468_v36 = vrot.slane %v2466_v12, 4 }
 0x130   : > { %v2477_v9 = vshrl.u32 %v8327_v37, 16  ;;  %v2459_v16 = vor.u32 %v2458_v8, %v2455_v11  ;;  %v2480_v28 = vshll.u32 %v8327_v37, 16  ;;  %v2486_v49 = vshll.u32 %v8330_v21, 16 }
 0x131   : > { %v2490_v24 = vshrl.u32 %v8330_v21, 16  ;;  %v2469_v43 = vor.u32 %v2468_v36, %v2464_v61  ;;  %v2474_v39 = vrot.slane %v2472_v19, 5  ;;  %v2496_v29 = vshll.u32 %v6598_v4, 16  ;;  %v6604_v4 = vld [vmem:[%s6703_s27 + $0xa8] sm:$0xf] }
 0x132   : > { %v2479_v20 = vrot.slane %v2477_v9, 4  ;;  %v2460_v45 = vrot.slane %v2459_v16, 4  ;;  %v2482_v52 = vrot.slane %v2480_v28, 5  ;;  %v8551_v25 = vrot.slane %v2486_v49, 5 }
 0x133   : > { %v2492_v50 = vrot.slane %v2490_v24, 4  ;;  %v2470_v37 = vrot.slane %v2469_v43, 4  ;;  %v5573_v54 = vrot.slane %v6599_v17, 9  ;;  %v4408_v6 = vrot.slane %v6600_v30, 5  ;;  %6120 = vmatmul.mubr.msk.bf16.gmra.mrb[12].mxu0 %vm434_vm1, %v5587_v15  ;;  %5988 = vmatmul.mubr.msk.bf16.vlgmr.msra.gmra.mrb[16].mxu1 %vm434_vm1, %v8458_v22  ;;  %v6603_v22 = vld [vmem:[%s6703_s27 + $0xbc] sm:$0x1] }
 0x134   : > { %v4411_v21 = vrot.slane %v8136_v55, 5  ;;  %v5378_v42 = vcombine.low %v2417_v13, %v2427_v35  ;;  %v2465_v10 = vsel %vm6837_vm4, %v2460_v45, %v2464_v61  ;;  %v2483_v56 = vor.u32 %v2482_v52, %v2479_v20  ;;  %6123 = vmatprep.mubr.msk.bf16.mxu0 %vm434_vm1, %v5588_v23  ;;  %v6605_v52 = vld [vmem:[%s6703_s27 + $0xac] sm:$0xf] }
 0x135   : > { %v2493_v27 = vor.u32 %v2492_v50, %v8551_v25  ;;  %v2475_v57 = vsel %vm6837_vm4, %v2470_v37, %v2474_v39  ;;  %v4410_v47 = vrot.slane %v4408_v6, 4  ;;  %v5574_v59 = vrot.slane %v6601_v0, 9 }
 0x136   : > { %v4415_v2 = vrot.slane %v6602_v31, 5  ;;  %v5379_v46 = vcombine.low %v2441_v18, %v2451_v1  ;;  %v5589_v55 = vcombine.low %v8532_v5, %v8539_v32  ;;  %v2498_v13 = vrot.slane %v2496_v29, 5  ;;  %5991 = vmatprep.mubr.msk.bf16.mxu1 %vm434_vm1, %v5378_v42 }
 0x137   : > { %v5380_v60 = vcombine.low %v2465_v10, %v2475_v57  ;;  %v4409_v41 = vsel %vm7059_vm7, %v5573_v54, %v4408_v6  ;;  %v4412_v15 = vsel %vm7059_vm7, %v4410_v47, %v4411_v21  ;;  %v2501_v35 = vshrl.u32 %v8345_v14, 16  ;;  %v6606_v6 = vld [vmem:[%s6703_s27 + $0xc8] sm:$0x1]  ;;  %v6608_v47 = vld [vmem:[%s6703_s27 + $0xb4] sm:$0xf] }
 0x138   : > { %v2484_v53 = vrot.slane %v2483_v56, 4  ;;  %v4417_v33 = vrot.slane %v4415_v2, 4  ;;  %v4418_v3 = vrot.slane %v8152_v62, 5  ;;  %v2504_v18 = vshll.u32 %v8345_v14, 16  ;;  %v6607_v56 = vld [vmem:[%s6703_s27 + $0xb8] sm:$0xf] }
 0x139   : > { %v2494_v11 = vrot.slane %v2493_v27, 4  ;;  %v4416_v12 = vsel %vm7059_vm7, %v5574_v59, %v4415_v2  ;;  %v2503_v34 = vrot.slane %v2501_v35, 4  ;;  %v2510_v19 = vshll.u32 %v8348_v7, 16 }
 0x13a   : > { %v5590_v23 = vcombine.low %v4409_v41, %v4412_v15  ;;  %v2506_v5 = vrot.slane %v2504_v18, 5  ;;  %v2514_v8 = vshrl.u32 %v8348_v7, 16  ;;  %v2520_v61 = vshll.u32 %v6603_v22, 16  ;;  %v6610_v15 = vld [vmem:[%s6703_s27 + $0xc4] sm:$0xf] }
 0x13b   : > { %v2512_v1 = vrot.slane %v2510_v19, 5  ;;  %v2525_v62 = vshrl.u32 %v8361_v40, 16  ;;  %v2528_v14 = vshll.u32 %v8361_v40, 16  ;;  %v2534_v32 = vshll.u32 %v8364_v51, 16  ;;  %6124 = vmatmul.mubr.msk.bf16.gmra.mrb[16].mxu0 %vm434_vm1, %v5589_v55  ;;  %5992 = vmatmul.mubr.msk.bf16.gmra.mrb[20].mxu1 %vm434_vm1, %v5379_v46  ;;  %v6609_v46 = vld [vmem:[%s6703_s27 + $0xc0] sm:$0xf] }
 0x13c   : > { %v4419_v36 = vsel %vm7059_vm7, %v4417_v33, %v4418_v3  ;;  %v2507_v9 = vor.u32 %v2506_v5, %v2503_v34  ;;  %v2516_v16 = vrot.slane %v2514_v8, 4  ;;  %v2538_v28 = vshrl.u32 %v8364_v51, 16  ;;  %6127 = vmatprep.mubr.msk.bf16.mxu0 %vm434_vm1, %v5590_v23  ;;  %5995 = vmatprep.mubr.msk.bf16.mxu1 %vm434_vm1, %v5380_v60  ;;  %v6611_v34 = vld [vmem:[%s6703_s27 + $0xd0] sm:$0xf] }
 0x13d   : > { %v2522_v7 = vrot.slane %v2520_v61, 5  ;;  %v2527_v49 = vrot.slane %v2525_v62, 4  ;;  %v2530_v24 = vrot.slane %v2528_v14, 5  ;;  %v8589_v43 = vrot.slane %v2534_v32, 5 }
 0x13e   : > { %v2508_v40 = vrot.slane %v2507_v9, 4  ;;  %v2517_v39 = vor.u32 %v2516_v16, %v2512_v1  ;;  %v2540_v20 = vrot.slane %v2538_v28, 4  ;;  %v5575_v29 = vrot.slane %v6604_v4, 9 }
 0x13f   : > { %v2489_v51 = vsel %vm6837_vm4, %v2484_v53, %v8551_v25  ;;  %v2499_v45 = vsel %vm6837_vm4, %v2494_v11, %v2498_v13  ;;  %v4422_v50 = vrot.slane %v6605_v52, 5  ;;  %v4425_v37 = vrot.slane %v8171_v26, 5 }
 0x140   : > { %v5591_v17 = vcombine.low %v4416_v12, %v4419_v36  ;;  %v2518_v54 = vrot.slane %v2517_v39, 4  ;;  %v2531_v30 = vor.u32 %v2530_v24, %v2527_v49  ;;  %v2544_v21 = vshll.u32 %v6606_v6, 16 }
 0x141   : > { %v2541_v25 = vor.u32 %v2540_v20, %v8589_v43  ;;  %v4423_v42 = vsel %vm7059_vm7, %v5575_v29, %v4422_v50  ;;  %v4424_v10 = vrot.slane %v4422_v50, 4  ;;  %v4429_v27 = vrot.slane %v6607_v56, 5 }
 0x142   : > { %v2513_v26 = vsel %vm6837_vm4, %v2508_v40, %v2512_v1  ;;  %v2523_v57 = vsel %vm6837_vm4, %v2518_v54, %v2522_v7  ;;  %v5576_v0 = vrot.slane %v6608_v47, 9  ;;  %v4432_v59 = vrot.slane %v8192_v58, 5  ;;  %v6612_v1 = vld [vmem:[%s6703_s27 + $0xcc] sm:$0xf] }
 0x143   : > { %v5381_v31 = vcombine.low %v2489_v51, %v2499_v45  ;;  %v4426_v2 = vsel %vm7059_vm7, %v4424_v10, %v4425_v37  ;;  %v5577_v55 = vrot.slane %v6609_v46, 9  ;;  %v8616_v13 = vrot.slane %v2544_v21, 5  ;;  %6128 = vmatmul.mubr.msk.bf16.gmra.mrb[20].mxu0 %vm434_vm1, %v5591_v17  ;;  %v8700_v10 = vld [vmem:[%s8855_s2] ss:$0 sm:$0xff] }
 0x144   : > { %v5592_v60 = vcombine.low %v4423_v42, %v4426_v2  ;;  %v4431_v41 = vrot.slane %v4429_v27, 4  ;;  %v4436_v35 = vrot.slane %v6610_v15, 5  ;;  %v5382_v53 = vcombine.low %v2513_v26, %v2523_v57 }
 0x145   : > { %v2532_v33 = vrot.slane %v2531_v30, 4  ;;  %v2542_v3 = vrot.slane %v2541_v25, 4  ;;  %v4439_v58 = vrot.slane %v8212_v44, 5  ;;  %v4430_v18 = vsel %vm7059_vm7, %v5576_v0, %v4429_v27  ;;  %5996 = vmatmul.mubr.msk.bf16.gmra.mrb[24].mxu1 %vm434_vm1, %v5381_v31 }
 0x146   : > { %6131 = vmatprep.mubr.msk.bf16.mxu0 %vm434_vm1, %v5592_v60  ;;  %v4433_v11 = vsel %vm7059_vm7, %v4431_v41, %v4432_v59  ;;  %v4438_v12 = vrot.slane %v4436_v35, 4  ;;  %v4443_v19 = vrot.slane %v6611_v34, 5  ;;  %v4437_v23 = vsel %vm7059_vm7, %v5577_v55, %v4436_v35  ;;  %5999 = vmatprep.mubr.msk.bf16.mxu1 %vm434_vm1, %v5382_v53 }
 0x147   : > { %v2537_v5 = vsel %vm6837_vm4, %v2532_v33, %v8589_v43  ;;  %v2547_v8 = vsel %vm6837_vm4, %v2542_v3, %v8616_v13  ;;  %v5593_v22 = vcombine.low %v4430_v18, %v4433_v11  ;;  %v6637_v61 = vmov 0.0  }
 0x148   : > { %v4440_v44 = vsel %vm7059_vm7, %v4438_v12, %v4439_v58  ;;  %240 = vst.msk [vmem:[#allocation2 + $0x10] sm:$0xff] %vm237_vm8, %v6637_v61  ;;  %238 = vst.msk [vmem:[#allocation2] sm:$0xff] %vm237_vm8, %v6637_v61  ;;  %v5578_v62 = vrot.slane %v6612_v1, 9  ;;  %v4445_v14 = vrot.slane %v4443_v19, 4  ;;  %v4446_v32 = vrot.slane %v8227_v48, 5 }
 0x149   : > { %239 = vst.msk [vmem:[#allocation2 + $0x8] sm:$0xff] %vm237_vm8, %v6637_v61  ;;  %241 = vst.msk [vmem:[#allocation2 + $0x18] sm:$0xff] %vm237_vm8, %v6637_v61  ;;  %v5594_v38 = vcombine.low %v4437_v23, %v4440_v44  ;;  %v5383_v36 = vcombine.low %v2537_v5, %v2547_v8 }
 0x14a   : > { %242 = vst.msk [vmem:[#allocation2 + $0x20] sm:$0xff] %vm237_vm8, %v6637_v61  ;;  %243 = vst.msk [vmem:[#allocation2 + $0x28] sm:$0xff] %vm237_vm8, %v6637_v61  ;;  %v4444_v9 = vsel %vm7059_vm7, %v5578_v62, %v4443_v19  ;;  %v4447_v16 = vsel %vm7059_vm7, %v4445_v14, %v4446_v32 }
 0x14b   : > { %244 = vst.msk [vmem:[#allocation2 + $0x30] sm:$0xff] %vm237_vm8, %v6637_v61  ;;  %245 = vst.msk [vmem:[#allocation2 + $0x38] sm:$0xff] %vm237_vm8, %v6637_v61  ;;  %6132 = vmatmul.mubr.msk.bf16.gmra.mrb[24].mxu0 %vm434_vm1, %v5593_v22  ;;  %v5595_v28 = vcombine.low %v4444_v9, %v4447_v16 }
 0x14c   : > { %246 = vst.msk [vmem:[#allocation2 + $0x40] sm:$0xff] %vm237_vm8, %v6637_v61  ;;  %247 = vst.msk [vmem:[#allocation2 + $0x48] sm:$0xff] %vm237_vm8, %v6637_v61  ;;  %6135 = vmatprep.mubr.msk.bf16.mxu0 %vm434_vm1, %v5594_v38 }
 0x14d   : > { %248 = vst.msk [vmem:[#allocation2 + $0x50] sm:$0xff] %vm237_vm8, %v6637_v61  ;;  %249 = vst.msk [vmem:[#allocation2 + $0x58] sm:$0xff] %vm237_vm8, %v6637_v61  ;;  %6000 = vmatmul.mubr.msk.bf16.gmra.mrb[28].mxu1 %vm434_vm1, %v5383_v36 }
 0x14e   : > { %250 = vst.msk [vmem:[#allocation2 + $0x60] sm:$0xff] %vm237_vm8, %v6637_v61  ;;  %251 = vst.msk [vmem:[#allocation2 + $0x68] sm:$0xff] %vm237_vm8, %v6637_v61 }
 0x14f   : > { %252 = vst.msk [vmem:[#allocation2 + $0x70] sm:$0xff] %vm237_vm8, %v6637_v61  ;;  %253 = vst.msk [vmem:[#allocation2 + $0x78] sm:$0xff] %vm237_vm8, %v6637_v61  ;;  %v272_v17 = vld [vmem:[#allocation2 + $0x10] sm:$0xff]  ;;  %v270_v54 = vld [vmem:[#allocation2] sm:$0xff] }
 0x150   : > { %254 = vst.msk [vmem:[#allocation2 + $0x80] sm:$0xff] %vm237_vm8, %v6637_v61  ;;  %255 = vst.msk [vmem:[#allocation2 + $0x88] sm:$0xff] %vm237_vm8, %v6637_v61  ;;  %v273_v30 = vld [vmem:[#allocation2 + $0x18] sm:$0xff]  ;;  %v271_v21 = vld [vmem:[#allocation2 + $0x8] sm:$0xff] }
 0x151   : > { %256 = vst.msk [vmem:[#allocation2 + $0x90] sm:$0xff] %vm237_vm8, %v6637_v61  ;;  %257 = vst.msk [vmem:[#allocation2 + $0x98] sm:$0xff] %vm237_vm8, %v6637_v61  ;;  %v274_v60 = vld [vmem:[#allocation2 + $0x20] sm:$0xff]  ;;  %v275_v58 = vld [vmem:[#allocation2 + $0x28] sm:$0xff] }
 0x152   : > { %258 = vst.msk [vmem:[#allocation2 + $0xa0] sm:$0xff] %vm237_vm8, %v6637_v61  ;;  %259 = vst.msk [vmem:[#allocation2 + $0xa8] sm:$0xff] %vm237_vm8, %v6637_v61  ;;  %v276_v46 = vld [vmem:[#allocation2 + $0x30] sm:$0xff]  ;;  %v277_v35 = vld [vmem:[#allocation2 + $0x38] sm:$0xff] }
 0x153   : > { %260 = vst.msk [vmem:[#allocation2 + $0xb0] sm:$0xff] %vm237_vm8, %v6637_v61  ;;  %261 = vst.msk [vmem:[#allocation2 + $0xb8] sm:$0xff] %vm237_vm8, %v6637_v61  ;;  %6136 = vmatmul.mubr.msk.bf16.gmra.mrb[28].mxu0 %vm434_vm1, %v5595_v28 }
 0x154   : > { %262 = vst.msk [vmem:[#allocation2 + $0xc0] sm:$0xff] %vm237_vm8, %v6637_v61  ;;  %263 = vst.msk [vmem:[#allocation2 + $0xc8] sm:$0xff] %vm237_vm8, %v6637_v61 }
 0x155   : > { %264 = vst.msk [vmem:[#allocation2 + $0xd0] sm:$0xff] %vm237_vm8, %v6637_v61  ;;  %265 = vst.msk [vmem:[#allocation2 + $0xd8] sm:$0xff] %vm237_vm8, %v6637_v61 }
 0x156   : > { %266 = vst.msk [vmem:[#allocation2 + $0xe0] sm:$0xff] %vm237_vm8, %v6637_v61  ;;  %267 = vst.msk [vmem:[#allocation2 + $0xe8] sm:$0xff] %vm237_vm8, %v6637_v61 }
 0x157   : > { %268 = vst.msk [vmem:[#allocation2 + $0xf0] sm:$0xff] %vm237_vm8, %v6637_v61  ;;  %269 = vst.msk [vmem:[#allocation2 + $0xf8] sm:$0xff] %vm237_vm8, %v6637_v61 }
 0x1c3   : > { %v5939_v7 = vpop.f32.mrb[0].mxu1 }
 0x1c4   : > { %v2005_v49 = vpop.f32.mrb[1].mxu1  ;;  %v6141_v6 = vadd.f32 %v5939_v7, %v272_v17  ;;  %v280_v7 = vld [vmem:[#allocation2 + $0x50] sm:$0xff] }
 0x1c5   : > { %v5940_v24 = vpop.f32.mrb[2].mxu1  ;;  %v6143_v25 = vadd.f32 %v2005_v49, %v270_v54 }
 0x1c6   : > { %v2008_v48 = vpop.f32.mrb[3].mxu1  ;;  %v6145_v56 = vadd.f32 %v5940_v24, %v273_v30 }
 0x1c7   : > { %v6147_v57 = vadd.f32 %v2008_v48, %v271_v21 }
 0x1cc   : > { %v5943_v43 = vpop.f32.mrb[4].mxu1 }
 0x1cd   : > { %v2021_v40 = vpop.f32.mrb[5].mxu1  ;;  %v6149_v3 = vadd.f32 %v5943_v43, %v276_v46  ;;  %v278_v43 = vld [vmem:[#allocation2 + $0x40] sm:$0xff] }
 0x1ce   : > { %v5944_v39 = vpop.f32.mrb[6].mxu1  ;;  %v6151_v12 = vadd.f32 %v2021_v40, %v274_v60 }
 0x1cf   : > { %v2024_v20 = vpop.f32.mrb[7].mxu1  ;;  %v6153_v44 = vadd.f32 %v5944_v39, %v277_v35 }
 0x1d0   : > { %v6155_v38 = vadd.f32 %v2024_v20, %v275_v58  ;;  %v281_v20 = vld [vmem:[#allocation2 + $0x58] sm:$0xff] }
 0x1d4   : > { %v8681_v4 = vpop.f32.mrb[8].mxu1 }
 0x1d5   : > { %v8683_v29 = vpop.f32.mrb[9].mxu1  ;;  %v6157_v30 = vadd.f32 %v8681_v4, %v280_v7 }
 0x1d6   : > { %v8685_v51 = vpop.f32.mrb[10].mxu1 }
 0x1d7   : > { %v8687_v63 = vpop.f32.mrb[11].mxu1 }
 0x1de   : > { %v8689_v45 = vpop.f32.mrb[12].mxu1 }
 0x1df   : > { %v8691_v52 = vpop.f32.mrb[13].mxu1 }
 0x1e0   : > { %v8693_v50 = vpop.f32.mrb[14].mxu1 }
 0x1e1   : > { %v8695_v37 = vpop.f32.mrb[15].mxu1 }
 0x1ee   : > { %v6109_v42 = vpop.f32.mrb[0].mxu0 }
 0x1ef   : > { %v6142_v27 = vadd.f32 %v6141_v6, %v6109_v42  ;;  %v4583_v26 = vpop.f32.mrb[1].mxu0  ;;  %v279_v6 = vld [vmem:[#allocation2 + $0x48] sm:$0xff]  ;;  %v6159_v42 = vadd.f32 %v8683_v29, %v278_v43 }
 0x1f0   : > { %v6144_v47 = vadd.f32 %v6143_v25, %v4583_v26  ;;  %v6110_v0 = vpop.f32.mrb[2].mxu0 }
 0x1f1   : > { %4745 = vst.msk [vmem:[#allocation2 + $0x10] sm:$0xff] %vm237_vm8, %v6142_v27  ;;  %v4787_v59 = vadd.f32 %v6142_v27, %v8700_v10  ;;  %v6146_v31 = vadd.f32 %v6145_v56, %v6110_v0  ;;  %v4586_v2 = vpop.f32.mrb[3].mxu0 }
 0x1f2   : > { %4743 = vst.msk [vmem:[#allocation2] sm:$0xff] %vm237_vm8, %v6144_v47  ;;  %v4785_v55 = vadd.f32 %v6144_v47, %v8700_v10  ;;  %v6148_v13 = vadd.f32 %v6147_v57, %v4586_v2  ;;  %v6161_v57 = vadd.f32 %v8685_v51, %v281_v20  ;;  %v6163_v2 = vadd.f32 %v8687_v63, %v279_v6  ;;  %v286_v20 = vld [vmem:[#allocation2 + $0x80] sm:$0xff]  ;;  %v289_v6 = vld [vmem:[#allocation2 + $0x98] sm:$0xff] }
 0x1f3   : > { %v4819_v41 = vmul.f32 0.1, %v4787_v59  ;;  %4746 = vst.msk [vmem:[#allocation2 + $0x18] sm:$0xff] %vm237_vm8, %v6146_v31  ;;  %v4788_v15 = vadd.f32 %v6146_v31, %v8700_v10 }
 0x1f4   : > { %v4817_v53 = vmul.f32 0.1, %v4785_v55  ;;  %4744 = vst.msk [vmem:[#allocation2 + $0x8] sm:$0xff] %vm237_vm8, %v6148_v13  ;;  %v4786_v33 = vadd.f32 %v6148_v13, %v8700_v10 }
 0x1f5   : > { %v4851_v18 = vmax.f32 %v4787_v59, %v4819_v41  ;;  %v4820_v11 = vmul.f32 0.1, %v4788_v15 }
 0x1f6   : > { %v4849_v34 = vmax.f32 %v4785_v55, %v4817_v53  ;;  %v4818_v19 = vmul.f32 0.1, %v4786_v33  ;;  %v6113_v23 = vpop.f32.mrb[4].mxu0 }
 0x1f7   : > { %v5650_v5 = vpack.c.bf16 %v4851_v18, %v4851_v18  ;;  %v4852_v8 = vmax.f32 %v4788_v15, %v4820_v11  ;;  %v6150_v22 = vadd.f32 %v6149_v3, %v6113_v23  ;;  %v4599_v61 = vpop.f32.mrb[5].mxu0  ;;  %v284_v15 = vld [vmem:[#allocation2 + $0x70] sm:$0xff]  ;;  %v285_v18 = vld [vmem:[#allocation2 + $0x78] sm:$0xff] }
 0x1f8   : > { %v5648_v1 = vpack.c.bf16 %v4849_v34, %v4849_v34  ;;  %v4850_v62 = vmax.f32 %v4786_v33, %v4818_v19  ;;  %v6152_v14 = vadd.f32 %v6151_v12, %v4599_v61  ;;  %v6114_v32 = vpop.f32.mrb[6].mxu0  ;;  %v282_v33 = vld [vmem:[#allocation2 + $0x60] sm:$0xff]  ;;  %v6165_v34 = vadd.f32 %v8689_v45, %v284_v15  ;;  %v283_v19 = vld [vmem:[#allocation2 + $0x68] sm:$0xff] }
 0x1f9   : > { %5012 = vst.msk [vmem:[%s8714_s12 + $0x8] sm:$0xf] %vm5009_vm9, %v5650_v5  ;;  %v5651_v36 = vpack.c.bf16 %v4852_v8, %v4852_v8  ;;  %v4791_v9 = vadd.f32 %v6150_v22, %v8700_v10  ;;  %v6154_v16 = vadd.f32 %v6153_v44, %v6114_v32  ;;  %v4602_v28 = vpop.f32.mrb[7].mxu0  ;;  %v6167_v5 = vadd.f32 %v8691_v52, %v282_v33 }
 0x1fa   : > { %4749 = vst.msk [vmem:[#allocation2 + $0x30] sm:$0xff] %vm237_vm8, %v6150_v22  ;;  %v5649_v49 = vpack.c.bf16 %v4850_v62, %v4850_v62  ;;  %4747 = vst.msk [vmem:[#allocation2 + $0x20] sm:$0xff] %vm237_vm8, %v6152_v14  ;;  %v4789_v24 = vadd.f32 %v6152_v14, %v8700_v10  ;;  %v6156_v48 = vadd.f32 %v6155_v38, %v4602_v28 }
 0x1fb   : > { %5010 = vst.msk [vmem:[%s8714_s12] sm:$0xf] %vm5009_vm9, %v5648_v1  ;;  %5013 = vst.msk [vmem:[%s8714_s12 + $0xc] sm:$0xf] %vm5009_vm9, %v5651_v36  ;;  %v4823_v40 = vmul.f32 0.1, %v4791_v9  ;;  %v4792_v39 = vadd.f32 %v6154_v16, %v8700_v10  ;;  %v6169_v38 = vadd.f32 %v8693_v50, %v285_v18  ;;  %v6171_v36 = vadd.f32 %v8695_v37, %v283_v19 }
 0x1fc   : > { %4750 = vst.msk [vmem:[#allocation2 + $0x38] sm:$0xff] %vm237_vm8, %v6154_v16  ;;  %v4821_v17 = vmul.f32 0.1, %v4789_v24  ;;  %4748 = vst.msk [vmem:[#allocation2 + $0x28] sm:$0xff] %vm237_vm8, %v6156_v48  ;;  %v4790_v54 = vadd.f32 %v6156_v48, %v8700_v10  ;;  %v288_v37 = vld [vmem:[#allocation2 + $0x90] sm:$0xff]  ;;  %v290_v19 = vld [vmem:[#allocation2 + $0xa0] sm:$0xff] }
 0x1fd   : > { %5011 = vst.msk [vmem:[%s8714_s12 + $0x4] sm:$0xf] %vm5009_vm9, %v5649_v49  ;;  %v4855_v21 = vmax.f32 %v4791_v9, %v4823_v40  ;;  %v4824_v25 = vmul.f32 0.1, %v4792_v39  ;;  %v292_v18 = vld [vmem:[#allocation2 + $0xb0] sm:$0xff] }
 0x1fe   : > { %v4853_v56 = vmax.f32 %v4789_v24, %v4821_v17  ;;  %v4822_v27 = vmul.f32 0.1, %v4790_v54  ;;  %v6117_v26 = vpop.f32.mrb[8].mxu0 }
 0x1ff   : > { %v5654_v47 = vpack.c.bf16 %v4855_v21, %v4855_v21  ;;  %v4856_v0 = vmax.f32 %v4792_v39, %v4824_v25  ;;  %v6158_v59 = vadd.f32 %v6157_v30, %v6117_v26  ;;  %v4615_v31 = vpop.f32.mrb[9].mxu0  ;;  %v287_v26 = vld [vmem:[#allocation2 + $0x88] sm:$0xff] }
 0x200   : > { %v5652_v46 = vpack.c.bf16 %v4853_v56, %v4853_v56  ;;  %v4854_v4 = vmax.f32 %v4790_v54, %v4822_v27  ;;  %v6160_v55 = vadd.f32 %v6159_v42, %v4615_v31  ;;  %v6118_v13 = vpop.f32.mrb[10].mxu0 }
 0x201   : > { %5016 = vst.msk [vmem:[%s8714_s12 + $0x18] sm:$0xf] %vm5009_vm9, %v5654_v47  ;;  %v5655_v29 = vpack.c.bf16 %v4856_v0, %v4856_v0  ;;  %v4795_v51 = vadd.f32 %v6158_v59, %v8700_v10  ;;  %v6162_v60 = vadd.f32 %v6161_v57, %v6118_v13  ;;  %v4618_v41 = vpop.f32.mrb[11].mxu0 }
 0x202   : > { %4753 = vst.msk [vmem:[#allocation2 + $0x50] sm:$0xff] %vm237_vm8, %v6158_v59  ;;  %v5653_v35 = vpack.c.bf16 %v4854_v4, %v4854_v4  ;;  %4751 = vst.msk [vmem:[#allocation2 + $0x40] sm:$0xff] %vm237_vm8, %v6160_v55  ;;  %v4793_v63 = vadd.f32 %v6160_v55, %v8700_v10  ;;  %v6164_v53 = vadd.f32 %v6163_v2, %v4618_v41 }
 0x203   : > { %5014 = vst.msk [vmem:[%s8714_s12 + $0x10] sm:$0xf] %vm5009_vm9, %v5652_v46  ;;  %5017 = vst.msk [vmem:[%s8714_s12 + $0x1c] sm:$0xf] %vm5009_vm9, %v5655_v29  ;;  %v4827_v3 = vmul.f32 0.1, %v4795_v51  ;;  %v4796_v58 = vadd.f32 %v6162_v60, %v8700_v10 }
 0x204   : > { %4754 = vst.msk [vmem:[#allocation2 + $0x58] sm:$0xff] %vm237_vm8, %v6162_v60  ;;  %v4825_v11 = vmul.f32 0.1, %v4793_v63  ;;  %4752 = vst.msk [vmem:[#allocation2 + $0x48] sm:$0xff] %vm237_vm8, %v6164_v53  ;;  %v4794_v12 = vadd.f32 %v6164_v53, %v8700_v10 }
 0x205   : > { %5015 = vst.msk [vmem:[%s8714_s12 + $0x14] sm:$0xf] %vm5009_vm9, %v5653_v35  ;;  %v4859_v23 = vmax.f32 %v4795_v51, %v4827_v3  ;;  %v4828_v44 = vmul.f32 0.1, %v4796_v58 }
 0x206   : > { %v4857_v8 = vmax.f32 %v4793_v63, %v4825_v11  ;;  %v4826_v22 = vmul.f32 0.1, %v4794_v12  ;;  %v6121_v61 = vpop.f32.mrb[12].mxu0  ;;  %v5989_v7 = vpop.f32.mrb[16].mxu1 }
 0x207   : > { %v5658_v1 = vpack.c.bf16 %v4859_v23, %v4859_v23  ;;  %v4860_v62 = vmax.f32 %v4796_v58, %v4828_v44  ;;  %v6166_v14 = vadd.f32 %v6165_v34, %v6121_v61  ;;  %v4631_v32 = vpop.f32.mrb[13].mxu0  ;;  %v2747_v43 = vpop.f32.mrb[17].mxu1  ;;  %v6173_v56 = vadd.f32 %v5989_v7, %v288_v37 }
 0x208   : > { %v5656_v9 = vpack.c.bf16 %v4857_v8, %v4857_v8  ;;  %v4858_v45 = vmax.f32 %v4794_v12, %v4826_v22  ;;  %v6168_v16 = vadd.f32 %v6167_v5, %v4631_v32  ;;  %v6122_v28 = vpop.f32.mrb[14].mxu0  ;;  %v5990_v54 = vpop.f32.mrb[18].mxu1  ;;  %v6175_v47 = vadd.f32 %v2747_v43, %v286_v20  ;;  %v293_v8 = vld [vmem:[#allocation2 + $0xb8] sm:$0xff] }
 0x209   : > { %5020 = vst.msk [vmem:[%s8714_s12 + $0x28] sm:$0xf] %vm5009_vm9, %v5658_v1  ;;  %v5659_v52 = vpack.c.bf16 %v4860_v62, %v4860_v62  ;;  %v4799_v50 = vadd.f32 %v6166_v14, %v8700_v10  ;;  %v6170_v49 = vadd.f32 %v6169_v38, %v6122_v28  ;;  %v4634_v24 = vpop.f32.mrb[15].mxu0  ;;  %v2750_v25 = vpop.f32.mrb[19].mxu1  ;;  %v6177_v46 = vadd.f32 %v5990_v54, %v289_v6 }
 0x20a   : > { %4757 = vst.msk [vmem:[#allocation2 + $0x70] sm:$0xff] %vm237_vm8, %v6166_v14  ;;  %v5657_v48 = vpack.c.bf16 %v4858_v45, %v4858_v45  ;;  %4755 = vst.msk [vmem:[#allocation2 + $0x60] sm:$0xff] %vm237_vm8, %v6168_v16  ;;  %v4797_v40 = vadd.f32 %v6168_v16, %v8700_v10  ;;  %v6172_v39 = vadd.f32 %v6171_v36, %v4634_v24  ;;  %v291_v14 = vld [vmem:[#allocation2 + $0xa8] sm:$0xff] }
 0x20b   : > { %5018 = vst.msk [vmem:[%s8714_s12 + $0x20] sm:$0xf] %vm5009_vm9, %v5656_v9  ;;  %5021 = vst.msk [vmem:[%s8714_s12 + $0x2c] sm:$0xf] %vm5009_vm9, %v5659_v52  ;;  %v4831_v17 = vmul.f32 0.1, %v4799_v50  ;;  %v4800_v30 = vadd.f32 %v6170_v49, %v8700_v10  ;;  %v6179_v51 = vadd.f32 %v2750_v25, %v287_v26 }
 0x20c   : > { %4758 = vst.msk [vmem:[#allocation2 + $0x78] sm:$0xff] %vm237_vm8, %v6170_v49  ;;  %v4829_v21 = vmul.f32 0.1, %v4797_v40  ;;  %4756 = vst.msk [vmem:[#allocation2 + $0x68] sm:$0xff] %vm237_vm8, %v6172_v39  ;;  %v4798_v42 = vadd.f32 %v6172_v39, %v8700_v10 }
 0x20d   : > { %5019 = vst.msk [vmem:[%s8714_s12 + $0x24] sm:$0xf] %vm5009_vm9, %v5657_v48  ;;  %v4863_v27 = vmax.f32 %v4799_v50, %v4831_v17  ;;  %v4832_v57 = vmul.f32 0.1, %v4800_v30 }
 0x20e   : > { %v4861_v0 = vmax.f32 %v4797_v40, %v4829_v21  ;;  %v4830_v59 = vmul.f32 0.1, %v4798_v42  ;;  %v6125_v31 = vpop.f32.mrb[16].mxu0  ;;  %v5993_v63 = vpop.f32.mrb[20].mxu1  ;;  %v296_v21 = vld [vmem:[#allocation2 + $0xd0] sm:$0xff] }
 0x20f   : > { %v5662_v2 = vpack.c.bf16 %v4863_v27, %v4863_v27  ;;  %v4864_v4 = vmax.f32 %v4800_v30, %v4832_v57  ;;  %v6174_v55 = vadd.f32 %v6173_v56, %v6125_v31  ;;  %v4647_v13 = vpop.f32.mrb[17].mxu0  ;;  %v2763_v11 = vpop.f32.mrb[21].mxu1  ;;  %v6181_v1 = vadd.f32 %v5993_v63, %v292_v18  ;;  %v294_v27 = vld [vmem:[#allocation2 + $0xc0] sm:$0xff] }
 0x210   : > { %v5660_v29 = vpack.c.bf16 %v4861_v0, %v4861_v0  ;;  %v4862_v60 = vmax.f32 %v4798_v42, %v4830_v59  ;;  %v6176_v41 = vadd.f32 %v6175_v47, %v4647_v13  ;;  %v6126_v15 = vpop.f32.mrb[18].mxu0  ;;  %v5994_v44 = vpop.f32.mrb[22].mxu1  ;;  %v6183_v36 = vadd.f32 %v2763_v11, %v290_v19  ;;  %v297_v0 = vld [vmem:[#allocation2 + $0xd8] sm:$0xff] }
 0x211   : > { %5024 = vst.msk [vmem:[%s8714_s12 + $0x38] sm:$0xf] %vm5009_vm9, %v5662_v2  ;;  %v5663_v35 = vpack.c.bf16 %v4864_v4, %v4864_v4  ;;  %v4803_v53 = vadd.f32 %v6174_v55, %v8700_v10  ;;  %v6178_v33 = vadd.f32 %v6177_v46, %v6126_v15  ;;  %v4650_v3 = vpop.f32.mrb[19].mxu0  ;;  %v2766_v61 = vpop.f32.mrb[23].mxu1  ;;  %v6185_v52 = vadd.f32 %v5994_v44, %v293_v8 }
 0x212   : > { %4761 = vst.msk [vmem:[#allocation2 + $0x90] sm:$0xff] %vm237_vm8, %v6174_v55  ;;  %v5661_v58 = vpack.c.bf16 %v4862_v60, %v4862_v60  ;;  %4759 = vst.msk [vmem:[#allocation2 + $0x80] sm:$0xff] %vm237_vm8, %v6176_v41  ;;  %v4801_v12 = vadd.f32 %v6176_v41, %v8700_v10  ;;  %v6180_v34 = vadd.f32 %v6179_v51, %v4650_v3  ;;  %v295_v55 = vld [vmem:[#allocation2 + $0xc8] sm:$0xff] }
 0x213   : > { %5022 = vst.msk [vmem:[%s8714_s12 + $0x30] sm:$0xf] %vm5009_vm9, %v5660_v29  ;;  %5025 = vst.msk [vmem:[%s8714_s12 + $0x3c] sm:$0xf] %vm5009_vm9, %v5663_v35  ;;  %v4835_v23 = vmul.f32 0.1, %v4803_v53  ;;  %v4804_v5 = vadd.f32 %v6178_v33, %v8700_v10  ;;  %v6187_v48 = vadd.f32 %v2766_v61, %v291_v14 }
 0x214   : > { %4762 = vst.msk [vmem:[#allocation2 + $0x98] sm:$0xff] %vm237_vm8, %v6178_v33  ;;  %v4833_v22 = vmul.f32 0.1, %v4801_v12  ;;  %4760 = vst.msk [vmem:[#allocation2 + $0x88] sm:$0xff] %vm237_vm8, %v6180_v34  ;;  %v4802_v38 = vadd.f32 %v6180_v34, %v8700_v10 }
 0x215   : > { %5023 = vst.msk [vmem:[%s8714_s12 + $0x34] sm:$0xf] %vm5009_vm9, %v5661_v58  ;;  %v4867_v62 = vmax.f32 %v4803_v53, %v4835_v23  ;;  %v4836_v32 = vmul.f32 0.1, %v4804_v5 }
 0x216   : > { %v4865_v9 = vmax.f32 %v4801_v12, %v4833_v22  ;;  %v4834_v45 = vmul.f32 0.1, %v4802_v38  ;;  %v6129_v16 = vpop.f32.mrb[20].mxu0  ;;  %v300_v22 = vld [vmem:[#allocation2 + $0xf0] sm:$0xff] }
 0x217   : > { %v5666_v28 = vpack.c.bf16 %v4867_v62, %v4867_v62  ;;  %v4868_v7 = vmax.f32 %v4804_v5, %v4836_v32  ;;  %v6182_v50 = vadd.f32 %v6181_v1, %v6129_v16  ;;  %v4663_v49 = vpop.f32.mrb[21].mxu0  ;;  %v298_v62 = vld [vmem:[#allocation2 + $0xe0] sm:$0xff] }
 0x218   : > { %v5664_v24 = vpack.c.bf16 %v4865_v9, %v4865_v9  ;;  %v4866_v37 = vmax.f32 %v4802_v38, %v4834_v45  ;;  %v6184_v43 = vadd.f32 %v6183_v36, %v4663_v49  ;;  %v6130_v40 = vpop.f32.mrb[22].mxu0  ;;  %v5997_v20 = vpop.f32.mrb[24].mxu1  ;;  %v301_v9 = vld [vmem:[#allocation2 + $0xf8] sm:$0xff] }
 0x219   : > { %5028 = vst.msk [vmem:[%s8714_s12 + $0x48] sm:$0xf] %vm5009_vm9, %v5666_v28  ;;  %v5667_v39 = vpack.c.bf16 %v4868_v7, %v4868_v7  ;;  %v4807_v17 = vadd.f32 %v6182_v50, %v8700_v10  ;;  %v6186_v54 = vadd.f32 %v6185_v52, %v6130_v40  ;;  %v4666_v30 = vpop.f32.mrb[23].mxu0  ;;  %v2779_v25 = vpop.f32.mrb[25].mxu1  ;;  %v6189_v46 = vadd.f32 %v5997_v20, %v296_v21 }
 0x21a   : > { %4765 = vst.msk [vmem:[#allocation2 + $0xb0] sm:$0xff] %vm237_vm8, %v6182_v50  ;;  %v5665_v6 = vpack.c.bf16 %v4866_v37, %v4866_v37  ;;  %4763 = vst.msk [vmem:[#allocation2 + $0xa0] sm:$0xff] %vm237_vm8, %v6184_v43  ;;  %v4805_v42 = vadd.f32 %v6184_v43, %v8700_v10  ;;  %v6188_v56 = vadd.f32 %v6187_v48, %v4666_v30  ;;  %v5998_v57 = vpop.f32.mrb[26].mxu1  ;;  %v299_v50 = vld [vmem:[#allocation2 + $0xe8] sm:$0xff] }
 0x21b   : > { %5026 = vst.msk [vmem:[%s8714_s12 + $0x40] sm:$0xf] %vm5009_vm9, %v5664_v24  ;;  %5029 = vst.msk [vmem:[%s8714_s12 + $0x4c] sm:$0xf] %vm5009_vm9, %v5667_v39  ;;  %v4839_v26 = vmul.f32 0.1, %v4807_v17  ;;  %v4808_v47 = vadd.f32 %v6186_v54, %v8700_v10  ;;  %v6191_v29 = vadd.f32 %v2779_v25, %v294_v27  ;;  %v6193_v35 = vadd.f32 %v5998_v57, %v297_v0 }
 0x21c   : > { %4766 = vst.msk [vmem:[#allocation2 + $0xb8] sm:$0xff] %vm237_vm8, %v6186_v54  ;;  %v4837_v59 = vmul.f32 0.1, %v4805_v42  ;;  %v2782_v31 = vpop.f32.mrb[27].mxu1  ;;  %4764 = vst.msk [vmem:[#allocation2 + $0xa8] sm:$0xff] %vm237_vm8, %v6188_v56  ;;  %v4806_v2 = vadd.f32 %v6188_v56, %v8700_v10 }
 0x21d   : > { %5027 = vst.msk [vmem:[%s8714_s12 + $0x44] sm:$0xf] %vm5009_vm9, %v5665_v6  ;;  %v4871_v4 = vmax.f32 %v4807_v17, %v4839_v26  ;;  %v4840_v13 = vmul.f32 0.1, %v4808_v47  ;;  %v6195_v58 = vadd.f32 %v2782_v31, %v295_v55 }
 0x21e   : > { %v4869_v51 = vmax.f32 %v4805_v42, %v4837_v59  ;;  %v4838_v60 = vmul.f32 0.1, %v4806_v2  ;;  %v6133_v41 = vpop.f32.mrb[24].mxu0 }
 0x21f   : > { %v5670_v15 = vpack.c.bf16 %v4871_v4, %v4871_v4  ;;  %v4872_v63 = vmax.f32 %v4808_v47, %v4840_v13  ;;  %v6190_v53 = vadd.f32 %v6189_v46, %v6133_v41  ;;  %v4679_v33 = vpop.f32.mrb[25].mxu0 }
 0x220   : > { %v5668_v3 = vpack.c.bf16 %v4869_v51, %v4869_v51  ;;  %v4870_v18 = vmax.f32 %v4806_v2, %v4838_v60  ;;  %v6192_v11 = vadd.f32 %v6191_v29, %v4679_v33  ;;  %v6134_v12 = vpop.f32.mrb[26].mxu0  ;;  %v6001_v19 = vpop.f32.mrb[28].mxu1 }
 0x221   : > { %5032 = vst.msk [vmem:[%s8714_s12 + $0x58] sm:$0xf] %vm5009_vm9, %v5670_v15  ;;  %v5671_v34 = vpack.c.bf16 %v4872_v63, %v4872_v63  ;;  %v4811_v23 = vadd.f32 %v6190_v53, %v8700_v10  ;;  %v6194_v44 = vadd.f32 %v6193_v35, %v6134_v12  ;;  %v4682_v5 = vpop.f32.mrb[27].mxu0  ;;  %v2795_v61 = vpop.f32.mrb[29].mxu1  ;;  %v6197_v52 = vadd.f32 %v6001_v19, %v300_v22 }
 0x222   : > { %4769 = vst.msk [vmem:[#allocation2 + $0xd0] sm:$0xff] %vm237_vm8, %v6190_v53  ;;  %v5669_v8 = vpack.c.bf16 %v4870_v18, %v4870_v18  ;;  %4767 = vst.msk [vmem:[#allocation2 + $0xc0] sm:$0xff] %vm237_vm8, %v6192_v11  ;;  %v4809_v38 = vadd.f32 %v6192_v11, %v8700_v10  ;;  %v6196_v1 = vadd.f32 %v6195_v58, %v4682_v5  ;;  %v6002_v32 = vpop.f32.mrb[30].mxu1 }
 0x223   : > { %5030 = vst.msk [vmem:[%s8714_s12 + $0x50] sm:$0xf] %vm5009_vm9, %v5668_v3  ;;  %5033 = vst.msk [vmem:[%s8714_s12 + $0x5c] sm:$0xf] %vm5009_vm9, %v5671_v34  ;;  %v4843_v14 = vmul.f32 0.1, %v4811_v23  ;;  %v4812_v36 = vadd.f32 %v6194_v44, %v8700_v10  ;;  %v6199_v24 = vadd.f32 %v2795_v61, %v298_v62  ;;  %v6201_v39 = vadd.f32 %v6002_v32, %v301_v9 }
 0x224   : > { %4770 = vst.msk [vmem:[#allocation2 + $0xd8] sm:$0xff] %vm237_vm8, %v6194_v44  ;;  %v4841_v45 = vmul.f32 0.1, %v4809_v38  ;;  %v2798_v16 = vpop.f32.mrb[31].mxu1  ;;  %4768 = vst.msk [vmem:[#allocation2 + $0xc8] sm:$0xff] %vm237_vm8, %v6196_v1  ;;  %v4810_v28 = vadd.f32 %v6196_v1, %v8700_v10 }
 0x225   : > { %5031 = vst.msk [vmem:[%s8714_s12 + $0x54] sm:$0xf] %vm5009_vm9, %v5669_v8  ;;  %v4875_v7 = vmax.f32 %v4811_v23, %v4843_v14  ;;  %v4844_v49 = vmul.f32 0.1, %v4812_v36  ;;  %v6203_v6 = vadd.f32 %v2798_v16, %v299_v50 }
 0x226   : > { %v4873_v48 = vmax.f32 %v4809_v38, %v4841_v45  ;;  %v4842_v37 = vmul.f32 0.1, %v4810_v28  ;;  %v6137_v43 = vpop.f32.mrb[28].mxu0 }
 0x227   : > { %v5674_v40 = vpack.c.bf16 %v4875_v7, %v4875_v7  ;;  %v4876_v20 = vmax.f32 %v4812_v36, %v4844_v49  ;;  %v6198_v17 = vadd.f32 %v6197_v52, %v6137_v43  ;;  %v4695_v54 = vpop.f32.mrb[29].mxu0 }
 0x228   : > { %v5672_v30 = vpack.c.bf16 %v4873_v48, %v4873_v48  ;;  %v4874_v21 = vmax.f32 %v4810_v28, %v4842_v37  ;;  %v6200_v25 = vadd.f32 %v6199_v24, %v4695_v54  ;;  %v6138_v42 = vpop.f32.mrb[30].mxu0 }
 0x229   : > { %5036 = vst.msk [vmem:[%s8714_s12 + $0x68] sm:$0xf] %vm5009_vm9, %v5674_v40  ;;  %v5675_v56 = vpack.c.bf16 %v4876_v20, %v4876_v20  ;;  %v4815_v27 = vadd.f32 %v6198_v17, %v8700_v10  ;;  %v6202_v26 = vadd.f32 %v6201_v39, %v6138_v42  ;;  %v4698_v57 = vpop.f32.mrb[31].mxu0 }
 0x22a   : > { %4773 = vst.msk [vmem:[#allocation2 + $0xf0] sm:$0xff] %vm237_vm8, %v6198_v17  ;;  %v5673_v47 = vpack.c.bf16 %v4874_v21, %v4874_v21  ;;  %4771 = vst.msk [vmem:[#allocation2 + $0xe0] sm:$0xff] %vm237_vm8, %v6200_v25  ;;  %v4813_v0 = vadd.f32 %v6200_v25, %v8700_v10  ;;  %v6204_v59 = vadd.f32 %v6203_v6, %v4698_v57 }
 0x22b   : > { %5034 = vst.msk [vmem:[%s8714_s12 + $0x60] sm:$0xf] %vm5009_vm9, %v5672_v30  ;;  %5037 = vst.msk [vmem:[%s8714_s12 + $0x6c] sm:$0xf] %vm5009_vm9, %v5675_v56  ;;  %v4847_v31 = vmul.f32 0.1, %v4815_v27  ;;  %v4816_v2 = vadd.f32 %v6202_v26, %v8700_v10 }
 0x22c   : > { %4774 = vst.msk [vmem:[#allocation2 + $0xf8] sm:$0xff] %vm237_vm8, %v6202_v26  ;;  %v4845_v46 = vmul.f32 0.1, %v4813_v0  ;;  %4772 = vst.msk [vmem:[#allocation2 + $0xe8] sm:$0xff] %vm237_vm8, %v6204_v59  ;;  %v4814_v4 = vadd.f32 %v6204_v59, %v8700_v10 }
 0x22d   : > { %5035 = vst.msk [vmem:[%s8714_s12 + $0x64] sm:$0xf] %vm5009_vm9, %v5673_v47  ;;  %v4879_v55 = vmax.f32 %v4815_v27, %v4847_v31  ;;  %v4848_v13 = vmul.f32 0.1, %v4816_v2 }
 0x22e   : > { %v4877_v29 = vmax.f32 %v4813_v0, %v4845_v46  ;;  %v4846_v51 = vmul.f32 0.1, %v4814_v4 }
 0x22f   : > { %v5678_v60 = vpack.c.bf16 %v4879_v55, %v4879_v55  ;;  %v4880_v41 = vmax.f32 %v4816_v2, %v4848_v13 }
 0x230   : > { %v5676_v15 = vpack.c.bf16 %v4877_v29, %v4877_v29  ;;  %v4878_v35 = vmax.f32 %v4814_v4, %v4846_v51 }
 0x231   : > { %5040 = vst.msk [vmem:[%s8714_s12 + $0x78] sm:$0xf] %vm5009_vm9, %v5678_v60  ;;  %v5679_v63 = vpack.c.bf16 %v4880_v41, %v4880_v41 }
 0x232   : > { %5038 = vst.msk [vmem:[%s8714_s12 + $0x70] sm:$0xf] %vm5009_vm9, %v5676_v15  ;;  %v5677_v53 = vpack.c.bf16 %v4878_v35, %v4878_v35 }
 0x233   : > { %5041 = vst.msk [vmem:[%s8714_s12 + $0x7c] sm:$0xf] %vm5009_vm9, %v5679_v63 }
 0x234   : > { %5039 = vst.msk [vmem:[%s8714_s12 + $0x74] sm:$0xf] %vm5009_vm9, %v5677_v53 }
 0x235 PF: > { %s13_s14 = sadd.s32 1, %s6635_s14   ;;  %s9037_s12 = smov %s6631_s13 }
 0x236   : > { %p10_p5 = scmp.ge.s32.totalorder %s13_s14, 4   ;;  %s9038_s13 = smov %s9040_s15 }
 0x238   :  { %12 = sbr.rel (!%p10_p5) target bundleno = 2 (0x2), region = 84 }

</bundles_post_ra>
